<compile_context>
chip_gen: v6e
topology: v6e:2x2x1
jax: 0.10.0
libtpu: 0.0.40
codegen_flags: <defaults>
</compile_context>

<pallas_src>
import functools

import jax
import jax.numpy as jnp
from jax.experimental import pallas as pl
from jax.experimental.pallas import tpu as pltpu


def _round_up(x, m):
    return (x + m - 1) // m * m


# --------------------------------------------------------------------------- kernel
def tsl_kernel(idx_ref, xcont_ref, tab_ref, tabsq_ref, wconv_ref, bconv_ref,
               w1_ref, b1_ref, w2_ref, b2_ref, out_ref, h_s,
               *, T, E, n_cont):
    TB, NT = idx_ref.shape                               # NT = n_cat * T
    Vtot, d_cat = tab_ref.shape
    d_cont = n_cont * E
    D = d_cat + d_cont
    T4 = T + 4
    inv_T = 1.0 / T

    # Lane-dense decoder-input slab; padded lanes stay exactly zero.
    h_s[...] = jnp.zeros_like(h_s)

    # ---- categorical: one-hot counts over (feature, time), one-pass stats ---------
    #   sum_t emb[idx_t]   == counts @ table
    #   sum_t emb[idx_t]^2 == counts @ table^2   (tables are vocab/column disjoint)
    idx = idx_ref[...]                                   # (TB, NT) int32, vocab-offset
    iota_v = jax.lax.broadcasted_iota(jnp.int32, (TB, Vtot), 1)
    counts = jnp.zeros((TB, Vtot), jnp.float32)
    for t in range(NT):                                  # static unroll; NT is small here
        counts = counts + (idx[:, t:t + 1] == iota_v).astype(jnp.float32)
    sum_cat = jnp.dot(counts, tab_ref[...], preferred_element_type=jnp.float32)
    ssq_cat = jnp.dot(counts, tabsq_ref[...], preferred_element_type=jnp.float32)
    mean_cat = sum_cat * inv_T
    var_cat = jnp.maximum(ssq_cat * inv_T - mean_cat * mean_cat, 0.0)
    h_s[:, 0:d_cat] = mean_cat
    h_s[:, D:D + d_cat] = jnp.sqrt(var_cat)

    # ---- continuous: Conv1d(k=5, pad=2) as 5 shifted scalar-MACs per channel ------
    # One-pass sum / sum-of-squares over time; conv bias only shifts the mean
    # (std is shift-invariant), added once below as a vector op.
    xc = xcont_ref[...].astype(jnp.float32)              # bf16 -> f32 on load
    for j in range(n_cont):
        base = j * T4
        taps = [xc[:, base + k: base + k + T] for k in range(5)]   # 5 x (TB, T)
        for e in range(E):
            row = j * E + e
            acc = wconv_ref[row, 0] * taps[0]
            for k in range(1, 5):
                acc = acc + wconv_ref[row, k] * taps[k]            # (TB, T)
            s = jnp.sum(acc, axis=1, keepdims=True) * inv_T        # E[conv] - bias
            q = jnp.sum(acc * acc, axis=1, keepdims=True) * inv_T  # E[(conv - bias)^2]
            var = jnp.maximum(q - s * s, 0.0)
            col = d_cat + row
            h_s[:, col:col + 1] = s
            h_s[:, D + col:D + col + 1] = jnp.sqrt(var)
    h_s[:, d_cat:D] = h_s[:, d_cat:D] + bconv_ref[...]   # add conv bias to the means

    # ---- decoder: Linear -> ReLU -> Dropout(0.3) -> Linear (dropout = identity) ---
    # TODO(synk): cast h / w1 / w2 to bf16 (f32 accumulate) when ~1e-3 accuracy is OK.
    h = h_s[...]
    h1 = jnp.maximum(jnp.dot(h, w1_ref[...], preferred_element_type=jnp.float32)
                     + b1_ref[...], 0.0)
    out_ref[...] = (jnp.dot(h1, w2_ref[...], preferred_element_type=jnp.float32)
                    + b2_ref[...])


# --------------------------------------------------------------------------- wrapper
def timeseries_linear_forward(batch, params, *, cat_names, cont_names,
                              emb_dim, hidden_size, output_size):
    E = emb_dim
    n_cat, n_cont = len(cat_names), len(cont_names)
    d_cat, d_cont = n_cat * E, n_cont * E
    D = d_cat + d_cont
    hidden2 = params["w1"].shape[1]
    B, T = batch[cat_names[0]].shape
    T4 = T + 4

    # -- categorical: int32 indices offset into a shared vocab (tiny HBM stream) ----
    offs, vtot = [], 0
    for n in cat_names:
        offs.append(vtot)
        vtot += params["emb"][n].shape[0]
    idx = jnp.concatenate(
        [batch[n].astype(jnp.int32) + off for n, off in zip(cat_names, offs)],
        axis=1)                                                      # (B, n_cat*T)
    # Block-diagonal stacked embedding table + elementwise square (resident weights).
    tab = jnp.zeros((vtot, d_cat), jnp.float32)
    for j, (n, off) in enumerate(zip(cat_names, offs)):
        tab = tab.at[off:off + params["emb"][n].shape[0], j * E:(j + 1) * E].set(
            params["emb"][n])
    tabsq = tab * tab

    # -- continuous: bf16 activations, zero-padded, feature-major flat layout -------
    xcont = jnp.stack([batch[n].astype(jnp.float32) for n in cont_names], axis=1)
    xcont = jnp.pad(xcont, ((0, 0), (0, 0), (2, 2))).astype(jnp.bfloat16)
    xcont = xcont.reshape(B, n_cont * T4)                            # (B, n_cont*(T+4))

    # Conv weights / biases (tiny, resident; scalars broadcast inside the kernel).
    wconv = jnp.concatenate(
        [params["conv_w"][n][:, 0, :] for n in cont_names], axis=0)  # (d_cont, 5)
    bconv = jnp.concatenate([params["conv_b"][n] for n in cont_names])[None, :]

    # Lane-padded decoder weights (padded rows/cols are zero so they never leak).
    lanes = _round_up(max(2 * D, 128), 128)
    Hp = _round_up(max(hidden2, 128), 128)
    Op = _round_up(max(output_size, 128), 128)
    w1p = jnp.zeros((lanes, Hp), jnp.float32).at[:2 * D, :hidden2].set(params["w1"])
    b1p = jnp.zeros((1, Hp), jnp.float32).at[:, :hidden2].set(params["b1"])
    w2p = jnp.zeros((Hp, Op), jnp.float32).at[:hidden2, :output_size].set(params["w2"])
    b2p = jnp.zeros((1, Op), jnp.float32).at[:, :output_size].set(params["b2"])

    # -- batch tiling: big TB for 256x256 MXU, 16-row rounding (bf16 sublane tile), --
    # -- and a >=2-step grid when B allows so both v7x TensorCores get work.        --
    TB = min(256, _round_up(max(B, 1), 16))
    if B > 16 and _round_up(B, TB) == TB:                 # would be a single grid step
        TB = _round_up((B + 1) // 2, 16)
    B_pad = _round_up(B, TB)
    idx = jnp.pad(idx, ((0, B_pad - B), (0, 0)))
    xcont = jnp.pad(xcont, ((0, B_pad - B), (0, 0)))

    NT = n_cat * T
    num_tiles = B_pad // TB
    flops = num_tiles * (2 * TB * NT * vtot                # one-hot counts
                         + 4 * TB * vtot * d_cat           # counts @ {tab, tab^2}
                         + 12 * TB * T * d_cont            # shifted-MAC conv + stats
                         + 2 * TB * lanes * Hp + 2 * TB * Hp * Op)
    bytes_accessed = (4 * B_pad * NT + 2 * B_pad * n_cont * T4
                      + 4 * (2 * vtot * d_cat + 6 * d_cont
                             + lanes * Hp + Hp + Hp * Op + Op)
                      + 4 * B_pad * Op)

    kernel = functools.partial(tsl_kernel, T=T, E=E, n_cont=n_cont)

    grid_spec = pltpu.PrefetchScalarGridSpec(
        num_scalar_prefetch=0,
        grid=(num_tiles,),
        in_specs=[
            pl.BlockSpec((TB, NT), lambda i: (i, 0)),               # int32 cat indices
            pl.BlockSpec((TB, n_cont * T4), lambda i: (i, 0)),      # bf16 continuous
            pl.BlockSpec((vtot, d_cat), lambda i: (0, 0)),          # resident emb table
            pl.BlockSpec((vtot, d_cat), lambda i: (0, 0)),          # resident emb table^2
            pl.BlockSpec((d_cont, 5), lambda i: (0, 0)),            # conv taps
            pl.BlockSpec((1, d_cont), lambda i: (0, 0)),            # conv bias
            pl.BlockSpec((lanes, Hp), lambda i: (0, 0)),            # decoder weights
            pl.BlockSpec((1, Hp), lambda i: (0, 0)),
            pl.BlockSpec((Hp, Op), lambda i: (0, 0)),
            pl.BlockSpec((1, Op), lambda i: (0, 0)),
        ],
        out_specs=pl.BlockSpec((TB, Op), lambda i: (i, 0)),         # lane-dense output
        scratch_shapes=[pltpu.VMEM((TB, lanes), jnp.float32)],      # decoder-input slab
    )

    out = pl.pallas_call(
        kernel,
        out_shape=jax.ShapeDtypeStruct((B_pad, Op), jnp.float32),
        grid_spec=grid_spec,
        compiler_params=pltpu.CompilerParams(
            dimension_semantics=("parallel",),
            vmem_limit_bytes=32 * 1024 * 1024),
        cost_estimate=pl.CostEstimate(flops=int(flops), transcendentals=0,
                                      bytes_accessed=int(bytes_accessed)),
    )(idx, xcont, tab, tabsq, wconv, bconv, w1p, b1p, w2p, b2p)

    return {"preds": out[:B, :output_size]}


# --------------------------------------------------------------------------- reference
def reference_forward(batch, params, *, cat_names, cont_names,
                      emb_dim, hidden_size, output_size):
    feats = []
    for name in cat_names:
        feats.append(params["emb"][name][batch[name].astype(jnp.int32)])
    for name in cont_names:
        # Mirror the kernel's bf16 activation transfer for the continuous inputs.
        x = batch[name].astype(jnp.bfloat16).astype(jnp.float32)     # (B, T)
        xp = jnp.pad(x, ((0, 0), (2, 2)))
        w = params["conv_w"][name]                                    # (E, 1, 5)
        y = sum(xp[:, None, k:k + x.shape[1]] * w[None, :, 0, k:k + 1] for k in range(5))
        y = y + params["conv_b"][name][None, :, None]                 # (B, E, T)
        feats.append(jnp.transpose(y, (0, 2, 1)))                     # (B, T, E)
    features = jnp.concatenate(feats, axis=2)                         # (B, T, D)
    mean = features.mean(axis=1)
    std = jnp.sqrt(((features - mean[:, None, :]) ** 2).mean(axis=1)) # unbiased=False
    h = jnp.concatenate([mean, std], axis=-1)
    h1 = jnp.maximum(h @ params["w1"] + params["b1"], 0.0)
    return h1 @ params["w2"] + params["b2"]


# --------------------------------------------------------------------------- main
if __name__ == "__main__":
    B, T = 2, 16
    emb_dim = 8                                    # embeddings_hidden
    hidden_size, output_size = 32, 4
    cat_cardinalities = [("cat_a", 5), ("cat_b", 7)]
    continious = ["cont_a", "cont_b"]
    cat_names = [n for n, _ in cat_cardinalities]
    n_feats = len(cat_cardinalities) + len(continious)
    input_size = n_feats * emb_dim * 2             # decoder input size
    hidden2 = hidden_size // 2

    key = jax.random.PRNGKey(0)
    keys = iter(jax.random.split(key, 32))

    params = {"emb": {}, "conv_w": {}, "conv_b": {}}
    for name, card in cat_cardinalities:
        params["emb"][name] = 0.1 * jax.random.normal(next(keys), (card + 1, emb_dim),
                                                      jnp.float32)
    for name in continious:
        params["conv_w"][name] = 0.2 * jax.random.normal(next(keys), (emb_dim, 1, 5),
                                                         jnp.float32)
        params["conv_b"][name] = 0.05 * jax.random.normal(next(keys), (emb_dim,),
                                                          jnp.float32)
    params["w1"] = 0.1 * jax.random.normal(next(keys), (input_size, hidden2), jnp.float32)
    params["b1"] = 0.05 * jax.random.normal(next(keys), (1, hidden2), jnp.float32)
    params["w2"] = 0.1 * jax.random.normal(next(keys), (hidden2, output_size), jnp.float32)
    params["b2"] = 0.05 * jax.random.normal(next(keys), (1, output_size), jnp.float32)

    batch = {}
    for name, card in cat_cardinalities:
        batch[name] = jax.random.randint(next(keys), (B, T), 0, card + 1, jnp.int32)
    for name in continious:
        batch[name] = jax.random.normal(next(keys), (B, T), jnp.float32)

    cfg = dict(cat_names=cat_names, cont_names=continious, emb_dim=emb_dim,
               hidden_size=hidden_size, output_size=output_size)

    out = timeseries_linear_forward(batch, params, **cfg)
    preds = jax.block_until_ready(out["preds"])

    ref = jax.block_until_ready(reference_forward(batch, params, **cfg))
    assert preds.shape == (B, output_size)
    assert jnp.allclose(preds, ref, atol=1e-4, rtol=1e-4), (preds, ref)

    print("KERNEL_OK")
</pallas_src>

<mosaic_0001>
module attributes {stable_mosaic.version = 11 : i64} {
  func.func @tsl_kernel(%arg0: i32, %arg1: memref<16x32xi32, #tpu.memory_space<vmem>>, %arg2: memref<16x40xbf16, #tpu.memory_space<vmem>>, %arg3: memref<14x16xf32, #tpu.memory_space<vmem>>, %arg4: memref<14x16xf32, #tpu.memory_space<vmem>>, %arg5: memref<16x5xf32, #tpu.memory_space<vmem>>, %arg6: memref<1x16xf32, #tpu.memory_space<vmem>>, %arg7: memref<128x128xf32, #tpu.memory_space<vmem>>, %arg8: memref<1x128xf32, #tpu.memory_space<vmem>>, %arg9: memref<128x128xf32, #tpu.memory_space<vmem>>, %arg10: memref<1x128xf32, #tpu.memory_space<vmem>>, %arg11: memref<16x128xf32, #tpu.memory_space<vmem>>, %arg12: memref<16x128xf32, #tpu.memory_space<vmem>>) attributes {dimension_semantics = [#tpu.dimension_semantics<parallel>], iteration_bounds = array<i64: 1>, scalar_prefetch = 0 : i64, scratch_operands = 1 : i64, tpu.core_type = #tpu.core_type<tc>, window_params = [{transform_indices = @transform_0, window_bounds = array<i64: 16, 32>}, {transform_indices = @transform_1, window_bounds = array<i64: 16, 40>}, {pipeline_mode = #tpu.pipeline_mode<synchronous>, transform_indices = @transform_2, window_bounds = array<i64: 14, 16>}, {pipeline_mode = #tpu.pipeline_mode<synchronous>, transform_indices = @transform_3, window_bounds = array<i64: 14, 16>}, {pipeline_mode = #tpu.pipeline_mode<synchronous>, transform_indices = @transform_4, window_bounds = array<i64: 16, 5>}, {pipeline_mode = #tpu.pipeline_mode<synchronous>, transform_indices = @transform_5, window_bounds = array<i64: 1, 16>}, {pipeline_mode = #tpu.pipeline_mode<synchronous>, transform_indices = @transform_6, window_bounds = array<i64: 128, 128>}, {pipeline_mode = #tpu.pipeline_mode<synchronous>, transform_indices = @transform_7, window_bounds = array<i64: 1, 128>}, {pipeline_mode = #tpu.pipeline_mode<synchronous>, transform_indices = @transform_8, window_bounds = array<i64: 128, 128>}, {pipeline_mode = #tpu.pipeline_mode<synchronous>, transform_indices = @transform_9, window_bounds = array<i64: 1, 128>}, {transform_indices = @transform_10, window_bounds = array<i64: 16, 128>}]} {
    %cst = arith.constant 0.000000e+00 : f32
    %0 = vector.broadcast %cst : f32 to vector<16x128xf32>
    %c0 = arith.constant 0 : index
    %c0_0 = arith.constant 0 : index
    %1 = vector.load %arg12[%c0, %c0_0] : memref<16x128xf32, #tpu.memory_space<vmem>>, vector<16x128xf32>
    tpu.vector_store %arg12[%c0, %c0_0], %0 {strides = array<i32>} : memref<16x128xf32, #tpu.memory_space<vmem>>, vector<16x128xf32>,
    %c0_1 = arith.constant 0 : index
    %c0_2 = arith.constant 0 : index
    %2 = vector.load %arg1[%c0_1, %c0_2] : memref<16x32xi32, #tpu.memory_space<vmem>>, vector<16x32xi32>
    %3 = tpu.iota {dimensions = array<i32: 1>} : vector<16x14xi32>
    %cst_3 = arith.constant 0.000000e+00 : f32
    %4 = vector.broadcast %cst_3 : f32 to vector<16x14xf32>
    %5 = vector.extract_strided_slice %2 {offsets = [0, 0], sizes = [16, 1], strides = [1, 1]} : vector<16x32xi32> to vector<16x1xi32>
    %6 = vector.broadcast %5 : vector<16x1xi32> to vector<16x14xi32>
    %7 = arith.cmpi eq, %6, %3 : vector<16x14xi32>
    %8 = arith.extui %7 : vector<16x14xi1> to vector<16x14xi32>
    %9 = arith.sitofp %8 : vector<16x14xi32> to vector<16x14xf32>
    %10 = arith.addf %4, %9 : vector<16x14xf32>
    %11 = vector.extract_strided_slice %2 {offsets = [0, 1], sizes = [16, 1], strides = [1, 1]} : vector<16x32xi32> to vector<16x1xi32>
    %12 = vector.broadcast %11 : vector<16x1xi32> to vector<16x14xi32>
    %13 = arith.cmpi eq, %12, %3 : vector<16x14xi32>
    %14 = arith.extui %13 : vector<16x14xi1> to vector<16x14xi32>
    %15 = arith.sitofp %14 : vector<16x14xi32> to vector<16x14xf32>
    %16 = arith.addf %10, %15 : vector<16x14xf32>
    %17 = vector.extract_strided_slice %2 {offsets = [0, 2], sizes = [16, 1], strides = [1, 1]} : vector<16x32xi32> to vector<16x1xi32>
    %18 = vector.broadcast %17 : vector<16x1xi32> to vector<16x14xi32>
    %19 = arith.cmpi eq, %18, %3 : vector<16x14xi32>
    %20 = arith.extui %19 : vector<16x14xi1> to vector<16x14xi32>
    %21 = arith.sitofp %20 : vector<16x14xi32> to vector<16x14xf32>
    %22 = arith.addf %16, %21 : vector<16x14xf32>
    %23 = vector.extract_strided_slice %2 {offsets = [0, 3], sizes = [16, 1], strides = [1, 1]} : vector<16x32xi32> to vector<16x1xi32>
    %24 = vector.broadcast %23 : vector<16x1xi32> to vector<16x14xi32>
    %25 = arith.cmpi eq, %24, %3 : vector<16x14xi32>
    %26 = arith.extui %25 : vector<16x14xi1> to vector<16x14xi32>
    %27 = arith.sitofp %26 : vector<16x14xi32> to vector<16x14xf32>
    %28 = arith.addf %22, %27 : vector<16x14xf32>
    %29 = vector.extract_strided_slice %2 {offsets = [0, 4], sizes = [16, 1], strides = [1, 1]} : vector<16x32xi32> to vector<16x1xi32>
    %30 = vector.broadcast %29 : vector<16x1xi32> to vector<16x14xi32>
    %31 = arith.cmpi eq, %30, %3 : vector<16x14xi32>
    %32 = arith.extui %31 : vector<16x14xi1> to vector<16x14xi32>
    %33 = arith.sitofp %32 : vector<16x14xi32> to vector<16x14xf32>
    %34 = arith.addf %28, %33 : vector<16x14xf32>
    %35 = vector.extract_strided_slice %2 {offsets = [0, 5], sizes = [16, 1], strides = [1, 1]} : vector<16x32xi32> to vector<16x1xi32>
    %36 = vector.broadcast %35 : vector<16x1xi32> to vector<16x14xi32>
    %37 = arith.cmpi eq, %36, %3 : vector<16x14xi32>
    %38 = arith.extui %37 : vector<16x14xi1> to vector<16x14xi32>
    %39 = arith.sitofp %38 : vector<16x14xi32> to vector<16x14xf32>
    %40 = arith.addf %34, %39 : vector<16x14xf32>
    %41 = vector.extract_strided_slice %2 {offsets = [0, 6], sizes = [16, 1], strides = [1, 1]} : vector<16x32xi32> to vector<16x1xi32>
    %42 = vector.broadcast %41 : vector<16x1xi32> to vector<16x14xi32>
    %43 = arith.cmpi eq, %42, %3 : vector<16x14xi32>
    %44 = arith.extui %43 : vector<16x14xi1> to vector<16x14xi32>
    %45 = arith.sitofp %44 : vector<16x14xi32> to vector<16x14xf32>
    %46 = arith.addf %40, %45 : vector<16x14xf32>
    %47 = vector.extract_strided_slice %2 {offsets = [0, 7], sizes = [16, 1], strides = [1, 1]} : vector<16x32xi32> to vector<16x1xi32>
    %48 = vector.broadcast %47 : vector<16x1xi32> to vector<16x14xi32>
    %49 = arith.cmpi eq, %48, %3 : vector<16x14xi32>
    %50 = arith.extui %49 : vector<16x14xi1> to vector<16x14xi32>
    %51 = arith.sitofp %50 : vector<16x14xi32> to vector<16x14xf32>
    %52 = arith.addf %46, %51 : vector<16x14xf32>
    %53 = vector.extract_strided_slice %2 {offsets = [0, 8], sizes = [16, 1], strides = [1, 1]} : vector<16x32xi32> to vector<16x1xi32>
    %54 = vector.broadcast %53 : vector<16x1xi32> to vector<16x14xi32>
    %55 = arith.cmpi eq, %54, %3 : vector<16x14xi32>
    %56 = arith.extui %55 : vector<16x14xi1> to vector<16x14xi32>
    %57 = arith.sitofp %56 : vector<16x14xi32> to vector<16x14xf32>
    %58 = arith.addf %52, %57 : vector<16x14xf32>
    %59 = vector.extract_strided_slice %2 {offsets = [0, 9], sizes = [16, 1], strides = [1, 1]} : vector<16x32xi32> to vector<16x1xi32>
    %60 = vector.broadcast %59 : vector<16x1xi32> to vector<16x14xi32>
    %61 = arith.cmpi eq, %60, %3 : vector<16x14xi32>
    %62 = arith.extui %61 : vector<16x14xi1> to vector<16x14xi32>
    %63 = arith.sitofp %62 : vector<16x14xi32> to vector<16x14xf32>
    %64 = arith.addf %58, %63 : vector<16x14xf32>
    %65 = vector.extract_strided_slice %2 {offsets = [0, 10], sizes = [16, 1], strides = [1, 1]} : vector<16x32xi32> to vector<16x1xi32>
    %66 = vector.broadcast %65 : vector<16x1xi32> to vector<16x14xi32>
    %67 = arith.cmpi eq, %66, %3 : vector<16x14xi32>
    %68 = arith.extui %67 : vector<16x14xi1> to vector<16x14xi32>
    %69 = arith.sitofp %68 : vector<16x14xi32> to vector<16x14xf32>
    %70 = arith.addf %64, %69 : vector<16x14xf32>
    %71 = vector.extract_strided_slice %2 {offsets = [0, 11], sizes = [16, 1], strides = [1, 1]} : vector<16x32xi32> to vector<16x1xi32>
    %72 = vector.broadcast %71 : vector<16x1xi32> to vector<16x14xi32>
    %73 = arith.cmpi eq, %72, %3 : vector<16x14xi32>
    %74 = arith.extui %73 : vector<16x14xi1> to vector<16x14xi32>
    %75 = arith.sitofp %74 : vector<16x14xi32> to vector<16x14xf32>
    %76 = arith.addf %70, %75 : vector<16x14xf32>
    %77 = vector.extract_strided_slice %2 {offsets = [0, 12], sizes = [16, 1], strides = [1, 1]} : vector<16x32xi32> to vector<16x1xi32>
    %78 = vector.broadcast %77 : vector<16x1xi32> to vector<16x14xi32>
    %79 = arith.cmpi eq, %78, %3 : vector<16x14xi32>
    %80 = arith.extui %79 : vector<16x14xi1> to vector<16x14xi32>
    %81 = arith.sitofp %80 : vector<16x14xi32> to vector<16x14xf32>
    %82 = arith.addf %76, %81 : vector<16x14xf32>
    %83 = vector.extract_strided_slice %2 {offsets = [0, 13], sizes = [16, 1], strides = [1, 1]} : vector<16x32xi32> to vector<16x1xi32>
    %84 = vector.broadcast %83 : vector<16x1xi32> to vector<16x14xi32>
    %85 = arith.cmpi eq, %84, %3 : vector<16x14xi32>
    %86 = arith.extui %85 : vector<16x14xi1> to vector<16x14xi32>
    %87 = arith.sitofp %86 : vector<16x14xi32> to vector<16x14xf32>
    %88 = arith.addf %82, %87 : vector<16x14xf32>
    %89 = vector.extract_strided_slice %2 {offsets = [0, 14], sizes = [16, 1], strides = [1, 1]} : vector<16x32xi32> to vector<16x1xi32>
    %90 = vector.broadcast %89 : vector<16x1xi32> to vector<16x14xi32>
    %91 = arith.cmpi eq, %90, %3 : vector<16x14xi32>
    %92 = arith.extui %91 : vector<16x14xi1> to vector<16x14xi32>
    %93 = arith.sitofp %92 : vector<16x14xi32> to vector<16x14xf32>
    %94 = arith.addf %88, %93 : vector<16x14xf32>
    %95 = vector.extract_strided_slice %2 {offsets = [0, 15], sizes = [16, 1], strides = [1, 1]} : vector<16x32xi32> to vector<16x1xi32>
    %96 = vector.broadcast %95 : vector<16x1xi32> to vector<16x14xi32>
    %97 = arith.cmpi eq, %96, %3 : vector<16x14xi32>
    %98 = arith.extui %97 : vector<16x14xi1> to vector<16x14xi32>
    %99 = arith.sitofp %98 : vector<16x14xi32> to vector<16x14xf32>
    %100 = arith.addf %94, %99 : vector<16x14xf32>
    %101 = vector.extract_strided_slice %2 {offsets = [0, 16], sizes = [16, 1], strides = [1, 1]} : vector<16x32xi32> to vector<16x1xi32>
    %102 = vector.broadcast %101 : vector<16x1xi32> to vector<16x14xi32>
    %103 = arith.cmpi eq, %102, %3 : vector<16x14xi32>
    %104 = arith.extui %103 : vector<16x14xi1> to vector<16x14xi32>
    %105 = arith.sitofp %104 : vector<16x14xi32> to vector<16x14xf32>
    %106 = arith.addf %100, %105 : vector<16x14xf32>
    %107 = vector.extract_strided_slice %2 {offsets = [0, 17], sizes = [16, 1], strides = [1, 1]} : vector<16x32xi32> to vector<16x1xi32>
    %108 = vector.broadcast %107 : vector<16x1xi32> to vector<16x14xi32>
    %109 = arith.cmpi eq, %108, %3 : vector<16x14xi32>
    %110 = arith.extui %109 : vector<16x14xi1> to vector<16x14xi32>
    %111 = arith.sitofp %110 : vector<16x14xi32> to vector<16x14xf32>
    %112 = arith.addf %106, %111 : vector<16x14xf32>
    %113 = vector.extract_strided_slice %2 {offsets = [0, 18], sizes = [16, 1], strides = [1, 1]} : vector<16x32xi32> to vector<16x1xi32>
    %114 = vector.broadcast %113 : vector<16x1xi32> to vector<16x14xi32>
    %115 = arith.cmpi eq, %114, %3 : vector<16x14xi32>
    %116 = arith.extui %115 : vector<16x14xi1> to vector<16x14xi32>
    %117 = arith.sitofp %116 : vector<16x14xi32> to vector<16x14xf32>
    %118 = arith.addf %112, %117 : vector<16x14xf32>
    %119 = vector.extract_strided_slice %2 {offsets = [0, 19], sizes = [16, 1], strides = [1, 1]} : vector<16x32xi32> to vector<16x1xi32>
    %120 = vector.broadcast %119 : vector<16x1xi32> to vector<16x14xi32>
    %121 = arith.cmpi eq, %120, %3 : vector<16x14xi32>
    %122 = arith.extui %121 : vector<16x14xi1> to vector<16x14xi32>
    %123 = arith.sitofp %122 : vector<16x14xi32> to vector<16x14xf32>
    %124 = arith.addf %118, %123 : vector<16x14xf32>
    %125 = vector.extract_strided_slice %2 {offsets = [0, 20], sizes = [16, 1], strides = [1, 1]} : vector<16x32xi32> to vector<16x1xi32>
    %126 = vector.broadcast %125 : vector<16x1xi32> to vector<16x14xi32>
    %127 = arith.cmpi eq, %126, %3 : vector<16x14xi32>
    %128 = arith.extui %127 : vector<16x14xi1> to vector<16x14xi32>
    %129 = arith.sitofp %128 : vector<16x14xi32> to vector<16x14xf32>
    %130 = arith.addf %124, %129 : vector<16x14xf32>
    %131 = vector.extract_strided_slice %2 {offsets = [0, 21], sizes = [16, 1], strides = [1, 1]} : vector<16x32xi32> to vector<16x1xi32>
    %132 = vector.broadcast %131 : vector<16x1xi32> to vector<16x14xi32>
    %133 = arith.cmpi eq, %132, %3 : vector<16x14xi32>
    %134 = arith.extui %133 : vector<16x14xi1> to vector<16x14xi32>
    %135 = arith.sitofp %134 : vector<16x14xi32> to vector<16x14xf32>
    %136 = arith.addf %130, %135 : vector<16x14xf32>
    %137 = vector.extract_strided_slice %2 {offsets = [0, 22], sizes = [16, 1], strides = [1, 1]} : vector<16x32xi32> to vector<16x1xi32>
    %138 = vector.broadcast %137 : vector<16x1xi32> to vector<16x14xi32>
    %139 = arith.cmpi eq, %138, %3 : vector<16x14xi32>
    %140 = arith.extui %139 : vector<16x14xi1> to vector<16x14xi32>
    %141 = arith.sitofp %140 : vector<16x14xi32> to vector<16x14xf32>
    %142 = arith.addf %136, %141 : vector<16x14xf32>
    %143 = vector.extract_strided_slice %2 {offsets = [0, 23], sizes = [16, 1], strides = [1, 1]} : vector<16x32xi32> to vector<16x1xi32>
    %144 = vector.broadcast %143 : vector<16x1xi32> to vector<16x14xi32>
    %145 = arith.cmpi eq, %144, %3 : vector<16x14xi32>
    %146 = arith.extui %145 : vector<16x14xi1> to vector<16x14xi32>
    %147 = arith.sitofp %146 : vector<16x14xi32> to vector<16x14xf32>
    %148 = arith.addf %142, %147 : vector<16x14xf32>
    %149 = vector.extract_strided_slice %2 {offsets = [0, 24], sizes = [16, 1], strides = [1, 1]} : vector<16x32xi32> to vector<16x1xi32>
    %150 = vector.broadcast %149 : vector<16x1xi32> to vector<16x14xi32>
    %151 = arith.cmpi eq, %150, %3 : vector<16x14xi32>
    %152 = arith.extui %151 : vector<16x14xi1> to vector<16x14xi32>
    %153 = arith.sitofp %152 : vector<16x14xi32> to vector<16x14xf32>
    %154 = arith.addf %148, %153 : vector<16x14xf32>
    %155 = vector.extract_strided_slice %2 {offsets = [0, 25], sizes = [16, 1], strides = [1, 1]} : vector<16x32xi32> to vector<16x1xi32>
    %156 = vector.broadcast %155 : vector<16x1xi32> to vector<16x14xi32>
    %157 = arith.cmpi eq, %156, %3 : vector<16x14xi32>
    %158 = arith.extui %157 : vector<16x14xi1> to vector<16x14xi32>
    %159 = arith.sitofp %158 : vector<16x14xi32> to vector<16x14xf32>
    %160 = arith.addf %154, %159 : vector<16x14xf32>
    %161 = vector.extract_strided_slice %2 {offsets = [0, 26], sizes = [16, 1], strides = [1, 1]} : vector<16x32xi32> to vector<16x1xi32>
    %162 = vector.broadcast %161 : vector<16x1xi32> to vector<16x14xi32>
    %163 = arith.cmpi eq, %162, %3 : vector<16x14xi32>
    %164 = arith.extui %163 : vector<16x14xi1> to vector<16x14xi32>
    %165 = arith.sitofp %164 : vector<16x14xi32> to vector<16x14xf32>
    %166 = arith.addf %160, %165 : vector<16x14xf32>
    %167 = vector.extract_strided_slice %2 {offsets = [0, 27], sizes = [16, 1], strides = [1, 1]} : vector<16x32xi32> to vector<16x1xi32>
    %168 = vector.broadcast %167 : vector<16x1xi32> to vector<16x14xi32>
    %169 = arith.cmpi eq, %168, %3 : vector<16x14xi32>
    %170 = arith.extui %169 : vector<16x14xi1> to vector<16x14xi32>
    %171 = arith.sitofp %170 : vector<16x14xi32> to vector<16x14xf32>
    %172 = arith.addf %166, %171 : vector<16x14xf32>
    %173 = vector.extract_strided_slice %2 {offsets = [0, 28], sizes = [16, 1], strides = [1, 1]} : vector<16x32xi32> to vector<16x1xi32>
    %174 = vector.broadcast %173 : vector<16x1xi32> to vector<16x14xi32>
    %175 = arith.cmpi eq, %174, %3 : vector<16x14xi32>
    %176 = arith.extui %175 : vector<16x14xi1> to vector<16x14xi32>
    %177 = arith.sitofp %176 : vector<16x14xi32> to vector<16x14xf32>
    %178 = arith.addf %172, %177 : vector<16x14xf32>
    %179 = vector.extract_strided_slice %2 {offsets = [0, 29], sizes = [16, 1], strides = [1, 1]} : vector<16x32xi32> to vector<16x1xi32>
    %180 = vector.broadcast %179 : vector<16x1xi32> to vector<16x14xi32>
    %181 = arith.cmpi eq, %180, %3 : vector<16x14xi32>
    %182 = arith.extui %181 : vector<16x14xi1> to vector<16x14xi32>
    %183 = arith.sitofp %182 : vector<16x14xi32> to vector<16x14xf32>
    %184 = arith.addf %178, %183 : vector<16x14xf32>
    %185 = vector.extract_strided_slice %2 {offsets = [0, 30], sizes = [16, 1], strides = [1, 1]} : vector<16x32xi32> to vector<16x1xi32>
    %186 = vector.broadcast %185 : vector<16x1xi32> to vector<16x14xi32>
    %187 = arith.cmpi eq, %186, %3 : vector<16x14xi32>
    %188 = arith.extui %187 : vector<16x14xi1> to vector<16x14xi32>
    %189 = arith.sitofp %188 : vector<16x14xi32> to vector<16x14xf32>
    %190 = arith.addf %184, %189 : vector<16x14xf32>
    %191 = vector.extract_strided_slice %2 {offsets = [0, 31], sizes = [16, 1], strides = [1, 1]} : vector<16x32xi32> to vector<16x1xi32>
    %192 = vector.broadcast %191 : vector<16x1xi32> to vector<16x14xi32>
    %193 = arith.cmpi eq, %192, %3 : vector<16x14xi32>
    %194 = arith.extui %193 : vector<16x14xi1> to vector<16x14xi32>
    %195 = arith.sitofp %194 : vector<16x14xi32> to vector<16x14xf32>
    %196 = arith.addf %190, %195 : vector<16x14xf32>
    %c0_4 = arith.constant 0 : index
    %c0_5 = arith.constant 0 : index
    %197 = vector.load %arg3[%c0_4, %c0_5] : memref<14x16xf32, #tpu.memory_space<vmem>>, vector<14x16xf32>
    %cst_6 = arith.constant dense<0.000000e+00> : vector<16x16xf32>
    %198 = tpu.matmul %196, %197, %cst_6 {dimension_numbers = #tpu.dot_dimension_numbers<[1], [0], [0], [1], [0, 0, 1, 1], [], []>} : vector<16x14xf32>, vector<14x16xf32>, vector<16x16xf32> -> vector<16x16xf32>
    %c0_7 = arith.constant 0 : index
    %c0_8 = arith.constant 0 : index
    %199 = vector.load %arg4[%c0_7, %c0_8] : memref<14x16xf32, #tpu.memory_space<vmem>>, vector<14x16xf32>
    %cst_9 = arith.constant dense<0.000000e+00> : vector<16x16xf32>
    %200 = tpu.matmul %196, %199, %cst_9 {dimension_numbers = #tpu.dot_dimension_numbers<[1], [0], [0], [1], [0, 0, 1, 1], [], []>} : vector<16x14xf32>, vector<14x16xf32>, vector<16x16xf32> -> vector<16x16xf32>
    %cst_10 = arith.constant 6.250000e-02 : f32
    %201 = vector.broadcast %cst_10 : f32 to vector<16x16xf32>
    %202 = arith.mulf %198, %201 : vector<16x16xf32>
    %cst_11 = arith.constant 6.250000e-02 : f32
    %203 = vector.broadcast %cst_11 : f32 to vector<16x16xf32>
    %204 = arith.mulf %200, %203 : vector<16x16xf32>
    %205 = arith.mulf %202, %202 : vector<16x16xf32>
    %206 = arith.subf %204, %205 : vector<16x16xf32>
    %cst_12 = arith.constant 0.000000e+00 : f32
    %207 = vector.broadcast %cst_12 : f32 to vector<16x16xf32>
    %208 = arith.maximumf %206, %207 : vector<16x16xf32>
    %c0_13 = arith.constant 0 : index
    %c0_14 = arith.constant 0 : index
    %209 = vector.load %arg12[%c0_13, %c0_14] : memref<16x128xf32, #tpu.memory_space<vmem>>, vector<16x16xf32>
    tpu.vector_store %arg12[%c0_13, %c0_14], %202 {strides = array<i32>} : memref<16x128xf32, #tpu.memory_space<vmem>>, vector<16x16xf32>,
    %210 = math.sqrt %208 : vector<16x16xf32>
    %c0_15 = arith.constant 0 : index
    %c32 = arith.constant 32 : index
    %211 = vector.load %arg12[%c0_15, %c32] : memref<16x128xf32, #tpu.memory_space<vmem>>, vector<16x16xf32>
    tpu.vector_store %arg12[%c0_15, %c32], %210 {strides = array<i32>} : memref<16x128xf32, #tpu.memory_space<vmem>>, vector<16x16xf32>,
    %c0_16 = arith.constant 0 : index
    %c0_17 = arith.constant 0 : index
    %212 = vector.load %arg2[%c0_16, %c0_17] : memref<16x40xbf16, #tpu.memory_space<vmem>>, vector<16x40xbf16>
    %213 = arith.extf %212 : vector<16x40xbf16> to vector<16x40xf32>
    %214 = vector.extract_strided_slice %213 {offsets = [0, 0], sizes = [16, 16], strides = [1, 1]} : vector<16x40xf32> to vector<16x16xf32>
    %215 = vector.extract_strided_slice %213 {offsets = [0, 1], sizes = [16, 16], strides = [1, 1]} : vector<16x40xf32> to vector<16x16xf32>
    %216 = vector.extract_strided_slice %213 {offsets = [0, 2], sizes = [16, 16], strides = [1, 1]} : vector<16x40xf32> to vector<16x16xf32>
    %217 = vector.extract_strided_slice %213 {offsets = [0, 3], sizes = [16, 16], strides = [1, 1]} : vector<16x40xf32> to vector<16x16xf32>
    %218 = vector.extract_strided_slice %213 {offsets = [0, 4], sizes = [16, 16], strides = [1, 1]} : vector<16x40xf32> to vector<16x16xf32>
    %c0_18 = arith.constant 0 : index
    %c0_19 = arith.constant 0 : index
    %219 = vector.load %arg5[%c0_18, %c0_19] : memref<16x5xf32, #tpu.memory_space<vmem>>, vector<1x1xf32>
    %220 = vector.extract %219[0, 0] : f32 from vector<1x1xf32>
    %221 = vector.broadcast %220 : f32 to vector<16x16xf32>
    %222 = arith.mulf %221, %214 : vector<16x16xf32>
    %c0_20 = arith.constant 0 : index
    %c1 = arith.constant 1 : index
    %223 = vector.load %arg5[%c0_20, %c1] : memref<16x5xf32, #tpu.memory_space<vmem>>, vector<1x1xf32>
    %224 = vector.extract %223[0, 0] : f32 from vector<1x1xf32>
    %225 = vector.broadcast %224 : f32 to vector<16x16xf32>
    %226 = arith.mulf %225, %215 : vector<16x16xf32>
    %227 = arith.addf %222, %226 : vector<16x16xf32>
    %c0_21 = arith.constant 0 : index
    %c2 = arith.constant 2 : index
    %228 = vector.load %arg5[%c0_21, %c2] : memref<16x5xf32, #tpu.memory_space<vmem>>, vector<1x1xf32>
    %229 = vector.extract %228[0, 0] : f32 from vector<1x1xf32>
    %230 = vector.broadcast %229 : f32 to vector<16x16xf32>
    %231 = arith.mulf %230, %216 : vector<16x16xf32>
    %232 = arith.addf %227, %231 : vector<16x16xf32>
    %c0_22 = arith.constant 0 : index
    %c3 = arith.constant 3 : index
    %233 = vector.load %arg5[%c0_22, %c3] : memref<16x5xf32, #tpu.memory_space<vmem>>, vector<1x1xf32>
    %234 = vector.extract %233[0, 0] : f32 from vector<1x1xf32>
    %235 = vector.broadcast %234 : f32 to vector<16x16xf32>
    %236 = arith.mulf %235, %217 : vector<16x16xf32>
    %237 = arith.addf %232, %236 : vector<16x16xf32>
    %c0_23 = arith.constant 0 : index
    %c4 = arith.constant 4 : index
    %238 = vector.load %arg5[%c0_23, %c4] : memref<16x5xf32, #tpu.memory_space<vmem>>, vector<1x1xf32>
    %239 = vector.extract %238[0, 0] : f32 from vector<1x1xf32>
    %240 = vector.broadcast %239 : f32 to vector<16x16xf32>
    %241 = arith.mulf %240, %218 : vector<16x16xf32>
    %242 = arith.addf %237, %241 : vector<16x16xf32>
    %cst_24 = arith.constant dense<0.000000e+00> : vector<16xf32>
    %243 = vector.multi_reduction <add>, %242, %cst_24 [1] : vector<16x16xf32> to vector<16xf32>
    %244 = vector.shape_cast %243 : vector<16xf32> to vector<16x1xf32>
    %cst_25 = arith.constant 6.250000e-02 : f32
    %245 = vector.broadcast %cst_25 : f32 to vector<16x1xf32>
    %246 = arith.mulf %244, %245 : vector<16x1xf32>
    %247 = arith.mulf %242, %242 : vector<16x16xf32>
    %cst_26 = arith.constant dense<0.000000e+00> : vector<16xf32>
    %248 = vector.multi_reduction <add>, %247, %cst_26 [1] : vector<16x16xf32> to vector<16xf32>
    %249 = vector.shape_cast %248 : vector<16xf32> to vector<16x1xf32>
    %cst_27 = arith.constant 6.250000e-02 : f32
    %250 = vector.broadcast %cst_27 : f32 to vector<16x1xf32>
    %251 = arith.mulf %249, %250 : vector<16x1xf32>
    %252 = arith.mulf %246, %246 : vector<16x1xf32>
    %253 = arith.subf %251, %252 : vector<16x1xf32>
    %cst_28 = arith.constant 0.000000e+00 : f32
    %254 = vector.broadcast %cst_28 : f32 to vector<16x1xf32>
    %255 = arith.maximumf %253, %254 : vector<16x1xf32>
    %c0_29 = arith.constant 0 : index
    %c16 = arith.constant 16 : index
    %256 = vector.load %arg12[%c0_29, %c16] : memref<16x128xf32, #tpu.memory_space<vmem>>, vector<16x1xf32>
    tpu.vector_store %arg12[%c0_29, %c16], %246 {strides = array<i32>} : memref<16x128xf32, #tpu.memory_space<vmem>>, vector<16x1xf32>,
    %257 = math.sqrt %255 : vector<16x1xf32>
    %c0_30 = arith.constant 0 : index
    %c48 = arith.constant 48 : index
    %258 = vector.load %arg12[%c0_30, %c48] : memref<16x128xf32, #tpu.memory_space<vmem>>, vector<16x1xf32>
    tpu.vector_store %arg12[%c0_30, %c48], %257 {strides = array<i32>} : memref<16x128xf32, #tpu.memory_space<vmem>>, vector<16x1xf32>,
    %c1_31 = arith.constant 1 : index
    %c0_32 = arith.constant 0 : index
    %259 = vector.load %arg5[%c1_31, %c0_32] : memref<16x5xf32, #tpu.memory_space<vmem>>, vector<1x1xf32>
    %260 = vector.extract %259[0, 0] : f32 from vector<1x1xf32>
    %261 = vector.broadcast %260 : f32 to vector<16x16xf32>
    %262 = arith.mulf %261, %214 : vector<16x16xf32>
    %c1_33 = arith.constant 1 : index
    %c1_34 = arith.constant 1 : index
    %263 = vector.load %arg5[%c1_33, %c1_34] : memref<16x5xf32, #tpu.memory_space<vmem>>, vector<1x1xf32>
    %264 = vector.extract %263[0, 0] : f32 from vector<1x1xf32>
    %265 = vector.broadcast %264 : f32 to vector<16x16xf32>
    %266 = arith.mulf %265, %215 : vector<16x16xf32>
    %267 = arith.addf %262, %266 : vector<16x16xf32>
    %c1_35 = arith.constant 1 : index
    %c2_36 = arith.constant 2 : index
    %268 = vector.load %arg5[%c1_35, %c2_36] : memref<16x5xf32, #tpu.memory_space<vmem>>, vector<1x1xf32>
    %269 = vector.extract %268[0, 0] : f32 from vector<1x1xf32>
    %270 = vector.broadcast %269 : f32 to vector<16x16xf32>
    %271 = arith.mulf %270, %216 : vector<16x16xf32>
    %272 = arith.addf %267, %271 : vector<16x16xf32>
    %c1_37 = arith.constant 1 : index
    %c3_38 = arith.constant 3 : index
    %273 = vector.load %arg5[%c1_37, %c3_38] : memref<16x5xf32, #tpu.memory_space<vmem>>, vector<1x1xf32>
    %274 = vector.extract %273[0, 0] : f32 from vector<1x1xf32>
    %275 = vector.broadcast %274 : f32 to vector<16x16xf32>
    %276 = arith.mulf %275, %217 : vector<16x16xf32>
    %277 = arith.addf %272, %276 : vector<16x16xf32>
    %c1_39 = arith.constant 1 : index
    %c4_40 = arith.constant 4 : index
    %278 = vector.load %arg5[%c1_39, %c4_40] : memref<16x5xf32, #tpu.memory_space<vmem>>, vector<1x1xf32>
    %279 = vector.extract %278[0, 0] : f32 from vector<1x1xf32>
    %280 = vector.broadcast %279 : f32 to vector<16x16xf32>
    %281 = arith.mulf %280, %218 : vector<16x16xf32>
    %282 = arith.addf %277, %281 : vector<16x16xf32>
    %cst_41 = arith.constant dense<0.000000e+00> : vector<16xf32>
    %283 = vector.multi_reduction <add>, %282, %cst_41 [1] : vector<16x16xf32> to vector<16xf32>
    %284 = vector.shape_cast %283 : vector<16xf32> to vector<16x1xf32>
    %cst_42 = arith.constant 6.250000e-02 : f32
    %285 = vector.broadcast %cst_42 : f32 to vector<16x1xf32>
    %286 = arith.mulf %284, %285 : vector<16x1xf32>
    %287 = arith.mulf %282, %282 : vector<16x16xf32>
    %cst_43 = arith.constant dense<0.000000e+00> : vector<16xf32>
    %288 = vector.multi_reduction <add>, %287, %cst_43 [1] : vector<16x16xf32> to vector<16xf32>
    %289 = vector.shape_cast %288 : vector<16xf32> to vector<16x1xf32>
    %cst_44 = arith.constant 6.250000e-02 : f32
    %290 = vector.broadcast %cst_44 : f32 to vector<16x1xf32>
    %291 = arith.mulf %289, %290 : vector<16x1xf32>
    %292 = arith.mulf %286, %286 : vector<16x1xf32>
    %293 = arith.subf %291, %292 : vector<16x1xf32>
    %cst_45 = arith.constant 0.000000e+00 : f32
    %294 = vector.broadcast %cst_45 : f32 to vector<16x1xf32>
    %295 = arith.maximumf %293, %294 : vector<16x1xf32>
    %c0_46 = arith.constant 0 : index
    %c17 = arith.constant 17 : index
    %296 = vector.load %arg12[%c0_46, %c17] : memref<16x128xf32, #tpu.memory_space<vmem>>, vector<16x1xf32>
    tpu.vector_store %arg12[%c0_46, %c17], %286 {strides = array<i32>} : memref<16x128xf32, #tpu.memory_space<vmem>>, vector<16x1xf32>,
    %297 = math.sqrt %295 : vector<16x1xf32>
    %c0_47 = arith.constant 0 : index
    %c49 = arith.constant 49 : index
    %298 = vector.load %arg12[%c0_47, %c49] : memref<16x128xf32, #tpu.memory_space<vmem>>, vector<16x1xf32>
    tpu.vector_store %arg12[%c0_47, %c49], %297 {strides = array<i32>} : memref<16x128xf32, #tpu.memory_space<vmem>>, vector<16x1xf32>,
    %c2_48 = arith.constant 2 : index
    %c0_49 = arith.constant 0 : index
    %299 = vector.load %arg5[%c2_48, %c0_49] : memref<16x5xf32, #tpu.memory_space<vmem>>, vector<1x1xf32>
    %300 = vector.extract %299[0, 0] : f32 from vector<1x1xf32>
    %301 = vector.broadcast %300 : f32 to vector<16x16xf32>
    %302 = arith.mulf %301, %214 : vector<16x16xf32>
    %c2_50 = arith.constant 2 : index
    %c1_51 = arith.constant 1 : index
    %303 = vector.load %arg5[%c2_50, %c1_51] : memref<16x5xf32, #tpu.memory_space<vmem>>, vector<1x1xf32>
    %304 = vector.extract %303[0, 0] : f32 from vector<1x1xf32>
    %305 = vector.broadcast %304 : f32 to vector<16x16xf32>
    %306 = arith.mulf %305, %215 : vector<16x16xf32>
    %307 = arith.addf %302, %306 : vector<16x16xf32>
    %c2_52 = arith.constant 2 : index
    %c2_53 = arith.constant 2 : index
    %308 = vector.load %arg5[%c2_52, %c2_53] : memref<16x5xf32, #tpu.memory_space<vmem>>, vector<1x1xf32>
    %309 = vector.extract %308[0, 0] : f32 from vector<1x1xf32>
    %310 = vector.broadcast %309 : f32 to vector<16x16xf32>
    %311 = arith.mulf %310, %216 : vector<16x16xf32>
    %312 = arith.addf %307, %311 : vector<16x16xf32>
    %c2_54 = arith.constant 2 : index
    %c3_55 = arith.constant 3 : index
    %313 = vector.load %arg5[%c2_54, %c3_55] : memref<16x5xf32, #tpu.memory_space<vmem>>, vector<1x1xf32>
    %314 = vector.extract %313[0, 0] : f32 from vector<1x1xf32>
    %315 = vector.broadcast %314 : f32 to vector<16x16xf32>
    %316 = arith.mulf %315, %217 : vector<16x16xf32>
    %317 = arith.addf %312, %316 : vector<16x16xf32>
    %c2_56 = arith.constant 2 : index
    %c4_57 = arith.constant 4 : index
    %318 = vector.load %arg5[%c2_56, %c4_57] : memref<16x5xf32, #tpu.memory_space<vmem>>, vector<1x1xf32>
    %319 = vector.extract %318[0, 0] : f32 from vector<1x1xf32>
    %320 = vector.broadcast %319 : f32 to vector<16x16xf32>
    %321 = arith.mulf %320, %218 : vector<16x16xf32>
    %322 = arith.addf %317, %321 : vector<16x16xf32>
    %cst_58 = arith.constant dense<0.000000e+00> : vector<16xf32>
    %323 = vector.multi_reduction <add>, %322, %cst_58 [1] : vector<16x16xf32> to vector<16xf32>
    %324 = vector.shape_cast %323 : vector<16xf32> to vector<16x1xf32>
    %cst_59 = arith.constant 6.250000e-02 : f32
    %325 = vector.broadcast %cst_59 : f32 to vector<16x1xf32>
    %326 = arith.mulf %324, %325 : vector<16x1xf32>
    %327 = arith.mulf %322, %322 : vector<16x16xf32>
    %cst_60 = arith.constant dense<0.000000e+00> : vector<16xf32>
    %328 = vector.multi_reduction <add>, %327, %cst_60 [1] : vector<16x16xf32> to vector<16xf32>
    %329 = vector.shape_cast %328 : vector<16xf32> to vector<16x1xf32>
    %cst_61 = arith.constant 6.250000e-02 : f32
    %330 = vector.broadcast %cst_61 : f32 to vector<16x1xf32>
    %331 = arith.mulf %329, %330 : vector<16x1xf32>
    %332 = arith.mulf %326, %326 : vector<16x1xf32>
    %333 = arith.subf %331, %332 : vector<16x1xf32>
    %cst_62 = arith.constant 0.000000e+00 : f32
    %334 = vector.broadcast %cst_62 : f32 to vector<16x1xf32>
    %335 = arith.maximumf %333, %334 : vector<16x1xf32>
    %c0_63 = arith.constant 0 : index
    %c18 = arith.constant 18 : index
    %336 = vector.load %arg12[%c0_63, %c18] : memref<16x128xf32, #tpu.memory_space<vmem>>, vector<16x1xf32>
    tpu.vector_store %arg12[%c0_63, %c18], %326 {strides = array<i32>} : memref<16x128xf32, #tpu.memory_space<vmem>>, vector<16x1xf32>,
    %337 = math.sqrt %335 : vector<16x1xf32>
    %c0_64 = arith.constant 0 : index
    %c50 = arith.constant 50 : index
    %338 = vector.load %arg12[%c0_64, %c50] : memref<16x128xf32, #tpu.memory_space<vmem>>, vector<16x1xf32>
    tpu.vector_store %arg12[%c0_64, %c50], %337 {strides = array<i32>} : memref<16x128xf32, #tpu.memory_space<vmem>>, vector<16x1xf32>,
    %c3_65 = arith.constant 3 : index
    %c0_66 = arith.constant 0 : index
    %339 = vector.load %arg5[%c3_65, %c0_66] : memref<16x5xf32, #tpu.memory_space<vmem>>, vector<1x1xf32>
    %340 = vector.extract %339[0, 0] : f32 from vector<1x1xf32>
    %341 = vector.broadcast %340 : f32 to vector<16x16xf32>
    %342 = arith.mulf %341, %214 : vector<16x16xf32>
    %c3_67 = arith.constant 3 : index
    %c1_68 = arith.constant 1 : index
    %343 = vector.load %arg5[%c3_67, %c1_68] : memref<16x5xf32, #tpu.memory_space<vmem>>, vector<1x1xf32>
    %344 = vector.extract %343[0, 0] : f32 from vector<1x1xf32>
    %345 = vector.broadcast %344 : f32 to vector<16x16xf32>
    %346 = arith.mulf %345, %215 : vector<16x16xf32>
    %347 = arith.addf %342, %346 : vector<16x16xf32>
    %c3_69 = arith.constant 3 : index
    %c2_70 = arith.constant 2 : index
    %348 = vector.load %arg5[%c3_69, %c2_70] : memref<16x5xf32, #tpu.memory_space<vmem>>, vector<1x1xf32>
    %349 = vector.extract %348[0, 0] : f32 from vector<1x1xf32>
    %350 = vector.broadcast %349 : f32 to vector<16x16xf32>
    %351 = arith.mulf %350, %216 : vector<16x16xf32>
    %352 = arith.addf %347, %351 : vector<16x16xf32>
    %c3_71 = arith.constant 3 : index
    %c3_72 = arith.constant 3 : index
    %353 = vector.load %arg5[%c3_71, %c3_72] : memref<16x5xf32, #tpu.memory_space<vmem>>, vector<1x1xf32>
    %354 = vector.extract %353[0, 0] : f32 from vector<1x1xf32>
    %355 = vector.broadcast %354 : f32 to vector<16x16xf32>
    %356 = arith.mulf %355, %217 : vector<16x16xf32>
    %357 = arith.addf %352, %356 : vector<16x16xf32>
    %c3_73 = arith.constant 3 : index
    %c4_74 = arith.constant 4 : index
    %358 = vector.load %arg5[%c3_73, %c4_74] : memref<16x5xf32, #tpu.memory_space<vmem>>, vector<1x1xf32>
    %359 = vector.extract %358[0, 0] : f32 from vector<1x1xf32>
    %360 = vector.broadcast %359 : f32 to vector<16x16xf32>
    %361 = arith.mulf %360, %218 : vector<16x16xf32>
    %362 = arith.addf %357, %361 : vector<16x16xf32>
    %cst_75 = arith.constant dense<0.000000e+00> : vector<16xf32>
    %363 = vector.multi_reduction <add>, %362, %cst_75 [1] : vector<16x16xf32> to vector<16xf32>
    %364 = vector.shape_cast %363 : vector<16xf32> to vector<16x1xf32>
    %cst_76 = arith.constant 6.250000e-02 : f32
    %365 = vector.broadcast %cst_76 : f32 to vector<16x1xf32>
    %366 = arith.mulf %364, %365 : vector<16x1xf32>
    %367 = arith.mulf %362, %362 : vector<16x16xf32>
    %cst_77 = arith.constant dense<0.000000e+00> : vector<16xf32>
    %368 = vector.multi_reduction <add>, %367, %cst_77 [1] : vector<16x16xf32> to vector<16xf32>
    %369 = vector.shape_cast %368 : vector<16xf32> to vector<16x1xf32>
    %cst_78 = arith.constant 6.250000e-02 : f32
    %370 = vector.broadcast %cst_78 : f32 to vector<16x1xf32>
    %371 = arith.mulf %369, %370 : vector<16x1xf32>
    %372 = arith.mulf %366, %366 : vector<16x1xf32>
    %373 = arith.subf %371, %372 : vector<16x1xf32>
    %cst_79 = arith.constant 0.000000e+00 : f32
    %374 = vector.broadcast %cst_79 : f32 to vector<16x1xf32>
    %375 = arith.maximumf %373, %374 : vector<16x1xf32>
    %c0_80 = arith.constant 0 : index
    %c19 = arith.constant 19 : index
    %376 = vector.load %arg12[%c0_80, %c19] : memref<16x128xf32, #tpu.memory_space<vmem>>, vector<16x1xf32>
    tpu.vector_store %arg12[%c0_80, %c19], %366 {strides = array<i32>} : memref<16x128xf32, #tpu.memory_space<vmem>>, vector<16x1xf32>,
    %377 = math.sqrt %375 : vector<16x1xf32>
    %c0_81 = arith.constant 0 : index
    %c51 = arith.constant 51 : index
    %378 = vector.load %arg12[%c0_81, %c51] : memref<16x128xf32, #tpu.memory_space<vmem>>, vector<16x1xf32>
    tpu.vector_store %arg12[%c0_81, %c51], %377 {strides = array<i32>} : memref<16x128xf32, #tpu.memory_space<vmem>>, vector<16x1xf32>,
    %c4_82 = arith.constant 4 : index
    %c0_83 = arith.constant 0 : index
    %379 = vector.load %arg5[%c4_82, %c0_83] : memref<16x5xf32, #tpu.memory_space<vmem>>, vector<1x1xf32>
    %380 = vector.extract %379[0, 0] : f32 from vector<1x1xf32>
    %381 = vector.broadcast %380 : f32 to vector<16x16xf32>
    %382 = arith.mulf %381, %214 : vector<16x16xf32>
    %c4_84 = arith.constant 4 : index
    %c1_85 = arith.constant 1 : index
    %383 = vector.load %arg5[%c4_84, %c1_85] : memref<16x5xf32, #tpu.memory_space<vmem>>, vector<1x1xf32>
    %384 = vector.extract %383[0, 0] : f32 from vector<1x1xf32>
    %385 = vector.broadcast %384 : f32 to vector<16x16xf32>
    %386 = arith.mulf %385, %215 : vector<16x16xf32>
    %387 = arith.addf %382, %386 : vector<16x16xf32>
    %c4_86 = arith.constant 4 : index
    %c2_87 = arith.constant 2 : index
    %388 = vector.load %arg5[%c4_86, %c2_87] : memref<16x5xf32, #tpu.memory_space<vmem>>, vector<1x1xf32>
    %389 = vector.extract %388[0, 0] : f32 from vector<1x1xf32>
    %390 = vector.broadcast %389 : f32 to vector<16x16xf32>
    %391 = arith.mulf %390, %216 : vector<16x16xf32>
    %392 = arith.addf %387, %391 : vector<16x16xf32>
    %c4_88 = arith.constant 4 : index
    %c3_89 = arith.constant 3 : index
    %393 = vector.load %arg5[%c4_88, %c3_89] : memref<16x5xf32, #tpu.memory_space<vmem>>, vector<1x1xf32>
    %394 = vector.extract %393[0, 0] : f32 from vector<1x1xf32>
    %395 = vector.broadcast %394 : f32 to vector<16x16xf32>
    %396 = arith.mulf %395, %217 : vector<16x16xf32>
    %397 = arith.addf %392, %396 : vector<16x16xf32>
    %c4_90 = arith.constant 4 : index
    %c4_91 = arith.constant 4 : index
    %398 = vector.load %arg5[%c4_90, %c4_91] : memref<16x5xf32, #tpu.memory_space<vmem>>, vector<1x1xf32>
    %399 = vector.extract %398[0, 0] : f32 from vector<1x1xf32>
    %400 = vector.broadcast %399 : f32 to vector<16x16xf32>
    %401 = arith.mulf %400, %218 : vector<16x16xf32>
    %402 = arith.addf %397, %401 : vector<16x16xf32>
    %cst_92 = arith.constant dense<0.000000e+00> : vector<16xf32>
    %403 = vector.multi_reduction <add>, %402, %cst_92 [1] : vector<16x16xf32> to vector<16xf32>
    %404 = vector.shape_cast %403 : vector<16xf32> to vector<16x1xf32>
    %cst_93 = arith.constant 6.250000e-02 : f32
    %405 = vector.broadcast %cst_93 : f32 to vector<16x1xf32>
    %406 = arith.mulf %404, %405 : vector<16x1xf32>
    %407 = arith.mulf %402, %402 : vector<16x16xf32>
    %cst_94 = arith.constant dense<0.000000e+00> : vector<16xf32>
    %408 = vector.multi_reduction <add>, %407, %cst_94 [1] : vector<16x16xf32> to vector<16xf32>
    %409 = vector.shape_cast %408 : vector<16xf32> to vector<16x1xf32>
    %cst_95 = arith.constant 6.250000e-02 : f32
    %410 = vector.broadcast %cst_95 : f32 to vector<16x1xf32>
    %411 = arith.mulf %409, %410 : vector<16x1xf32>
    %412 = arith.mulf %406, %406 : vector<16x1xf32>
    %413 = arith.subf %411, %412 : vector<16x1xf32>
    %cst_96 = arith.constant 0.000000e+00 : f32
    %414 = vector.broadcast %cst_96 : f32 to vector<16x1xf32>
    %415 = arith.maximumf %413, %414 : vector<16x1xf32>
    %c0_97 = arith.constant 0 : index
    %c20 = arith.constant 20 : index
    %416 = vector.load %arg12[%c0_97, %c20] : memref<16x128xf32, #tpu.memory_space<vmem>>, vector<16x1xf32>
    tpu.vector_store %arg12[%c0_97, %c20], %406 {strides = array<i32>} : memref<16x128xf32, #tpu.memory_space<vmem>>, vector<16x1xf32>,
    %417 = math.sqrt %415 : vector<16x1xf32>
    %c0_98 = arith.constant 0 : index
    %c52 = arith.constant 52 : index
    %418 = vector.load %arg12[%c0_98, %c52] : memref<16x128xf32, #tpu.memory_space<vmem>>, vector<16x1xf32>
    tpu.vector_store %arg12[%c0_98, %c52], %417 {strides = array<i32>} : memref<16x128xf32, #tpu.memory_space<vmem>>, vector<16x1xf32>,
    %c5 = arith.constant 5 : index
    %c0_99 = arith.constant 0 : index
    %419 = vector.load %arg5[%c5, %c0_99] : memref<16x5xf32, #tpu.memory_space<vmem>>, vector<1x1xf32>
    %420 = vector.extract %419[0, 0] : f32 from vector<1x1xf32>
    %421 = vector.broadcast %420 : f32 to vector<16x16xf32>
    %422 = arith.mulf %421, %214 : vector<16x16xf32>
    %c5_100 = arith.constant 5 : index
    %c1_101 = arith.constant 1 : index
    %423 = vector.load %arg5[%c5_100, %c1_101] : memref<16x5xf32, #tpu.memory_space<vmem>>, vector<1x1xf32>
    %424 = vector.extract %423[0, 0] : f32 from vector<1x1xf32>
    %425 = vector.broadcast %424 : f32 to vector<16x16xf32>
    %426 = arith.mulf %425, %215 : vector<16x16xf32>
    %427 = arith.addf %422, %426 : vector<16x16xf32>
    %c5_102 = arith.constant 5 : index
    %c2_103 = arith.constant 2 : index
    %428 = vector.load %arg5[%c5_102, %c2_103] : memref<16x5xf32, #tpu.memory_space<vmem>>, vector<1x1xf32>
    %429 = vector.extract %428[0, 0] : f32 from vector<1x1xf32>
    %430 = vector.broadcast %429 : f32 to vector<16x16xf32>
    %431 = arith.mulf %430, %216 : vector<16x16xf32>
    %432 = arith.addf %427, %431 : vector<16x16xf32>
    %c5_104 = arith.constant 5 : index
    %c3_105 = arith.constant 3 : index
    %433 = vector.load %arg5[%c5_104, %c3_105] : memref<16x5xf32, #tpu.memory_space<vmem>>, vector<1x1xf32>
    %434 = vector.extract %433[0, 0] : f32 from vector<1x1xf32>
    %435 = vector.broadcast %434 : f32 to vector<16x16xf32>
    %436 = arith.mulf %435, %217 : vector<16x16xf32>
    %437 = arith.addf %432, %436 : vector<16x16xf32>
    %c5_106 = arith.constant 5 : index
    %c4_107 = arith.constant 4 : index
    %438 = vector.load %arg5[%c5_106, %c4_107] : memref<16x5xf32, #tpu.memory_space<vmem>>, vector<1x1xf32>
    %439 = vector.extract %438[0, 0] : f32 from vector<1x1xf32>
    %440 = vector.broadcast %439 : f32 to vector<16x16xf32>
    %441 = arith.mulf %440, %218 : vector<16x16xf32>
    %442 = arith.addf %437, %441 : vector<16x16xf32>
    %cst_108 = arith.constant dense<0.000000e+00> : vector<16xf32>
    %443 = vector.multi_reduction <add>, %442, %cst_108 [1] : vector<16x16xf32> to vector<16xf32>
    %444 = vector.shape_cast %443 : vector<16xf32> to vector<16x1xf32>
    %cst_109 = arith.constant 6.250000e-02 : f32
    %445 = vector.broadcast %cst_109 : f32 to vector<16x1xf32>
    %446 = arith.mulf %444, %445 : vector<16x1xf32>
    %447 = arith.mulf %442, %442 : vector<16x16xf32>
    %cst_110 = arith.constant dense<0.000000e+00> : vector<16xf32>
    %448 = vector.multi_reduction <add>, %447, %cst_110 [1] : vector<16x16xf32> to vector<16xf32>
    %449 = vector.shape_cast %448 : vector<16xf32> to vector<16x1xf32>
    %cst_111 = arith.constant 6.250000e-02 : f32
    %450 = vector.broadcast %cst_111 : f32 to vector<16x1xf32>
    %451 = arith.mulf %449, %450 : vector<16x1xf32>
    %452 = arith.mulf %446, %446 : vector<16x1xf32>
    %453 = arith.subf %451, %452 : vector<16x1xf32>
    %cst_112 = arith.constant 0.000000e+00 : f32
    %454 = vector.broadcast %cst_112 : f32 to vector<16x1xf32>
    %455 = arith.maximumf %453, %454 : vector<16x1xf32>
    %c0_113 = arith.constant 0 : index
    %c21 = arith.constant 21 : index
    %456 = vector.load %arg12[%c0_113, %c21] : memref<16x128xf32, #tpu.memory_space<vmem>>, vector<16x1xf32>
    tpu.vector_store %arg12[%c0_113, %c21], %446 {strides = array<i32>} : memref<16x128xf32, #tpu.memory_space<vmem>>, vector<16x1xf32>,
    %457 = math.sqrt %455 : vector<16x1xf32>
    %c0_114 = arith.constant 0 : index
    %c53 = arith.constant 53 : index
    %458 = vector.load %arg12[%c0_114, %c53] : memref<16x128xf32, #tpu.memory_space<vmem>>, vector<16x1xf32>
    tpu.vector_store %arg12[%c0_114, %c53], %457 {strides = array<i32>} : memref<16x128xf32, #tpu.memory_space<vmem>>, vector<16x1xf32>,
    %c6 = arith.constant 6 : index
    %c0_115 = arith.constant 0 : index
    %459 = vector.load %arg5[%c6, %c0_115] : memref<16x5xf32, #tpu.memory_space<vmem>>, vector<1x1xf32>
    %460 = vector.extract %459[0, 0] : f32 from vector<1x1xf32>
    %461 = vector.broadcast %460 : f32 to vector<16x16xf32>
    %462 = arith.mulf %461, %214 : vector<16x16xf32>
    %c6_116 = arith.constant 6 : index
    %c1_117 = arith.constant 1 : index
    %463 = vector.load %arg5[%c6_116, %c1_117] : memref<16x5xf32, #tpu.memory_space<vmem>>, vector<1x1xf32>
    %464 = vector.extract %463[0, 0] : f32 from vector<1x1xf32>
    %465 = vector.broadcast %464 : f32 to vector<16x16xf32>
    %466 = arith.mulf %465, %215 : vector<16x16xf32>
    %467 = arith.addf %462, %466 : vector<16x16xf32>
    %c6_118 = arith.constant 6 : index
    %c2_119 = arith.constant 2 : index
    %468 = vector.load %arg5[%c6_118, %c2_119] : memref<16x5xf32, #tpu.memory_space<vmem>>, vector<1x1xf32>
    %469 = vector.extract %468[0, 0] : f32 from vector<1x1xf32>
    %470 = vector.broadcast %469 : f32 to vector<16x16xf32>
    %471 = arith.mulf %470, %216 : vector<16x16xf32>
    %472 = arith.addf %467, %471 : vector<16x16xf32>
    %c6_120 = arith.constant 6 : index
    %c3_121 = arith.constant 3 : index
    %473 = vector.load %arg5[%c6_120, %c3_121] : memref<16x5xf32, #tpu.memory_space<vmem>>, vector<1x1xf32>
    %474 = vector.extract %473[0, 0] : f32 from vector<1x1xf32>
    %475 = vector.broadcast %474 : f32 to vector<16x16xf32>
    %476 = arith.mulf %475, %217 : vector<16x16xf32>
    %477 = arith.addf %472, %476 : vector<16x16xf32>
    %c6_122 = arith.constant 6 : index
    %c4_123 = arith.constant 4 : index
    %478 = vector.load %arg5[%c6_122, %c4_123] : memref<16x5xf32, #tpu.memory_space<vmem>>, vector<1x1xf32>
    %479 = vector.extract %478[0, 0] : f32 from vector<1x1xf32>
    %480 = vector.broadcast %479 : f32 to vector<16x16xf32>
    %481 = arith.mulf %480, %218 : vector<16x16xf32>
    %482 = arith.addf %477, %481 : vector<16x16xf32>
    %cst_124 = arith.constant dense<0.000000e+00> : vector<16xf32>
    %483 = vector.multi_reduction <add>, %482, %cst_124 [1] : vector<16x16xf32> to vector<16xf32>
    %484 = vector.shape_cast %483 : vector<16xf32> to vector<16x1xf32>
    %cst_125 = arith.constant 6.250000e-02 : f32
    %485 = vector.broadcast %cst_125 : f32 to vector<16x1xf32>
    %486 = arith.mulf %484, %485 : vector<16x1xf32>
    %487 = arith.mulf %482, %482 : vector<16x16xf32>
    %cst_126 = arith.constant dense<0.000000e+00> : vector<16xf32>
    %488 = vector.multi_reduction <add>, %487, %cst_126 [1] : vector<16x16xf32> to vector<16xf32>
    %489 = vector.shape_cast %488 : vector<16xf32> to vector<16x1xf32>
    %cst_127 = arith.constant 6.250000e-02 : f32
    %490 = vector.broadcast %cst_127 : f32 to vector<16x1xf32>
    %491 = arith.mulf %489, %490 : vector<16x1xf32>
    %492 = arith.mulf %486, %486 : vector<16x1xf32>
    %493 = arith.subf %491, %492 : vector<16x1xf32>
    %cst_128 = arith.constant 0.000000e+00 : f32
    %494 = vector.broadcast %cst_128 : f32 to vector<16x1xf32>
    %495 = arith.maximumf %493, %494 : vector<16x1xf32>
    %c0_129 = arith.constant 0 : index
    %c22 = arith.constant 22 : index
    %496 = vector.load %arg12[%c0_129, %c22] : memref<16x128xf32, #tpu.memory_space<vmem>>, vector<16x1xf32>
    tpu.vector_store %arg12[%c0_129, %c22], %486 {strides = array<i32>} : memref<16x128xf32, #tpu.memory_space<vmem>>, vector<16x1xf32>,
    %497 = math.sqrt %495 : vector<16x1xf32>
    %c0_130 = arith.constant 0 : index
    %c54 = arith.constant 54 : index
    %498 = vector.load %arg12[%c0_130, %c54] : memref<16x128xf32, #tpu.memory_space<vmem>>, vector<16x1xf32>
    tpu.vector_store %arg12[%c0_130, %c54], %497 {strides = array<i32>} : memref<16x128xf32, #tpu.memory_space<vmem>>, vector<16x1xf32>,
    %c7 = arith.constant 7 : index
    %c0_131 = arith.constant 0 : index
    %499 = vector.load %arg5[%c7, %c0_131] : memref<16x5xf32, #tpu.memory_space<vmem>>, vector<1x1xf32>
    %500 = vector.extract %499[0, 0] : f32 from vector<1x1xf32>
    %501 = vector.broadcast %500 : f32 to vector<16x16xf32>
    %502 = arith.mulf %501, %214 : vector<16x16xf32>
    %c7_132 = arith.constant 7 : index
    %c1_133 = arith.constant 1 : index
    %503 = vector.load %arg5[%c7_132, %c1_133] : memref<16x5xf32, #tpu.memory_space<vmem>>, vector<1x1xf32>
    %504 = vector.extract %503[0, 0] : f32 from vector<1x1xf32>
    %505 = vector.broadcast %504 : f32 to vector<16x16xf32>
    %506 = arith.mulf %505, %215 : vector<16x16xf32>
    %507 = arith.addf %502, %506 : vector<16x16xf32>
    %c7_134 = arith.constant 7 : index
    %c2_135 = arith.constant 2 : index
    %508 = vector.load %arg5[%c7_134, %c2_135] : memref<16x5xf32, #tpu.memory_space<vmem>>, vector<1x1xf32>
    %509 = vector.extract %508[0, 0] : f32 from vector<1x1xf32>
    %510 = vector.broadcast %509 : f32 to vector<16x16xf32>
    %511 = arith.mulf %510, %216 : vector<16x16xf32>
    %512 = arith.addf %507, %511 : vector<16x16xf32>
    %c7_136 = arith.constant 7 : index
    %c3_137 = arith.constant 3 : index
    %513 = vector.load %arg5[%c7_136, %c3_137] : memref<16x5xf32, #tpu.memory_space<vmem>>, vector<1x1xf32>
    %514 = vector.extract %513[0, 0] : f32 from vector<1x1xf32>
    %515 = vector.broadcast %514 : f32 to vector<16x16xf32>
    %516 = arith.mulf %515, %217 : vector<16x16xf32>
    %517 = arith.addf %512, %516 : vector<16x16xf32>
    %c7_138 = arith.constant 7 : index
    %c4_139 = arith.constant 4 : index
    %518 = vector.load %arg5[%c7_138, %c4_139] : memref<16x5xf32, #tpu.memory_space<vmem>>, vector<1x1xf32>
    %519 = vector.extract %518[0, 0] : f32 from vector<1x1xf32>
    %520 = vector.broadcast %519 : f32 to vector<16x16xf32>
    %521 = arith.mulf %520, %218 : vector<16x16xf32>
    %522 = arith.addf %517, %521 : vector<16x16xf32>
    %cst_140 = arith.constant dense<0.000000e+00> : vector<16xf32>
    %523 = vector.multi_reduction <add>, %522, %cst_140 [1] : vector<16x16xf32> to vector<16xf32>
    %524 = vector.shape_cast %523 : vector<16xf32> to vector<16x1xf32>
    %cst_141 = arith.constant 6.250000e-02 : f32
    %525 = vector.broadcast %cst_141 : f32 to vector<16x1xf32>
    %526 = arith.mulf %524, %525 : vector<16x1xf32>
    %527 = arith.mulf %522, %522 : vector<16x16xf32>
    %cst_142 = arith.constant dense<0.000000e+00> : vector<16xf32>
    %528 = vector.multi_reduction <add>, %527, %cst_142 [1] : vector<16x16xf32> to vector<16xf32>
    %529 = vector.shape_cast %528 : vector<16xf32> to vector<16x1xf32>
    %cst_143 = arith.constant 6.250000e-02 : f32
    %530 = vector.broadcast %cst_143 : f32 to vector<16x1xf32>
    %531 = arith.mulf %529, %530 : vector<16x1xf32>
    %532 = arith.mulf %526, %526 : vector<16x1xf32>
    %533 = arith.subf %531, %532 : vector<16x1xf32>
    %cst_144 = arith.constant 0.000000e+00 : f32
    %534 = vector.broadcast %cst_144 : f32 to vector<16x1xf32>
    %535 = arith.maximumf %533, %534 : vector<16x1xf32>
    %c0_145 = arith.constant 0 : index
    %c23 = arith.constant 23 : index
    %536 = vector.load %arg12[%c0_145, %c23] : memref<16x128xf32, #tpu.memory_space<vmem>>, vector<16x1xf32>
    tpu.vector_store %arg12[%c0_145, %c23], %526 {strides = array<i32>} : memref<16x128xf32, #tpu.memory_space<vmem>>, vector<16x1xf32>,
    %537 = math.sqrt %535 : vector<16x1xf32>
    %c0_146 = arith.constant 0 : index
    %c55 = arith.constant 55 : index
    %538 = vector.load %arg12[%c0_146, %c55] : memref<16x128xf32, #tpu.memory_space<vmem>>, vector<16x1xf32>
    tpu.vector_store %arg12[%c0_146, %c55], %537 {strides = array<i32>} : memref<16x128xf32, #tpu.memory_space<vmem>>, vector<16x1xf32>,
    %539 = vector.extract_strided_slice %213 {offsets = [0, 20], sizes = [16, 16], strides = [1, 1]} : vector<16x40xf32> to vector<16x16xf32>
    %540 = vector.extract_strided_slice %213 {offsets = [0, 21], sizes = [16, 16], strides = [1, 1]} : vector<16x40xf32> to vector<16x16xf32>
    %541 = vector.extract_strided_slice %213 {offsets = [0, 22], sizes = [16, 16], strides = [1, 1]} : vector<16x40xf32> to vector<16x16xf32>
    %542 = vector.extract_strided_slice %213 {offsets = [0, 23], sizes = [16, 16], strides = [1, 1]} : vector<16x40xf32> to vector<16x16xf32>
    %543 = vector.extract_strided_slice %213 {offsets = [0, 24], sizes = [16, 16], strides = [1, 1]} : vector<16x40xf32> to vector<16x16xf32>
    %c8 = arith.constant 8 : index
    %c0_147 = arith.constant 0 : index
    %544 = vector.load %arg5[%c8, %c0_147] : memref<16x5xf32, #tpu.memory_space<vmem>>, vector<1x1xf32>
    %545 = vector.extract %544[0, 0] : f32 from vector<1x1xf32>
    %546 = vector.broadcast %545 : f32 to vector<16x16xf32>
    %547 = arith.mulf %546, %539 : vector<16x16xf32>
    %c8_148 = arith.constant 8 : index
    %c1_149 = arith.constant 1 : index
    %548 = vector.load %arg5[%c8_148, %c1_149] : memref<16x5xf32, #tpu.memory_space<vmem>>, vector<1x1xf32>
    %549 = vector.extract %548[0, 0] : f32 from vector<1x1xf32>
    %550 = vector.broadcast %549 : f32 to vector<16x16xf32>
    %551 = arith.mulf %550, %540 : vector<16x16xf32>
    %552 = arith.addf %547, %551 : vector<16x16xf32>
    %c8_150 = arith.constant 8 : index
    %c2_151 = arith.constant 2 : index
    %553 = vector.load %arg5[%c8_150, %c2_151] : memref<16x5xf32, #tpu.memory_space<vmem>>, vector<1x1xf32>
    %554 = vector.extract %553[0, 0] : f32 from vector<1x1xf32>
    %555 = vector.broadcast %554 : f32 to vector<16x16xf32>
    %556 = arith.mulf %555, %541 : vector<16x16xf32>
    %557 = arith.addf %552, %556 : vector<16x16xf32>
    %c8_152 = arith.constant 8 : index
    %c3_153 = arith.constant 3 : index
    %558 = vector.load %arg5[%c8_152, %c3_153] : memref<16x5xf32, #tpu.memory_space<vmem>>, vector<1x1xf32>
    %559 = vector.extract %558[0, 0] : f32 from vector<1x1xf32>
    %560 = vector.broadcast %559 : f32 to vector<16x16xf32>
    %561 = arith.mulf %560, %542 : vector<16x16xf32>
    %562 = arith.addf %557, %561 : vector<16x16xf32>
    %c8_154 = arith.constant 8 : index
    %c4_155 = arith.constant 4 : index
    %563 = vector.load %arg5[%c8_154, %c4_155] : memref<16x5xf32, #tpu.memory_space<vmem>>, vector<1x1xf32>
    %564 = vector.extract %563[0, 0] : f32 from vector<1x1xf32>
    %565 = vector.broadcast %564 : f32 to vector<16x16xf32>
    %566 = arith.mulf %565, %543 : vector<16x16xf32>
    %567 = arith.addf %562, %566 : vector<16x16xf32>
    %cst_156 = arith.constant dense<0.000000e+00> : vector<16xf32>
    %568 = vector.multi_reduction <add>, %567, %cst_156 [1] : vector<16x16xf32> to vector<16xf32>
    %569 = vector.shape_cast %568 : vector<16xf32> to vector<16x1xf32>
    %cst_157 = arith.constant 6.250000e-02 : f32
    %570 = vector.broadcast %cst_157 : f32 to vector<16x1xf32>
    %571 = arith.mulf %569, %570 : vector<16x1xf32>
    %572 = arith.mulf %567, %567 : vector<16x16xf32>
    %cst_158 = arith.constant dense<0.000000e+00> : vector<16xf32>
    %573 = vector.multi_reduction <add>, %572, %cst_158 [1] : vector<16x16xf32> to vector<16xf32>
    %574 = vector.shape_cast %573 : vector<16xf32> to vector<16x1xf32>
    %cst_159 = arith.constant 6.250000e-02 : f32
    %575 = vector.broadcast %cst_159 : f32 to vector<16x1xf32>
    %576 = arith.mulf %574, %575 : vector<16x1xf32>
    %577 = arith.mulf %571, %571 : vector<16x1xf32>
    %578 = arith.subf %576, %577 : vector<16x1xf32>
    %cst_160 = arith.constant 0.000000e+00 : f32
    %579 = vector.broadcast %cst_160 : f32 to vector<16x1xf32>
    %580 = arith.maximumf %578, %579 : vector<16x1xf32>
    %c0_161 = arith.constant 0 : index
    %c24 = arith.constant 24 : index
    %581 = vector.load %arg12[%c0_161, %c24] : memref<16x128xf32, #tpu.memory_space<vmem>>, vector<16x1xf32>
    tpu.vector_store %arg12[%c0_161, %c24], %571 {strides = array<i32>} : memref<16x128xf32, #tpu.memory_space<vmem>>, vector<16x1xf32>,
    %582 = math.sqrt %580 : vector<16x1xf32>
    %c0_162 = arith.constant 0 : index
    %c56 = arith.constant 56 : index
    %583 = vector.load %arg12[%c0_162, %c56] : memref<16x128xf32, #tpu.memory_space<vmem>>, vector<16x1xf32>
    tpu.vector_store %arg12[%c0_162, %c56], %582 {strides = array<i32>} : memref<16x128xf32, #tpu.memory_space<vmem>>, vector<16x1xf32>,
    %c9 = arith.constant 9 : index
    %c0_163 = arith.constant 0 : index
    %584 = vector.load %arg5[%c9, %c0_163] : memref<16x5xf32, #tpu.memory_space<vmem>>, vector<1x1xf32>
    %585 = vector.extract %584[0, 0] : f32 from vector<1x1xf32>
    %586 = vector.broadcast %585 : f32 to vector<16x16xf32>
    %587 = arith.mulf %586, %539 : vector<16x16xf32>
    %c9_164 = arith.constant 9 : index
    %c1_165 = arith.constant 1 : index
    %588 = vector.load %arg5[%c9_164, %c1_165] : memref<16x5xf32, #tpu.memory_space<vmem>>, vector<1x1xf32>
    %589 = vector.extract %588[0, 0] : f32 from vector<1x1xf32>
    %590 = vector.broadcast %589 : f32 to vector<16x16xf32>
    %591 = arith.mulf %590, %540 : vector<16x16xf32>
    %592 = arith.addf %587, %591 : vector<16x16xf32>
    %c9_166 = arith.constant 9 : index
    %c2_167 = arith.constant 2 : index
    %593 = vector.load %arg5[%c9_166, %c2_167] : memref<16x5xf32, #tpu.memory_space<vmem>>, vector<1x1xf32>
    %594 = vector.extract %593[0, 0] : f32 from vector<1x1xf32>
    %595 = vector.broadcast %594 : f32 to vector<16x16xf32>
    %596 = arith.mulf %595, %541 : vector<16x16xf32>
    %597 = arith.addf %592, %596 : vector<16x16xf32>
    %c9_168 = arith.constant 9 : index
    %c3_169 = arith.constant 3 : index
    %598 = vector.load %arg5[%c9_168, %c3_169] : memref<16x5xf32, #tpu.memory_space<vmem>>, vector<1x1xf32>
    %599 = vector.extract %598[0, 0] : f32 from vector<1x1xf32>
    %600 = vector.broadcast %599 : f32 to vector<16x16xf32>
    %601 = arith.mulf %600, %542 : vector<16x16xf32>
    %602 = arith.addf %597, %601 : vector<16x16xf32>
    %c9_170 = arith.constant 9 : index
    %c4_171 = arith.constant 4 : index
    %603 = vector.load %arg5[%c9_170, %c4_171] : memref<16x5xf32, #tpu.memory_space<vmem>>, vector<1x1xf32>
    %604 = vector.extract %603[0, 0] : f32 from vector<1x1xf32>
    %605 = vector.broadcast %604 : f32 to vector<16x16xf32>
    %606 = arith.mulf %605, %543 : vector<16x16xf32>
    %607 = arith.addf %602, %606 : vector<16x16xf32>
    %cst_172 = arith.constant dense<0.000000e+00> : vector<16xf32>
    %608 = vector.multi_reduction <add>, %607, %cst_172 [1] : vector<16x16xf32> to vector<16xf32>
    %609 = vector.shape_cast %608 : vector<16xf32> to vector<16x1xf32>
    %cst_173 = arith.constant 6.250000e-02 : f32
    %610 = vector.broadcast %cst_173 : f32 to vector<16x1xf32>
    %611 = arith.mulf %609, %610 : vector<16x1xf32>
    %612 = arith.mulf %607, %607 : vector<16x16xf32>
    %cst_174 = arith.constant dense<0.000000e+00> : vector<16xf32>
    %613 = vector.multi_reduction <add>, %612, %cst_174 [1] : vector<16x16xf32> to vector<16xf32>
    %614 = vector.shape_cast %613 : vector<16xf32> to vector<16x1xf32>
    %cst_175 = arith.constant 6.250000e-02 : f32
    %615 = vector.broadcast %cst_175 : f32 to vector<16x1xf32>
    %616 = arith.mulf %614, %615 : vector<16x1xf32>
    %617 = arith.mulf %611, %611 : vector<16x1xf32>
    %618 = arith.subf %616, %617 : vector<16x1xf32>
    %cst_176 = arith.constant 0.000000e+00 : f32
    %619 = vector.broadcast %cst_176 : f32 to vector<16x1xf32>
    %620 = arith.maximumf %618, %619 : vector<16x1xf32>
    %c0_177 = arith.constant 0 : index
    %c25 = arith.constant 25 : index
    %621 = vector.load %arg12[%c0_177, %c25] : memref<16x128xf32, #tpu.memory_space<vmem>>, vector<16x1xf32>
    tpu.vector_store %arg12[%c0_177, %c25], %611 {strides = array<i32>} : memref<16x128xf32, #tpu.memory_space<vmem>>, vector<16x1xf32>,
    %622 = math.sqrt %620 : vector<16x1xf32>
    %c0_178 = arith.constant 0 : index
    %c57 = arith.constant 57 : index
    %623 = vector.load %arg12[%c0_178, %c57] : memref<16x128xf32, #tpu.memory_space<vmem>>, vector<16x1xf32>
    tpu.vector_store %arg12[%c0_178, %c57], %622 {strides = array<i32>} : memref<16x128xf32, #tpu.memory_space<vmem>>, vector<16x1xf32>,
    %c10 = arith.constant 10 : index
    %c0_179 = arith.constant 0 : index
    %624 = vector.load %arg5[%c10, %c0_179] : memref<16x5xf32, #tpu.memory_space<vmem>>, vector<1x1xf32>
    %625 = vector.extract %624[0, 0] : f32 from vector<1x1xf32>
    %626 = vector.broadcast %625 : f32 to vector<16x16xf32>
    %627 = arith.mulf %626, %539 : vector<16x16xf32>
    %c10_180 = arith.constant 10 : index
    %c1_181 = arith.constant 1 : index
    %628 = vector.load %arg5[%c10_180, %c1_181] : memref<16x5xf32, #tpu.memory_space<vmem>>, vector<1x1xf32>
    %629 = vector.extract %628[0, 0] : f32 from vector<1x1xf32>
    %630 = vector.broadcast %629 : f32 to vector<16x16xf32>
    %631 = arith.mulf %630, %540 : vector<16x16xf32>
    %632 = arith.addf %627, %631 : vector<16x16xf32>
    %c10_182 = arith.constant 10 : index
    %c2_183 = arith.constant 2 : index
    %633 = vector.load %arg5[%c10_182, %c2_183] : memref<16x5xf32, #tpu.memory_space<vmem>>, vector<1x1xf32>
    %634 = vector.extract %633[0, 0] : f32 from vector<1x1xf32>
    %635 = vector.broadcast %634 : f32 to vector<16x16xf32>
    %636 = arith.mulf %635, %541 : vector<16x16xf32>
    %637 = arith.addf %632, %636 : vector<16x16xf32>
    %c10_184 = arith.constant 10 : index
    %c3_185 = arith.constant 3 : index
    %638 = vector.load %arg5[%c10_184, %c3_185] : memref<16x5xf32, #tpu.memory_space<vmem>>, vector<1x1xf32>
    %639 = vector.extract %638[0, 0] : f32 from vector<1x1xf32>
    %640 = vector.broadcast %639 : f32 to vector<16x16xf32>
    %641 = arith.mulf %640, %542 : vector<16x16xf32>
    %642 = arith.addf %637, %641 : vector<16x16xf32>
    %c10_186 = arith.constant 10 : index
    %c4_187 = arith.constant 4 : index
    %643 = vector.load %arg5[%c10_186, %c4_187] : memref<16x5xf32, #tpu.memory_space<vmem>>, vector<1x1xf32>
    %644 = vector.extract %643[0, 0] : f32 from vector<1x1xf32>
    %645 = vector.broadcast %644 : f32 to vector<16x16xf32>
    %646 = arith.mulf %645, %543 : vector<16x16xf32>
    %647 = arith.addf %642, %646 : vector<16x16xf32>
    %cst_188 = arith.constant dense<0.000000e+00> : vector<16xf32>
    %648 = vector.multi_reduction <add>, %647, %cst_188 [1] : vector<16x16xf32> to vector<16xf32>
    %649 = vector.shape_cast %648 : vector<16xf32> to vector<16x1xf32>
    %cst_189 = arith.constant 6.250000e-02 : f32
    %650 = vector.broadcast %cst_189 : f32 to vector<16x1xf32>
    %651 = arith.mulf %649, %650 : vector<16x1xf32>
    %652 = arith.mulf %647, %647 : vector<16x16xf32>
    %cst_190 = arith.constant dense<0.000000e+00> : vector<16xf32>
    %653 = vector.multi_reduction <add>, %652, %cst_190 [1] : vector<16x16xf32> to vector<16xf32>
    %654 = vector.shape_cast %653 : vector<16xf32> to vector<16x1xf32>
    %cst_191 = arith.constant 6.250000e-02 : f32
    %655 = vector.broadcast %cst_191 : f32 to vector<16x1xf32>
    %656 = arith.mulf %654, %655 : vector<16x1xf32>
    %657 = arith.mulf %651, %651 : vector<16x1xf32>
    %658 = arith.subf %656, %657 : vector<16x1xf32>
    %cst_192 = arith.constant 0.000000e+00 : f32
    %659 = vector.broadcast %cst_192 : f32 to vector<16x1xf32>
    %660 = arith.maximumf %658, %659 : vector<16x1xf32>
    %c0_193 = arith.constant 0 : index
    %c26 = arith.constant 26 : index
    %661 = vector.load %arg12[%c0_193, %c26] : memref<16x128xf32, #tpu.memory_space<vmem>>, vector<16x1xf32>
    tpu.vector_store %arg12[%c0_193, %c26], %651 {strides = array<i32>} : memref<16x128xf32, #tpu.memory_space<vmem>>, vector<16x1xf32>,
    %662 = math.sqrt %660 : vector<16x1xf32>
    %c0_194 = arith.constant 0 : index
    %c58 = arith.constant 58 : index
    %663 = vector.load %arg12[%c0_194, %c58] : memref<16x128xf32, #tpu.memory_space<vmem>>, vector<16x1xf32>
    tpu.vector_store %arg12[%c0_194, %c58], %662 {strides = array<i32>} : memref<16x128xf32, #tpu.memory_space<vmem>>, vector<16x1xf32>,
    %c11 = arith.constant 11 : index
    %c0_195 = arith.constant 0 : index
    %664 = vector.load %arg5[%c11, %c0_195] : memref<16x5xf32, #tpu.memory_space<vmem>>, vector<1x1xf32>
    %665 = vector.extract %664[0, 0] : f32 from vector<1x1xf32>
    %666 = vector.broadcast %665 : f32 to vector<16x16xf32>
    %667 = arith.mulf %666, %539 : vector<16x16xf32>
    %c11_196 = arith.constant 11 : index
    %c1_197 = arith.constant 1 : index
    %668 = vector.load %arg5[%c11_196, %c1_197] : memref<16x5xf32, #tpu.memory_space<vmem>>, vector<1x1xf32>
    %669 = vector.extract %668[0, 0] : f32 from vector<1x1xf32>
    %670 = vector.broadcast %669 : f32 to vector<16x16xf32>
    %671 = arith.mulf %670, %540 : vector<16x16xf32>
    %672 = arith.addf %667, %671 : vector<16x16xf32>
    %c11_198 = arith.constant 11 : index
    %c2_199 = arith.constant 2 : index
    %673 = vector.load %arg5[%c11_198, %c2_199] : memref<16x5xf32, #tpu.memory_space<vmem>>, vector<1x1xf32>
    %674 = vector.extract %673[0, 0] : f32 from vector<1x1xf32>
    %675 = vector.broadcast %674 : f32 to vector<16x16xf32>
    %676 = arith.mulf %675, %541 : vector<16x16xf32>
    %677 = arith.addf %672, %676 : vector<16x16xf32>
    %c11_200 = arith.constant 11 : index
    %c3_201 = arith.constant 3 : index
    %678 = vector.load %arg5[%c11_200, %c3_201] : memref<16x5xf32, #tpu.memory_space<vmem>>, vector<1x1xf32>
    %679 = vector.extract %678[0, 0] : f32 from vector<1x1xf32>
    %680 = vector.broadcast %679 : f32 to vector<16x16xf32>
    %681 = arith.mulf %680, %542 : vector<16x16xf32>
    %682 = arith.addf %677, %681 : vector<16x16xf32>
    %c11_202 = arith.constant 11 : index
    %c4_203 = arith.constant 4 : index
    %683 = vector.load %arg5[%c11_202, %c4_203] : memref<16x5xf32, #tpu.memory_space<vmem>>, vector<1x1xf32>
    %684 = vector.extract %683[0, 0] : f32 from vector<1x1xf32>
    %685 = vector.broadcast %684 : f32 to vector<16x16xf32>
    %686 = arith.mulf %685, %543 : vector<16x16xf32>
    %687 = arith.addf %682, %686 : vector<16x16xf32>
    %cst_204 = arith.constant dense<0.000000e+00> : vector<16xf32>
    %688 = vector.multi_reduction <add>, %687, %cst_204 [1] : vector<16x16xf32> to vector<16xf32>
    %689 = vector.shape_cast %688 : vector<16xf32> to vector<16x1xf32>
    %cst_205 = arith.constant 6.250000e-02 : f32
    %690 = vector.broadcast %cst_205 : f32 to vector<16x1xf32>
    %691 = arith.mulf %689, %690 : vector<16x1xf32>
    %692 = arith.mulf %687, %687 : vector<16x16xf32>
    %cst_206 = arith.constant dense<0.000000e+00> : vector<16xf32>
    %693 = vector.multi_reduction <add>, %692, %cst_206 [1] : vector<16x16xf32> to vector<16xf32>
    %694 = vector.shape_cast %693 : vector<16xf32> to vector<16x1xf32>
    %cst_207 = arith.constant 6.250000e-02 : f32
    %695 = vector.broadcast %cst_207 : f32 to vector<16x1xf32>
    %696 = arith.mulf %694, %695 : vector<16x1xf32>
    %697 = arith.mulf %691, %691 : vector<16x1xf32>
    %698 = arith.subf %696, %697 : vector<16x1xf32>
    %cst_208 = arith.constant 0.000000e+00 : f32
    %699 = vector.broadcast %cst_208 : f32 to vector<16x1xf32>
    %700 = arith.maximumf %698, %699 : vector<16x1xf32>
    %c0_209 = arith.constant 0 : index
    %c27 = arith.constant 27 : index
    %701 = vector.load %arg12[%c0_209, %c27] : memref<16x128xf32, #tpu.memory_space<vmem>>, vector<16x1xf32>
    tpu.vector_store %arg12[%c0_209, %c27], %691 {strides = array<i32>} : memref<16x128xf32, #tpu.memory_space<vmem>>, vector<16x1xf32>,
    %702 = math.sqrt %700 : vector<16x1xf32>
    %c0_210 = arith.constant 0 : index
    %c59 = arith.constant 59 : index
    %703 = vector.load %arg12[%c0_210, %c59] : memref<16x128xf32, #tpu.memory_space<vmem>>, vector<16x1xf32>
    tpu.vector_store %arg12[%c0_210, %c59], %702 {strides = array<i32>} : memref<16x128xf32, #tpu.memory_space<vmem>>, vector<16x1xf32>,
    %c12 = arith.constant 12 : index
    %c0_211 = arith.constant 0 : index
    %704 = vector.load %arg5[%c12, %c0_211] : memref<16x5xf32, #tpu.memory_space<vmem>>, vector<1x1xf32>
    %705 = vector.extract %704[0, 0] : f32 from vector<1x1xf32>
    %706 = vector.broadcast %705 : f32 to vector<16x16xf32>
    %707 = arith.mulf %706, %539 : vector<16x16xf32>
    %c12_212 = arith.constant 12 : index
    %c1_213 = arith.constant 1 : index
    %708 = vector.load %arg5[%c12_212, %c1_213] : memref<16x5xf32, #tpu.memory_space<vmem>>, vector<1x1xf32>
    %709 = vector.extract %708[0, 0] : f32 from vector<1x1xf32>
    %710 = vector.broadcast %709 : f32 to vector<16x16xf32>
    %711 = arith.mulf %710, %540 : vector<16x16xf32>
    %712 = arith.addf %707, %711 : vector<16x16xf32>
    %c12_214 = arith.constant 12 : index
    %c2_215 = arith.constant 2 : index
    %713 = vector.load %arg5[%c12_214, %c2_215] : memref<16x5xf32, #tpu.memory_space<vmem>>, vector<1x1xf32>
    %714 = vector.extract %713[0, 0] : f32 from vector<1x1xf32>
    %715 = vector.broadcast %714 : f32 to vector<16x16xf32>
    %716 = arith.mulf %715, %541 : vector<16x16xf32>
    %717 = arith.addf %712, %716 : vector<16x16xf32>
    %c12_216 = arith.constant 12 : index
    %c3_217 = arith.constant 3 : index
    %718 = vector.load %arg5[%c12_216, %c3_217] : memref<16x5xf32, #tpu.memory_space<vmem>>, vector<1x1xf32>
    %719 = vector.extract %718[0, 0] : f32 from vector<1x1xf32>
    %720 = vector.broadcast %719 : f32 to vector<16x16xf32>
    %721 = arith.mulf %720, %542 : vector<16x16xf32>
    %722 = arith.addf %717, %721 : vector<16x16xf32>
    %c12_218 = arith.constant 12 : index
    %c4_219 = arith.constant 4 : index
    %723 = vector.load %arg5[%c12_218, %c4_219] : memref<16x5xf32, #tpu.memory_space<vmem>>, vector<1x1xf32>
    %724 = vector.extract %723[0, 0] : f32 from vector<1x1xf32>
    %725 = vector.broadcast %724 : f32 to vector<16x16xf32>
    %726 = arith.mulf %725, %543 : vector<16x16xf32>
    %727 = arith.addf %722, %726 : vector<16x16xf32>
    %cst_220 = arith.constant dense<0.000000e+00> : vector<16xf32>
    %728 = vector.multi_reduction <add>, %727, %cst_220 [1] : vector<16x16xf32> to vector<16xf32>
    %729 = vector.shape_cast %728 : vector<16xf32> to vector<16x1xf32>
    %cst_221 = arith.constant 6.250000e-02 : f32
    %730 = vector.broadcast %cst_221 : f32 to vector<16x1xf32>
    %731 = arith.mulf %729, %730 : vector<16x1xf32>
    %732 = arith.mulf %727, %727 : vector<16x16xf32>
    %cst_222 = arith.constant dense<0.000000e+00> : vector<16xf32>
    %733 = vector.multi_reduction <add>, %732, %cst_222 [1] : vector<16x16xf32> to vector<16xf32>
    %734 = vector.shape_cast %733 : vector<16xf32> to vector<16x1xf32>
    %cst_223 = arith.constant 6.250000e-02 : f32
    %735 = vector.broadcast %cst_223 : f32 to vector<16x1xf32>
    %736 = arith.mulf %734, %735 : vector<16x1xf32>
    %737 = arith.mulf %731, %731 : vector<16x1xf32>
    %738 = arith.subf %736, %737 : vector<16x1xf32>
    %cst_224 = arith.constant 0.000000e+00 : f32
    %739 = vector.broadcast %cst_224 : f32 to vector<16x1xf32>
    %740 = arith.maximumf %738, %739 : vector<16x1xf32>
    %c0_225 = arith.constant 0 : index
    %c28 = arith.constant 28 : index
    %741 = vector.load %arg12[%c0_225, %c28] : memref<16x128xf32, #tpu.memory_space<vmem>>, vector<16x1xf32>
    tpu.vector_store %arg12[%c0_225, %c28], %731 {strides = array<i32>} : memref<16x128xf32, #tpu.memory_space<vmem>>, vector<16x1xf32>,
    %742 = math.sqrt %740 : vector<16x1xf32>
    %c0_226 = arith.constant 0 : index
    %c60 = arith.constant 60 : index
    %743 = vector.load %arg12[%c0_226, %c60] : memref<16x128xf32, #tpu.memory_space<vmem>>, vector<16x1xf32>
    tpu.vector_store %arg12[%c0_226, %c60], %742 {strides = array<i32>} : memref<16x128xf32, #tpu.memory_space<vmem>>, vector<16x1xf32>,
    %c13 = arith.constant 13 : index
    %c0_227 = arith.constant 0 : index
    %744 = vector.load %arg5[%c13, %c0_227] : memref<16x5xf32, #tpu.memory_space<vmem>>, vector<1x1xf32>
    %745 = vector.extract %744[0, 0] : f32 from vector<1x1xf32>
    %746 = vector.broadcast %745 : f32 to vector<16x16xf32>
    %747 = arith.mulf %746, %539 : vector<16x16xf32>
    %c13_228 = arith.constant 13 : index
    %c1_229 = arith.constant 1 : index
    %748 = vector.load %arg5[%c13_228, %c1_229] : memref<16x5xf32, #tpu.memory_space<vmem>>, vector<1x1xf32>
    %749 = vector.extract %748[0, 0] : f32 from vector<1x1xf32>
    %750 = vector.broadcast %749 : f32 to vector<16x16xf32>
    %751 = arith.mulf %750, %540 : vector<16x16xf32>
    %752 = arith.addf %747, %751 : vector<16x16xf32>
    %c13_230 = arith.constant 13 : index
    %c2_231 = arith.constant 2 : index
    %753 = vector.load %arg5[%c13_230, %c2_231] : memref<16x5xf32, #tpu.memory_space<vmem>>, vector<1x1xf32>
    %754 = vector.extract %753[0, 0] : f32 from vector<1x1xf32>
    %755 = vector.broadcast %754 : f32 to vector<16x16xf32>
    %756 = arith.mulf %755, %541 : vector<16x16xf32>
    %757 = arith.addf %752, %756 : vector<16x16xf32>
    %c13_232 = arith.constant 13 : index
    %c3_233 = arith.constant 3 : index
    %758 = vector.load %arg5[%c13_232, %c3_233] : memref<16x5xf32, #tpu.memory_space<vmem>>, vector<1x1xf32>
    %759 = vector.extract %758[0, 0] : f32 from vector<1x1xf32>
    %760 = vector.broadcast %759 : f32 to vector<16x16xf32>
    %761 = arith.mulf %760, %542 : vector<16x16xf32>
    %762 = arith.addf %757, %761 : vector<16x16xf32>
    %c13_234 = arith.constant 13 : index
    %c4_235 = arith.constant 4 : index
    %763 = vector.load %arg5[%c13_234, %c4_235] : memref<16x5xf32, #tpu.memory_space<vmem>>, vector<1x1xf32>
    %764 = vector.extract %763[0, 0] : f32 from vector<1x1xf32>
    %765 = vector.broadcast %764 : f32 to vector<16x16xf32>
    %766 = arith.mulf %765, %543 : vector<16x16xf32>
    %767 = arith.addf %762, %766 : vector<16x16xf32>
    %cst_236 = arith.constant dense<0.000000e+00> : vector<16xf32>
    %768 = vector.multi_reduction <add>, %767, %cst_236 [1] : vector<16x16xf32> to vector<16xf32>
    %769 = vector.shape_cast %768 : vector<16xf32> to vector<16x1xf32>
    %cst_237 = arith.constant 6.250000e-02 : f32
    %770 = vector.broadcast %cst_237 : f32 to vector<16x1xf32>
    %771 = arith.mulf %769, %770 : vector<16x1xf32>
    %772 = arith.mulf %767, %767 : vector<16x16xf32>
    %cst_238 = arith.constant dense<0.000000e+00> : vector<16xf32>
    %773 = vector.multi_reduction <add>, %772, %cst_238 [1] : vector<16x16xf32> to vector<16xf32>
    %774 = vector.shape_cast %773 : vector<16xf32> to vector<16x1xf32>
    %cst_239 = arith.constant 6.250000e-02 : f32
    %775 = vector.broadcast %cst_239 : f32 to vector<16x1xf32>
    %776 = arith.mulf %774, %775 : vector<16x1xf32>
    %777 = arith.mulf %771, %771 : vector<16x1xf32>
    %778 = arith.subf %776, %777 : vector<16x1xf32>
    %cst_240 = arith.constant 0.000000e+00 : f32
    %779 = vector.broadcast %cst_240 : f32 to vector<16x1xf32>
    %780 = arith.maximumf %778, %779 : vector<16x1xf32>
    %c0_241 = arith.constant 0 : index
    %c29 = arith.constant 29 : index
    %781 = vector.load %arg12[%c0_241, %c29] : memref<16x128xf32, #tpu.memory_space<vmem>>, vector<16x1xf32>
    tpu.vector_store %arg12[%c0_241, %c29], %771 {strides = array<i32>} : memref<16x128xf32, #tpu.memory_space<vmem>>, vector<16x1xf32>,
    %782 = math.sqrt %780 : vector<16x1xf32>
    %c0_242 = arith.constant 0 : index
    %c61 = arith.constant 61 : index
    %783 = vector.load %arg12[%c0_242, %c61] : memref<16x128xf32, #tpu.memory_space<vmem>>, vector<16x1xf32>
    tpu.vector_store %arg12[%c0_242, %c61], %782 {strides = array<i32>} : memref<16x128xf32, #tpu.memory_space<vmem>>, vector<16x1xf32>,
    %c14 = arith.constant 14 : index
    %c0_243 = arith.constant 0 : index
    %784 = vector.load %arg5[%c14, %c0_243] : memref<16x5xf32, #tpu.memory_space<vmem>>, vector<1x1xf32>
    %785 = vector.extract %784[0, 0] : f32 from vector<1x1xf32>
    %786 = vector.broadcast %785 : f32 to vector<16x16xf32>
    %787 = arith.mulf %786, %539 : vector<16x16xf32>
    %c14_244 = arith.constant 14 : index
    %c1_245 = arith.constant 1 : index
    %788 = vector.load %arg5[%c14_244, %c1_245] : memref<16x5xf32, #tpu.memory_space<vmem>>, vector<1x1xf32>
    %789 = vector.extract %788[0, 0] : f32 from vector<1x1xf32>
    %790 = vector.broadcast %789 : f32 to vector<16x16xf32>
    %791 = arith.mulf %790, %540 : vector<16x16xf32>
    %792 = arith.addf %787, %791 : vector<16x16xf32>
    %c14_246 = arith.constant 14 : index
    %c2_247 = arith.constant 2 : index
    %793 = vector.load %arg5[%c14_246, %c2_247] : memref<16x5xf32, #tpu.memory_space<vmem>>, vector<1x1xf32>
    %794 = vector.extract %793[0, 0] : f32 from vector<1x1xf32>
    %795 = vector.broadcast %794 : f32 to vector<16x16xf32>
    %796 = arith.mulf %795, %541 : vector<16x16xf32>
    %797 = arith.addf %792, %796 : vector<16x16xf32>
    %c14_248 = arith.constant 14 : index
    %c3_249 = arith.constant 3 : index
    %798 = vector.load %arg5[%c14_248, %c3_249] : memref<16x5xf32, #tpu.memory_space<vmem>>, vector<1x1xf32>
    %799 = vector.extract %798[0, 0] : f32 from vector<1x1xf32>
    %800 = vector.broadcast %799 : f32 to vector<16x16xf32>
    %801 = arith.mulf %800, %542 : vector<16x16xf32>
    %802 = arith.addf %797, %801 : vector<16x16xf32>
    %c14_250 = arith.constant 14 : index
    %c4_251 = arith.constant 4 : index
    %803 = vector.load %arg5[%c14_250, %c4_251] : memref<16x5xf32, #tpu.memory_space<vmem>>, vector<1x1xf32>
    %804 = vector.extract %803[0, 0] : f32 from vector<1x1xf32>
    %805 = vector.broadcast %804 : f32 to vector<16x16xf32>
    %806 = arith.mulf %805, %543 : vector<16x16xf32>
    %807 = arith.addf %802, %806 : vector<16x16xf32>
    %cst_252 = arith.constant dense<0.000000e+00> : vector<16xf32>
    %808 = vector.multi_reduction <add>, %807, %cst_252 [1] : vector<16x16xf32> to vector<16xf32>
    %809 = vector.shape_cast %808 : vector<16xf32> to vector<16x1xf32>
    %cst_253 = arith.constant 6.250000e-02 : f32
    %810 = vector.broadcast %cst_253 : f32 to vector<16x1xf32>
    %811 = arith.mulf %809, %810 : vector<16x1xf32>
    %812 = arith.mulf %807, %807 : vector<16x16xf32>
    %cst_254 = arith.constant dense<0.000000e+00> : vector<16xf32>
    %813 = vector.multi_reduction <add>, %812, %cst_254 [1] : vector<16x16xf32> to vector<16xf32>
    %814 = vector.shape_cast %813 : vector<16xf32> to vector<16x1xf32>
    %cst_255 = arith.constant 6.250000e-02 : f32
    %815 = vector.broadcast %cst_255 : f32 to vector<16x1xf32>
    %816 = arith.mulf %814, %815 : vector<16x1xf32>
    %817 = arith.mulf %811, %811 : vector<16x1xf32>
    %818 = arith.subf %816, %817 : vector<16x1xf32>
    %cst_256 = arith.constant 0.000000e+00 : f32
    %819 = vector.broadcast %cst_256 : f32 to vector<16x1xf32>
    %820 = arith.maximumf %818, %819 : vector<16x1xf32>
    %c0_257 = arith.constant 0 : index
    %c30 = arith.constant 30 : index
    %821 = vector.load %arg12[%c0_257, %c30] : memref<16x128xf32, #tpu.memory_space<vmem>>, vector<16x1xf32>
    tpu.vector_store %arg12[%c0_257, %c30], %811 {strides = array<i32>} : memref<16x128xf32, #tpu.memory_space<vmem>>, vector<16x1xf32>,
    %822 = math.sqrt %820 : vector<16x1xf32>
    %c0_258 = arith.constant 0 : index
    %c62 = arith.constant 62 : index
    %823 = vector.load %arg12[%c0_258, %c62] : memref<16x128xf32, #tpu.memory_space<vmem>>, vector<16x1xf32>
    tpu.vector_store %arg12[%c0_258, %c62], %822 {strides = array<i32>} : memref<16x128xf32, #tpu.memory_space<vmem>>, vector<16x1xf32>,
    %c15 = arith.constant 15 : index
    %c0_259 = arith.constant 0 : index
    %824 = vector.load %arg5[%c15, %c0_259] : memref<16x5xf32, #tpu.memory_space<vmem>>, vector<1x1xf32>
    %825 = vector.extract %824[0, 0] : f32 from vector<1x1xf32>
    %826 = vector.broadcast %825 : f32 to vector<16x16xf32>
    %827 = arith.mulf %826, %539 : vector<16x16xf32>
    %c15_260 = arith.constant 15 : index
    %c1_261 = arith.constant 1 : index
    %828 = vector.load %arg5[%c15_260, %c1_261] : memref<16x5xf32, #tpu.memory_space<vmem>>, vector<1x1xf32>
    %829 = vector.extract %828[0, 0] : f32 from vector<1x1xf32>
    %830 = vector.broadcast %829 : f32 to vector<16x16xf32>
    %831 = arith.mulf %830, %540 : vector<16x16xf32>
    %832 = arith.addf %827, %831 : vector<16x16xf32>
    %c15_262 = arith.constant 15 : index
    %c2_263 = arith.constant 2 : index
    %833 = vector.load %arg5[%c15_262, %c2_263] : memref<16x5xf32, #tpu.memory_space<vmem>>, vector<1x1xf32>
    %834 = vector.extract %833[0, 0] : f32 from vector<1x1xf32>
    %835 = vector.broadcast %834 : f32 to vector<16x16xf32>
    %836 = arith.mulf %835, %541 : vector<16x16xf32>
    %837 = arith.addf %832, %836 : vector<16x16xf32>
    %c15_264 = arith.constant 15 : index
    %c3_265 = arith.constant 3 : index
    %838 = vector.load %arg5[%c15_264, %c3_265] : memref<16x5xf32, #tpu.memory_space<vmem>>, vector<1x1xf32>
    %839 = vector.extract %838[0, 0] : f32 from vector<1x1xf32>
    %840 = vector.broadcast %839 : f32 to vector<16x16xf32>
    %841 = arith.mulf %840, %542 : vector<16x16xf32>
    %842 = arith.addf %837, %841 : vector<16x16xf32>
    %c15_266 = arith.constant 15 : index
    %c4_267 = arith.constant 4 : index
    %843 = vector.load %arg5[%c15_266, %c4_267] : memref<16x5xf32, #tpu.memory_space<vmem>>, vector<1x1xf32>
    %844 = vector.extract %843[0, 0] : f32 from vector<1x1xf32>
    %845 = vector.broadcast %844 : f32 to vector<16x16xf32>
    %846 = arith.mulf %845, %543 : vector<16x16xf32>
    %847 = arith.addf %842, %846 : vector<16x16xf32>
    %cst_268 = arith.constant dense<0.000000e+00> : vector<16xf32>
    %848 = vector.multi_reduction <add>, %847, %cst_268 [1] : vector<16x16xf32> to vector<16xf32>
    %849 = vector.shape_cast %848 : vector<16xf32> to vector<16x1xf32>
    %cst_269 = arith.constant 6.250000e-02 : f32
    %850 = vector.broadcast %cst_269 : f32 to vector<16x1xf32>
    %851 = arith.mulf %849, %850 : vector<16x1xf32>
    %852 = arith.mulf %847, %847 : vector<16x16xf32>
    %cst_270 = arith.constant dense<0.000000e+00> : vector<16xf32>
    %853 = vector.multi_reduction <add>, %852, %cst_270 [1] : vector<16x16xf32> to vector<16xf32>
    %854 = vector.shape_cast %853 : vector<16xf32> to vector<16x1xf32>
    %cst_271 = arith.constant 6.250000e-02 : f32
    %855 = vector.broadcast %cst_271 : f32 to vector<16x1xf32>
    %856 = arith.mulf %854, %855 : vector<16x1xf32>
    %857 = arith.mulf %851, %851 : vector<16x1xf32>
    %858 = arith.subf %856, %857 : vector<16x1xf32>
    %cst_272 = arith.constant 0.000000e+00 : f32
    %859 = vector.broadcast %cst_272 : f32 to vector<16x1xf32>
    %860 = arith.maximumf %858, %859 : vector<16x1xf32>
    %c0_273 = arith.constant 0 : index
    %c31 = arith.constant 31 : index
    %861 = vector.load %arg12[%c0_273, %c31] : memref<16x128xf32, #tpu.memory_space<vmem>>, vector<16x1xf32>
    tpu.vector_store %arg12[%c0_273, %c31], %851 {strides = array<i32>} : memref<16x128xf32, #tpu.memory_space<vmem>>, vector<16x1xf32>,
    %862 = math.sqrt %860 : vector<16x1xf32>
    %c0_274 = arith.constant 0 : index
    %c63 = arith.constant 63 : index
    %863 = vector.load %arg12[%c0_274, %c63] : memref<16x128xf32, #tpu.memory_space<vmem>>, vector<16x1xf32>
    tpu.vector_store %arg12[%c0_274, %c63], %862 {strides = array<i32>} : memref<16x128xf32, #tpu.memory_space<vmem>>, vector<16x1xf32>,
    %c0_275 = arith.constant 0 : index
    %c16_276 = arith.constant 16 : index
    %864 = vector.load %arg12[%c0_275, %c16_276] : memref<16x128xf32, #tpu.memory_space<vmem>>, vector<16x16xf32>
    %c0_277 = arith.constant 0 : index
    %c0_278 = arith.constant 0 : index
    %865 = vector.load %arg6[%c0_277, %c0_278] : memref<1x16xf32, #tpu.memory_space<vmem>>, vector<1x16xf32>
    %866 = vector.broadcast %865 : vector<1x16xf32> to vector<16x16xf32>
    %867 = arith.addf %864, %866 : vector<16x16xf32>
    %c0_279 = arith.constant 0 : index
    %c16_280 = arith.constant 16 : index
    %868 = vector.load %arg12[%c0_279, %c16_280] : memref<16x128xf32, #tpu.memory_space<vmem>>, vector<16x16xf32>
    tpu.vector_store %arg12[%c0_279, %c16_280], %867 {strides = array<i32>} : memref<16x128xf32, #tpu.memory_space<vmem>>, vector<16x16xf32>,
    %c0_281 = arith.constant 0 : index
    %c0_282 = arith.constant 0 : index
    %869 = vector.load %arg12[%c0_281, %c0_282] : memref<16x128xf32, #tpu.memory_space<vmem>>, vector<16x128xf32>
    %c0_283 = arith.constant 0 : index
    %c0_284 = arith.constant 0 : index
    %870 = vector.load %arg7[%c0_283, %c0_284] : memref<128x128xf32, #tpu.memory_space<vmem>>, vector<128x128xf32>
    %cst_285 = arith.constant dense<0.000000e+00> : vector<16x128xf32>
    %871 = tpu.matmul %869, %870, %cst_285 {dimension_numbers = #tpu.dot_dimension_numbers<[1], [0], [0], [1], [0, 0, 1, 1], [], []>} : vector<16x128xf32>, vector<128x128xf32>, vector<16x128xf32> -> vector<16x128xf32>
    %c0_286 = arith.constant 0 : index
    %c0_287 = arith.constant 0 : index
    %872 = vector.load %arg8[%c0_286, %c0_287] : memref<1x128xf32, #tpu.memory_space<vmem>>, vector<1x128xf32>
    %873 = vector.broadcast %872 : vector<1x128xf32> to vector<16x128xf32>
    %874 = arith.addf %871, %873 : vector<16x128xf32>
    %cst_288 = arith.constant 0.000000e+00 : f32
    %875 = vector.broadcast %cst_288 : f32 to vector<16x128xf32>
    %876 = arith.maximumf %874, %875 : vector<16x128xf32>
    %c0_289 = arith.constant 0 : index
    %c0_290 = arith.constant 0 : index
    %877 = vector.load %arg9[%c0_289, %c0_290] : memref<128x128xf32, #tpu.memory_space<vmem>>, vector<128x128xf32>
    %cst_291 = arith.constant dense<0.000000e+00> : vector<16x128xf32>
    %878 = tpu.matmul %876, %877, %cst_291 {dimension_numbers = #tpu.dot_dimension_numbers<[1], [0], [0], [1], [0, 0, 1, 1], [], []>} : vector<16x128xf32>, vector<128x128xf32>, vector<16x128xf32> -> vector<16x128xf32>
    %c0_292 = arith.constant 0 : index
    %c0_293 = arith.constant 0 : index
    %879 = vector.load %arg10[%c0_292, %c0_293] : memref<1x128xf32, #tpu.memory_space<vmem>>, vector<1x128xf32>
    %880 = vector.broadcast %879 : vector<1x128xf32> to vector<16x128xf32>
    %881 = arith.addf %878, %880 : vector<16x128xf32>
    %c0_294 = arith.constant 0 : index
    %c0_295 = arith.constant 0 : index
    %882 = vector.load %arg11[%c0_294, %c0_295] : memref<16x128xf32, #tpu.memory_space<vmem>>, vector<16x128xf32>
    tpu.vector_store %arg11[%c0_294, %c0_295], %881 {strides = array<i32>} : memref<16x128xf32, #tpu.memory_space<vmem>>, vector<16x128xf32>,
    return
  }
  func.func @transform_0(%arg0: i32) -> (i32, i32) {
    %c0_i32 = arith.constant 0 : i32
    %c0_i32_0 = arith.constant 0 : i32
    return %arg0, %c0_i32 : i32, i32
  }
  func.func @transform_1(%arg0: i32) -> (i32, i32) {
    %c0_i32 = arith.constant 0 : i32
    %c0_i32_0 = arith.constant 0 : i32
    return %arg0, %c0_i32 : i32, i32
  }
  func.func @transform_2(%arg0: i32) -> (i32, i32) {
    %c0_i32 = arith.constant 0 : i32
    %c0_i32_0 = arith.constant 0 : i32
    %c0_i32_1 = arith.constant 0 : i32
    return %c0_i32, %c0_i32_0 : i32, i32
  }
  func.func @transform_3(%arg0: i32) -> (i32, i32) {
    %c0_i32 = arith.constant 0 : i32
    %c0_i32_0 = arith.constant 0 : i32
    %c0_i32_1 = arith.constant 0 : i32
    return %c0_i32, %c0_i32_0 : i32, i32
  }
  func.func @transform_4(%arg0: i32) -> (i32, i32) {
    %c0_i32 = arith.constant 0 : i32
    %c0_i32_0 = arith.constant 0 : i32
    %c0_i32_1 = arith.constant 0 : i32
    return %c0_i32, %c0_i32_0 : i32, i32
  }
  func.func @transform_5(%arg0: i32) -> (i32, i32) {
    %c0_i32 = arith.constant 0 : i32
    %c0_i32_0 = arith.constant 0 : i32
    %c0_i32_1 = arith.constant 0 : i32
    return %c0_i32, %c0_i32_0 : i32, i32
  }
  func.func @transform_6(%arg0: i32) -> (i32, i32) {
    %c0_i32 = arith.constant 0 : i32
    %c0_i32_0 = arith.constant 0 : i32
    %c0_i32_1 = arith.constant 0 : i32
    return %c0_i32, %c0_i32_0 : i32, i32
  }
  func.func @transform_7(%arg0: i32) -> (i32, i32) {
    %c0_i32 = arith.constant 0 : i32
    %c0_i32_0 = arith.constant 0 : i32
    %c0_i32_1 = arith.constant 0 : i32
    return %c0_i32, %c0_i32_0 : i32, i32
  }
  func.func @transform_8(%arg0: i32) -> (i32, i32) {
    %c0_i32 = arith.constant 0 : i32
    %c0_i32_0 = arith.constant 0 : i32
    %c0_i32_1 = arith.constant 0 : i32
    return %c0_i32, %c0_i32_0 : i32, i32
  }
  func.func @transform_9(%arg0: i32) -> (i32, i32) {
    %c0_i32 = arith.constant 0 : i32
    %c0_i32_0 = arith.constant 0 : i32
    %c0_i32_1 = arith.constant 0 : i32
    return %c0_i32, %c0_i32_0 : i32, i32
  }
  func.func @transform_10(%arg0: i32) -> (i32, i32) {
    %c0_i32 = arith.constant 0 : i32
    %c0_i32_0 = arith.constant 0 : i32
    return %arg0, %c0_i32 : i32, i32
  }
}

</mosaic_0001>

<bundles_post_ra>
// kernel: tpu_custom_call.1
= control target key start
LH: loop header
LB: loop body
LE: loop exit
PB: predicated region body
PF: predicated region fallthrough
CT: control target
= control target key end

     0   :  { %15 = vsyncpa [#allocation4], 0  ;;  %s5166_s0 = inlined_call_operand.vmem [shape: s32[16,32], index: 0, kind: input, shape index: {}]   ;;  %s5167_s1 = inlined_call_operand.vmem [shape: bf16[16,40], index: 1, kind: input, shape index: {}]   ;;  %s5168_s2 = inlined_call_operand.hbm [shape: f32[14,16], index: 2, kind: input, shape index: {}]   ;;  %s5169_s3 = inlined_call_operand.hbm [shape: f32[14,16], index: 3, kind: input, shape index: {}]   ;;  %s5170_s4 = inlined_call_operand.vmem [shape: f32[16,5], index: 4, kind: input, shape index: {}]   ;;  %s5171_s5 = inlined_call_operand.vmem [shape: f32[1,16], index: 5, kind: input, shape index: {}]   ;;  %s5172_s6 = inlined_call_operand.hbm [shape: f32[128,128], index: 6, kind: input, shape index: {}]   ;;  %s5173_s7 = inlined_call_operand.vmem [shape: f32[1,128], index: 7, kind: input, shape index: {}]   ;;  %s5174_s8 = inlined_call_operand.hbm [shape: f32[128,128], index: 8, kind: input, shape index: {}]   ;;  %s5175_s9 = inlined_call_operand.vmem [shape: f32[1,128], index: 9, kind: input, shape index: {}]   ;;  %s5176_s10 = inlined_call_operand.hbm [shape: f32[16,128], index: 10, kind: output, shape index: {}]  }
   0x1   :  { %16 = vsyncpa [#allocation7], 0 }
   0x2   :  { %17 = vsyncpa [#allocation10], 0 }
   0x3   :  { %18 = vsyncpa [#allocation5], 0  ;;  %s3649_s13 = smov [#allocation6]   ;;  %s3650_s15 = smov [#allocation3]  }
   0x4   :  { %s40_s14 = sshll.u32 %s3649_s13, 4  ;;  %s28_s16 = sshll.u32 %s3650_s15, 4  ;;  %s41_s14 = int_to_ptr.vmem [resolvable:$true] %s40_s14  ;;  %s29_s16 = int_to_ptr.vmem [resolvable:$true] %s28_s16 }
   0x5   :  { %s3549_s17 = scalar_lea.vmem %s41_s14, 256  ;;  %p3554_p1 = scmp.lt.s32.totalorder %s41_s14, %s41_s14 }
   0x6   :  { %p3550_p0 = scmp.ne.s32.totalorder %s41_s14, %s3549_s17  ;;  %p3555_p2 = scmp.lt.s32.totalorder %s3549_s17, %s3549_s17 }
   0x8   :  { %p3556_p3 = por %p3555_p2, %p3554_p1 }
   0xa   :  { %p3557_p4 = pnand %p3556_p3, %p3550_p0 }
   0xc   :  { %3560 = shalt.err (!%p3557_p4)
}
   0xd   :  { %s3651_s18 = smov 128   ;;  %s3652_s19 = smov 8  }
   0xe   :  { %46 = dma.hbm_to_vmem [thread:$0]  %s5169_s3, 256, %s41_s14, [#allocation7], %s3651_s18, %s3651_s18, %s3652_s19  }
   0xf   :  { %s3569_s22 = scalar_lea.vmem %s29_s16, 256  ;;  %p3574_p6 = scmp.lt.s32.totalorder %s29_s16, %s29_s16 }
  0x10   :  { %p3570_p5 = scmp.ne.s32.totalorder %s29_s16, %s3569_s22  ;;  %p3575_p7 = scmp.lt.s32.totalorder %s3569_s22, %s3569_s22 }
  0x12   :  { %p3576_p8 = por %p3575_p7, %p3574_p6 }
  0x14   :  { %p3577_p9 = pnand %p3576_p8, %p3570_p5 }
  0x16   :  { %3580 = shalt.err (!%p3577_p9)
}
  0x17   :  { %34 = dma.hbm_to_vmem [thread:$0]  %s5168_s2, 256, %s29_s16, [#allocation4], %s3651_s18, %s3651_s18, %s3652_s19  }
  0x18   :  { %s3653_s25 = smov [#allocation8]   ;;  %s3654_s27 = smov [#allocation9]  }
  0x19   :  { %s56_s26 = sshll.u32 %s3653_s25, 4  ;;  %s70_s28 = sshll.u32 %s3654_s27, 4  ;;  %s57_s26 = int_to_ptr.vmem [resolvable:$true] %s56_s26  ;;  %s71_s28 = int_to_ptr.vmem [resolvable:$true] %s70_s28 }
  0x1a   :  { %s3589_s3 = scalar_lea.vmem %s57_s26, 2048  ;;  %p3594_p11 = scmp.lt.s32.totalorder %s57_s26, %s57_s26 }
  0x1b   :  { %p3590_p10 = scmp.ne.s32.totalorder %s57_s26, %s3589_s3  ;;  %p3595_p12 = scmp.lt.s32.totalorder %s3589_s3, %s3589_s3 }
  0x1d   :  { %p3596_p13 = por %p3595_p12, %p3594_p11 }
  0x1f   :  { %p3597_p0 = pnand %p3596_p13, %p3590_p10 }
  0x21   :  { %3600 = shalt.err (!%p3597_p0)
}
  0x22   :  { %62 = dma.hbm_to_vmem [thread:$0]  %s5172_s6, 2048, %s57_s26, [#allocation7], %s3651_s18, %s3651_s18, %s3652_s19  }
  0x23   :  { %s3609_s2 = scalar_lea.vmem %s71_s28, 2048  ;;  %p3614_p2 = scmp.lt.s32.totalorder %s71_s28, %s71_s28 }
  0x24   :  { %p3610_p1 = scmp.ne.s32.totalorder %s71_s28, %s3609_s2  ;;  %p3615_p3 = scmp.lt.s32.totalorder %s3609_s2, %s3609_s2 }
  0x26   :  { %p3616_p4 = por %p3615_p3, %p3614_p2 }
  0x28   :  { %p3617_p5 = pnand %p3616_p4, %p3610_p1 }
  0x2a   :  { %3620 = shalt.err (!%p3617_p5)
}
  0x2b   :  { %76 = dma.hbm_to_vmem [thread:$0]  %s5174_s8, 2048, %s71_s28, [#allocation10], %s3651_s18, %s3651_s18, %s3652_s19  }
  0x2c   :  { %3641 = dma.done.wait [#allocation4], 256  }
  0x2d   :  { %3642 = vsyncadd [#allocation4], 4294967040 }
  0x2e   :  { %3643 = dma.done.wait [#allocation7], 2304  }
  0x2f   :  { %3644 = vsyncadd [#allocation7], 4294964992 }
  0x30   :  { %3645 = dma.done.wait [#allocation10], 2048  }
  0x31   :  { %3646 = vsyncadd [#allocation10], 4294965248  ;;  %v3655_v0 = vmov 1   ;;  %v3656_v1 = vmov 0   ;;  %v3778_v2 = vld [vmem:[%s5166_s0] sm:$0xff]  ;;  %v3657_v4 = vmov 0.0  }
  0x32   :  { %3421 = vset.pattern.permute.xlu1 %v3655_v0  ;;  %3420 = vset.pattern.permute.xlu0 %v3656_v1  ;;  %v3783_v3 = vld [vmem:[%s5170_s4] sm:$0x1]  ;;  %91 = vst [vmem:[#allocation2] sm:$0xff] %v3657_v4  ;;  %92 = vst [vmem:[#allocation2 + $0x8] sm:$0xff] %v3657_v4  ;;  %v3793_v5 = vld [vmem:[%s5166_s0 + $0x8] sm:$0xff]  ;;  %v3658_v6 = vmov 2  }
  0x33   :  { %112 = vperm.xlu1 %3421, %v3778_v2   ;;  %98 = vperm.xlu0 %3420, %v3778_v2   ;;  %3213 = vpush %v3783_v3  ;;  %v3659_v7 = vmov 3   ;;  %v3660_v8 = vmov 4   ;;  %v3661_v9 = vmov 5   ;;  %v3662_v10 = vmov 6   ;;  %s3683_s0 = smov 127   ;;  %s3689_s17 = smov 126  }
  0x34   :  { %v3663_v11 = vmov 8   ;;  %v3664_v12 = vmov 9   ;;  %v3665_v13 = vmov 7   ;;  %v3666_v14 = vmov 11   ;;  %v546_v1 = vld [vmem:[#allocation3 + $0x8] sm:$0x3f] }
  0x35   :  { %v3667_v15 = vmov 12   ;;  %v3668_v16 = vmov 14   ;;  %v3669_v17 = vmov 15   ;;  %v3670_v18 = vmov 10   ;;  %s3690_s24 = smov 125   ;;  %s3691_s26 = smov 124  }
  0x36   :  { %v3671_v19 = vmov 17   ;;  %v3672_v20 = vmov 18   ;;  %v3673_v21 = vmov 20   ;;  %v3674_v22 = vmov 21   ;;  %s3692_s27 = smov 32  }
  0x37   :  { %115 = vperm.xlu1 %3421, %v3793_v5   ;;  %101 = vperm.xlu0 %3420, %v3793_v5   ;;  %v3675_v23 = vmov 13   ;;  %v3676_v24 = vmov 23   ;;  %v3677_v25 = vmov 24   ;;  %v3678_v26 = vmov 26  }
  0x38   :  { %v3679_v27 = vmov 27   ;;  %v3680_v28 = vmov 16   ;;  %v3681_v29 = vmov 29   ;;  %v3682_v30 = vmov 30  }
  0x39   :  { %v3684_v31 = vmov 31   ;;  %v3685_v32 = vmov 19   ;;  %v3686_v37 = vmov 22   ;;  %v3687_v46 = vmov 25  }
  0x3a   :  { %v3688_v55 = vmov 28   ;;  %vm554_vm0 = vcmask 1045504  }
  0x3b   :  { %3423 = vset.pattern.permute.xlu1 %v3658_v6  ;;  %3422 = vset.pattern.permute.xlu0 %v3658_v6  ;;  %v634_v6 = vld [vmem:[#allocation6 + $0x8] sm:$0x3f] }
  0x3c   :  { %129 = vperm.xlu1 %3423, %v3793_v5   ;;  %126 = vperm.xlu0 %3422, %v3778_v2  }
  0x3d   :  { %3129 = vmatprep.subr.msk.mxu0 %vm554_vm0, %v546_v1  ;;  %3136 = vmatprep.subr.msk.mxu1 %vm554_vm0, %v634_v6 }
  0x3e   :  { %3130 = vmatpush3.msk.msra.mxu0 %vm554_vm0, %v546_v1  ;;  %3137 = vmatpush3.msk.msra.mxu1 %vm554_vm0, %v634_v6 }
  0x40   :  { %3424 = vset.pattern.permute.xlu1 %v3659_v7  ;;  %3425 = vset.pattern.permute.xlu0 %v3659_v7  ;;  %v545_v7 = vld [vmem:[#allocation3] sm:$0xff] }
  0x41   :  { %140 = vperm.xlu1 %3424, %v3778_v2   ;;  %143 = vperm.xlu0 %3425, %v3793_v5  }
  0x42   :  { %3131 = vmatprep.subr.mxu0 %v545_v7 }
  0x43   :  { %3132 = vmatpush3.msra.mxu0 %v545_v7 }
  0x45   :  { %3426 = vset.pattern.permute.xlu1 %v3660_v8  ;;  %3427 = vset.pattern.permute.xlu0 %v3661_v9  ;;  %v633_v8 = vld [vmem:[#allocation6] sm:$0xff] }
  0x46   :  { %154 = vperm.xlu1 %3426, %v3778_v2   ;;  %168 = vperm.xlu0 %3427, %v3778_v2  }
  0x47   :  { %3138 = vmatprep.subr.mxu1 %v633_v8 }
  0x48   :  { %3139 = vmatpush3.msra.mxu1 %v633_v8 }
  0x4a   :  { %157 = vperm.xlu1 %3426, %v3793_v5   ;;  %3430 = vset.pattern.permute.xlu0 %v3662_v10 }
  0x4b   :  { %185 = vperm.xlu0 %3430, %v3793_v5  }
  0x4e   :  { %3428 = vset.pattern.permute.xlu1 %v3661_v9 }
  0x4f   :  { %171 = vperm.xlu1 %3428, %v3793_v5   ;;  %3432 = vset.pattern.permute.xlu0 %v3663_v11 }
  0x50   :  { %210 = vperm.xlu0 %3432, %v3778_v2  }
  0x53   :  { %3429 = vset.pattern.permute.xlu1 %v3662_v10 }
  0x54   :  { %182 = vperm.xlu1 %3429, %v3778_v2   ;;  %3435 = vset.pattern.permute.xlu0 %v3664_v12 }
  0x55   :  { %227 = vperm.xlu0 %3435, %v3793_v5  }
  0x58   :  { %3431 = vset.pattern.permute.xlu1 %v3665_v13 }
  0x59   :  { %196 = vperm.xlu1 %3431, %v3778_v2   ;;  %3437 = vset.pattern.permute.xlu0 %v3666_v14 }
  0x5a   :  { %252 = vperm.xlu0 %3437, %v3778_v2  }
  0x5d   :  { %199 = vperm.xlu1 %3431, %v3793_v5  }
  0x5e   :  { %3440 = vset.pattern.permute.xlu0 %v3667_v15 }
  0x5f   :  { %269 = vperm.xlu0 %3440, %v3793_v5  }
  0x61   :  { %3433 = vset.pattern.permute.xlu1 %v3663_v11 }
  0x62   :  { %213 = vperm.xlu1 %3433, %v3793_v5  }
  0x63   :  { %3442 = vset.pattern.permute.xlu0 %v3668_v16 }
  0x64   :  { %294 = vperm.xlu0 %3442, %v3778_v2   ;;  %s4099_s22 = spop %3213 }
  0x66   :  { %3434 = vset.pattern.permute.xlu1 %v3664_v12 }
  0x67   :  { %224 = vperm.xlu1 %3434, %v3778_v2  }
  0x68   :  { %3445 = vset.pattern.permute.xlu0 %v3669_v17 }
  0x69   :  { %311 = vperm.xlu0 %3445, %v3793_v5  }
  0x6b   :  { %3436 = vset.pattern.permute.xlu1 %v3670_v18 }
  0x6c   :  { %238 = vperm.xlu1 %3436, %v3778_v2  }
  0x6d   :  { %3447 = vset.pattern.permute.xlu0 %v3671_v19 }
  0x6e   :  { %336 = vperm.xlu0 %3447, %v3778_v2  }
  0x70   :  { %241 = vperm.xlu1 %3436, %v3793_v5  }
  0x72   :  { %3450 = vset.pattern.permute.xlu0 %v3672_v20 }
  0x73   :  { %353 = vperm.xlu0 %3450, %v3793_v5  }
  0x74   :  { %3438 = vset.pattern.permute.xlu1 %v3666_v14 }
  0x75   :  { %255 = vperm.xlu1 %3438, %v3793_v5  }
  0x77   :  { %3452 = vset.pattern.permute.xlu0 %v3673_v21 }
  0x78   :  { %378 = vperm.xlu0 %3452, %v3778_v2  }
  0x79   :  { %3439 = vset.pattern.permute.xlu1 %v3667_v15 }
  0x7a   :  { %266 = vperm.xlu1 %3439, %v3778_v2  }
  0x7c   :  { %3455 = vset.pattern.permute.xlu0 %v3674_v22 }
  0x7d   :  { %395 = vperm.xlu0 %3455, %v3793_v5  }
  0x7e   :  { %3441 = vset.pattern.permute.xlu1 %v3675_v23 }
  0x7f   :  { %280 = vperm.xlu1 %3441, %v3778_v2  }
  0x81   :  { %3457 = vset.pattern.permute.xlu0 %v3676_v24 }
  0x82   :  { %420 = vperm.xlu0 %3457, %v3778_v2  }
  0x83   :  { %283 = vperm.xlu1 %3441, %v3793_v5  }
  0x86   :  { %3460 = vset.pattern.permute.xlu0 %v3677_v25 }
  0x87   :  { %3443 = vset.pattern.permute.xlu1 %v3668_v16  ;;  %437 = vperm.xlu0 %3460, %v3793_v5  }
  0x88   :  { %297 = vperm.xlu1 %3443, %v3793_v5  }
  0x8b   :  { %3462 = vset.pattern.permute.xlu0 %v3678_v26 }
  0x8c   :  { %3444 = vset.pattern.permute.xlu1 %v3669_v17  ;;  %462 = vperm.xlu0 %3462, %v3778_v2  }
  0x8d   :  { %308 = vperm.xlu1 %3444, %v3778_v2  }
  0x90   :  { %3465 = vset.pattern.permute.xlu0 %v3679_v27 }
  0x91   :  { %3446 = vset.pattern.permute.xlu1 %v3680_v28  ;;  %479 = vperm.xlu0 %3465, %v3793_v5  }
  0x92   :  { %322 = vperm.xlu1 %3446, %v3778_v2  }
  0x95   :  { %3467 = vset.pattern.permute.xlu0 %v3681_v29 }
  0x96   :  { %325 = vperm.xlu1 %3446, %v3793_v5   ;;  %504 = vperm.xlu0 %3467, %v3778_v2  }
  0x9a   :  { %3448 = vset.pattern.permute.xlu1 %v3671_v19  ;;  %3470 = vset.pattern.permute.xlu0 %v3682_v30 }
  0x9b   :  { %339 = vperm.xlu1 %3448, %v3793_v5   ;;  %521 = vperm.xlu0 %3470, %v3793_v5  }
  0x9f   :  { %3449 = vset.pattern.permute.xlu1 %v3672_v20  ;;  %761 = vrot.lane.b32.xlu0 %v3783_v3, %s3683_s0 }
  0xa0   :  { %350 = vperm.xlu1 %3449, %v3778_v2   ;;  %3472 = vset.pattern.permute.xlu0 %v3684_v31 }
  0xa4   :  { %3451 = vset.pattern.permute.xlu1 %v3685_v32 }
  0xa5   :  { %364 = vperm.xlu1 %3451, %v3778_v2  }
  0xa9   :  { %367 = vperm.xlu1 %3451, %v3793_v5  }
  0xad   :  { %3453 = vset.pattern.permute.xlu1 %v3673_v21  ;;  %v95_v21 = vlaneseq }
  0xae   :  { %381 = vperm.xlu1 %3453, %v3793_v5   ;;  %v3846_v33 = vpop.permute.xlu1 %112  ;;  %v3848_v34 = vpop.permute.xlu0 %98 }
  0xb2   :  { %3454 = vset.pattern.permute.xlu1 %v3674_v22  ;;  %v3850_v35 = vpop.permute.xlu1 %115  ;;  %v3853_v36 = vpop.permute.xlu0 %101 }
  0xb3   :  { %392 = vperm.xlu1 %3454, %v3778_v2  }
  0xb7   :  { %3456 = vset.pattern.permute.xlu1 %v3686_v37  ;;  %v3855_v38 = vpop.permute.xlu1 %129  ;;  %v3858_v39 = vpop.permute.xlu0 %126 }
  0xb8   :  { %406 = vperm.xlu1 %3456, %v3778_v2  }
  0xbc   :  { %409 = vperm.xlu1 %3456, %v3793_v5   ;;  %v3861_v40 = vpop.permute.xlu1 %140  ;;  %v3863_v41 = vpop.permute.xlu0 %143 }
  0xc0   :  { %3458 = vset.pattern.permute.xlu1 %v3676_v24  ;;  %v3955_v24 = vand.u32 127, %v95_v21 }
  0xc1   :  { %423 = vperm.xlu1 %3458, %v3793_v5   ;;  %v3866_v42 = vpop.permute.xlu1 %154  ;;  %v3868_v43 = vpop.permute.xlu0 %168 }
  0xc2   :  { %vm117_vm1 = vcmp.eq.s32.totalorder %v3846_v33, %v3955_v24  ;;  %vm103_vm2 = vcmp.eq.s32.totalorder %v3848_v34, %v3955_v24  ;;  %vm131_vm3 = vcmp.eq.s32.totalorder %v3858_v39, %v3955_v24  ;;  %vm118_vm4 = vcmp.eq.s32.totalorder %v3850_v35, %v3955_v24 }
  0xc3   :  { %v3008_v28 = vsel %vm103_vm2, 1.0, %v3657_v4  ;;  %vm104_vm5 = vcmp.eq.s32.totalorder %v3853_v36, %v3955_v24  ;;  %vm145_vm6 = vcmp.eq.s32.totalorder %v3861_v40, %v3955_v24  ;;  %vm132_vm7 = vcmp.eq.s32.totalorder %v3855_v38, %v3955_v24 }
  0xc4   :  { %vm159_vm8 = vcmp.eq.s32.totalorder %v3866_v42, %v3955_v24  ;;  %v3011_v32 = vsel %vm118_vm4, 1.0, %v3657_v4  ;;  %v3009_v33 = vsel %vm104_vm5, 1.0, %v3657_v4  ;;  %v3014_v34 = vsel %vm145_vm6, 1.0, %v3657_v4 }
  0xc5   :  { %3459 = vset.pattern.permute.xlu1 %v3677_v25  ;;  %v3870_v44 = vpop.permute.xlu1 %157  ;;  %vm146_vm9 = vcmp.eq.s32.totalorder %v3863_v41, %v3955_v24  ;;  %v3013_v36 = vsel %vm132_vm7, 1.0, %v3657_v4  ;;  %v3016_v37 = vsel %vm159_vm8, 1.0, %v3657_v4  ;;  %v124_v38 = vadd.f32 %v3011_v32, %v3009_v33 }
  0xc6   :  { %434 = vperm.xlu1 %3459, %v3778_v2   ;;  %v3873_v45 = vpop.permute.xlu0 %185  ;;  %vm173_vm10 = vcmp.eq.s32.totalorder %v3868_v43, %v3955_v24  ;;  %vm160_vm11 = vcmp.eq.s32.totalorder %v3870_v44, %v3955_v24  ;;  %v3015_v42 = vsel %vm146_vm9, 1.0, %v3657_v4 }
  0xc7   :  { %v3018_v41 = vsel %vm173_vm10, 1.0, %v3657_v4  ;;  %v3017_v1 = vsel %vm160_vm11, 1.0, %v3657_v4  ;;  %vm188_vm15 = vcmp.eq.s32.totalorder %v3873_v45, %v3955_v24 }
  0xca   :  { %3461 = vset.pattern.permute.xlu1 %v3687_v46  ;;  %v3875_v47 = vpop.permute.xlu1 %171  ;;  %v138_v46 = vadd.f32 %v3013_v36, %v124_v38 }
  0xcb   :  { %448 = vperm.xlu1 %3461, %v3778_v2   ;;  %v3878_v48 = vpop.permute.xlu0 %210  ;;  %vm174_vm12 = vcmp.eq.s32.totalorder %v3875_v47, %v3955_v24 }
  0xcc   :  { %v152_v6 = vadd.f32 %v3015_v42, %v138_v46  ;;  %v3019_v44 = vsel %vm174_vm12, 1.0, %v3657_v4  ;;  %vm215_vm0 = vcmp.eq.s32.totalorder %v3878_v48, %v3955_v24 }
  0xcd   :  { %v3024_v45 = vsel %vm215_vm0, 1.0, %v3657_v4 }
  0xce   :  { %v166_v21 = vadd.f32 %v3017_v1, %v152_v6 }
  0xcf   :  { %451 = vperm.xlu1 %3461, %v3793_v5   ;;  %v3881_v49 = vpop.permute.xlu1 %182 }
  0xd0   :  { %v3883_v50 = vpop.permute.xlu0 %227  ;;  %vm187_vm13 = vcmp.eq.s32.totalorder %v3881_v49, %v3955_v24  ;;  %v180_v49 = vadd.f32 %v3019_v44, %v166_v21 }
  0xd1   :  { %v3020_v7 = vsel %vm187_vm13, 1.0, %v3657_v4  ;;  %vm230_vm5 = vcmp.eq.s32.totalorder %v3883_v50, %v3955_v24 }
  0xd3   :  { %3463 = vset.pattern.permute.xlu1 %v3678_v26 }
  0xd4   :  { %465 = vperm.xlu1 %3463, %v3793_v5   ;;  %v3886_v51 = vpop.permute.xlu1 %196 }
  0xd5   :  { %v3888_v52 = vpop.permute.xlu0 %252  ;;  %vm201_vm14 = vcmp.eq.s32.totalorder %v3886_v51, %v3955_v24  ;;  %v3021_v51 = vsel %vm188_vm15, 1.0, %v3657_v4 }
  0xd6   :  { %v3022_v47 = vsel %vm201_vm14, 1.0, %v3657_v4  ;;  %vm257_vm6 = vcmp.eq.s32.totalorder %v3888_v52, %v3955_v24 }
  0xd8   :  { %3464 = vset.pattern.permute.xlu1 %v3679_v27  ;;  %v3890_v53 = vpop.permute.xlu1 %199  ;;  %v3010_v27 = vsel %vm117_vm1, 1.0, %v3657_v4 }
  0xd9   :  { %476 = vperm.xlu1 %3464, %v3778_v2   ;;  %vm202_vm1 = vcmp.eq.s32.totalorder %v3890_v53, %v3955_v24 }
  0xda   :  { %v3893_v54 = vpop.permute.xlu0 %269 }
  0xdb   :  { %vm272_vm11 = vcmp.eq.s32.totalorder %v3893_v54, %v3955_v24 }
  0xdd   :  { %3466 = vset.pattern.permute.xlu1 %v3688_v55  ;;  %v3895_v56 = vpop.permute.xlu1 %213 }
  0xde   :  { %490 = vperm.xlu1 %3466, %v3778_v2   ;;  %vm216_vm2 = vcmp.eq.s32.totalorder %v3895_v56, %v3955_v24 }
  0xdf   :  { %v3898_v57 = vpop.permute.xlu0 %294  ;;  %v3025_v48 = vsel %vm216_vm2, 1.0, %v3657_v4 }
  0xe0   :  { %vm299_vm12 = vcmp.eq.s32.totalorder %v3898_v57, %v3955_v24 }
  0xe1   :  { %v3036_v54 = vsel %vm299_vm12, 1.0, %v3657_v4 }
  0xe2   :  { %493 = vperm.xlu1 %3466, %v3793_v5   ;;  %v3901_v58 = vpop.permute.xlu1 %224 }
  0xe4   :  { %v3903_v59 = vpop.permute.xlu0 %311 }
  0xe6   :  { %3468 = vset.pattern.permute.xlu1 %v3681_v29  ;;  %v3012_v29 = vsel %vm131_vm3, 1.0, %v3657_v4  ;;  %vm229_vm3 = vcmp.eq.s32.totalorder %v3901_v58, %v3955_v24 }
  0xe7   :  { %507 = vperm.xlu1 %3468, %v3793_v5   ;;  %v3907_v60 = vpop.permute.xlu1 %238  ;;  %v3026_v53 = vsel %vm229_vm3, 1.0, %v3657_v4 }
  0xe8   :  { %vm243_vm4 = vcmp.eq.s32.totalorder %v3907_v60, %v3955_v24  ;;  %v3027_v60 = vsel %vm230_vm5, 1.0, %v3657_v4 }
  0xe9   :  { %v3909_v61 = vpop.permute.xlu0 %336  ;;  %v3028_v58 = vsel %vm243_vm4, 1.0, %v3657_v4 }
  0xea   :  { %vm341_vm2 = vcmp.eq.s32.totalorder %v3909_v61, %v3955_v24 }
  0xeb   :  { %3469 = vset.pattern.permute.xlu1 %v3682_v30  ;;  %v3912_v62 = vpop.permute.xlu1 %241  ;;  %v3042_v61 = vsel %vm341_vm2, 1.0, %v3657_v4 }
  0xec   :  { %518 = vperm.xlu1 %3469, %v3778_v2   ;;  %vm244_vm7 = vcmp.eq.s32.totalorder %v3912_v62, %v3955_v24 }
  0xed   :  { %v3029_v38 = vsel %vm244_vm7, 1.0, %v3657_v4 }
  0xee   :  { %v3915_v63 = vpop.permute.xlu0 %353 }
  0xef   :  { %vm356_vm7 = vcmp.eq.s32.totalorder %v3915_v63, %v3955_v24 }
  0xf0   :  { %3471 = vset.pattern.permute.xlu1 %v3684_v31  ;;  %v3917_v0 = vpop.permute.xlu1 %255  ;;  %v123_v31 = vadd.f32 %v3010_v27, %v3008_v28 }
  0xf1   :  { %532 = vperm.xlu1 %3471, %v3778_v2   ;;  %vm258_vm8 = vcmp.eq.s32.totalorder %v3917_v0, %v3955_v24 }
  0xf2   :  { %v137_v35 = vadd.f32 %v3012_v29, %v123_v31  ;;  %v3023_v29 = vsel %vm202_vm1, 1.0, %v3657_v4  ;;  %v194_v31 = vadd.f32 %v3021_v51, %v180_v49  ;;  %v3031_v52 = vsel %vm258_vm8, 1.0, %v3657_v4 }
  0xf3   :  { %v3920_v9 = vpop.permute.xlu0 %378  ;;  %vm314_vm1 = vcmp.eq.s32.totalorder %v3903_v59, %v3955_v24  ;;  %v3082_v59 = vld [vmem:[%s5167_s1] sm:$0xff]  }
  0xf4   :  { %v151_v40 = vadd.f32 %v3014_v34, %v137_v35  ;;  %v208_v33 = vadd.f32 %v3023_v29, %v194_v31  ;;  %v4095_v29 = vunpack.c.l.bf16 %v3082_v59  ;;  %vm383_vm8 = vcmp.eq.s32.totalorder %v3920_v9, %v3955_v24 }
  0xf5   :  { %535 = vperm.xlu1 %3471, %v3793_v5   ;;  %v3923_v10 = vpop.permute.xlu1 %266 }
  0xf6   :  { %v165_v55 = vadd.f32 %v3016_v37, %v151_v40  ;;  %v222_v34 = vadd.f32 %v3025_v48, %v208_v33  ;;  %vm271_vm9 = vcmp.eq.s32.totalorder %v3923_v10, %v3955_v24  ;;  %v3030_v37 = vsel %vm257_vm6, 1.0, %v3657_v4 }
  0xf7   :  { %v3032_v62 = vsel %vm271_vm9, 1.0, %v3657_v4 }
  0xf8   :  { %v3925_v11 = vpop.permute.xlu0 %395  ;;  %v179_v8 = vadd.f32 %v3018_v41, %v165_v55  ;;  %v236_v40 = vadd.f32 %v3027_v60, %v222_v34  ;;  %v3048_v60 = vsel %vm383_vm8, 1.0, %v3657_v4 }
  0xf9   :  { %778 = vrot.lane.b32.xlu1 %v3783_v3, %s3689_s17 }
  0xfa   :  { %v3929_v2 = vpop.permute.xlu1 %280  ;;  %v250_v0 = vadd.f32 %v3029_v38, %v236_v40 }
  0xfb   :  { %vm285_vm10 = vcmp.eq.s32.totalorder %v3929_v2, %v3955_v24  ;;  %v3033_v2 = vsel %vm272_vm11, 1.0, %v3657_v4 }
  0xfc   :  { %v3034_v10 = vsel %vm285_vm10, 1.0, %v3657_v4  ;;  %v264_v55 = vadd.f32 %v3031_v52, %v250_v0 }
  0xfd   :  { %v3931_v12 = vpop.permute.xlu0 %420 }
  0xfe   :  { %v3933_v13 = vpop.permute.xlu1 %283  ;;  %v278_v44 = vadd.f32 %v3033_v2, %v264_v55 }
  0xff   :  { %vm286_vm13 = vcmp.eq.s32.totalorder %v3933_v13, %v3955_v24 }
 0x100   :  { %v3035_v6 = vsel %vm286_vm13, 1.0, %v3657_v4  ;;  %vm398_vm13 = vcmp.eq.s32.totalorder %v3925_v11, %v3955_v24 }
 0x102   :  { %v3935_v14 = vpop.permute.xlu0 %437 }
 0x103   :  { %v3937_v15 = vpop.permute.xlu1 %297 }
 0x104   :  { %vm300_vm14 = vcmp.eq.s32.totalorder %v3937_v15, %v3955_v24  ;;  %v292_v15 = vadd.f32 %v3035_v6, %v278_v44 }
 0x105   :  { %v3037_v13 = vsel %vm300_vm14, 1.0, %v3657_v4  ;;  %vm425_vm14 = vcmp.eq.s32.totalorder %v3931_v12, %v3955_v24 }
 0x106   :  { %v306_v21 = vadd.f32 %v3037_v13, %v292_v15  ;;  %v3054_v11 = vsel %vm425_vm14, 1.0, %v3657_v4 }
 0x107   :  { %v3939_v5 = vpop.permute.xlu0 %462 }
 0x108   :  { %v3941_v16 = vpop.permute.xlu1 %308 }
 0x109   :  { %vm313_vm15 = vcmp.eq.s32.totalorder %v3941_v16, %v3955_v24 }
 0x10c   :  { %v3943_v17 = vpop.permute.xlu0 %479 }
 0x10d   :  { %v3945_v18 = vpop.permute.xlu1 %322 }
 0x10e   :  { %vm327_vm0 = vcmp.eq.s32.totalorder %v3945_v18, %v3955_v24  ;;  %v3039_v18 = vsel %vm314_vm1, 1.0, %v3657_v4 }
 0x10f   :  { %v3040_v16 = vsel %vm327_vm0, 1.0, %v3657_v4 }
 0x111   :  { %v3947_v19 = vpop.permute.xlu1 %325  ;;  %v3949_v20 = vpop.permute.xlu0 %504 }
 0x112   :  { %vm328_vm3 = vcmp.eq.s32.totalorder %v3947_v19, %v3955_v24  ;;  %v320_v19 = vadd.f32 %v3039_v18, %v306_v21 }
 0x113   :  { %v3041_v51 = vsel %vm328_vm3, 1.0, %v3657_v4  ;;  %vm440_vm3 = vcmp.eq.s32.totalorder %v3935_v14, %v3955_v24 }
 0x114   :  { %v334_v31 = vadd.f32 %v3041_v51, %v320_v19 }
 0x116   :  { %v3951_v22 = vpop.permute.xlu1 %339  ;;  %v3953_v23 = vpop.permute.xlu0 %521 }
 0x117   :  { %vm342_vm4 = vcmp.eq.s32.totalorder %v3951_v22, %v3955_v24  ;;  %vm524_vm14 = vcmp.eq.s32.totalorder %v3953_v23, %v3955_v24 }
 0x11a   :  { %v762_v25 = vpop.permute.xlu0 %761 }
 0x11b   :  { %v3961_v26 = vpop.permute.xlu1 %350  ;;  %3215 = vpush %v762_v25  ;;  %v193_v25 = vadd.f32 %v3020_v7, %v179_v8  ;;  %v3038_v7 = vsel %vm313_vm15, 1.0, %v3657_v4 }
 0x11c   :  { %vm355_vm5 = vcmp.eq.s32.totalorder %v3961_v26, %v3955_v24  ;;  %v4097_v26 = vunpack.c.h.bf16 %v3082_v59 }
 0x11d   :  { %v207_v28 = vadd.f32 %v3022_v47, %v193_v25 }
 0x11f   :  { %v221_v32 = vadd.f32 %v3024_v45, %v207_v28  ;;  %v3043_v28 = vsel %vm342_vm4, 1.0, %v3657_v4  ;;  %v3044_v45 = vsel %vm355_vm5, 1.0, %v3657_v4  ;;  %vm467_vm4 = vcmp.eq.s32.totalorder %v3939_v5, %v3955_v24 }
 0x120   :  { %v3974_v30 = vpop.permute.xlu1 %364  ;;  %v3060_v14 = vsel %vm467_vm4, 1.0, %v3657_v4 }
 0x121   :  { %v235_v35 = vadd.f32 %v3026_v53, %v221_v32  ;;  %vm369_vm6 = vcmp.eq.s32.totalorder %v3974_v30, %v3955_v24  ;;  %v348_v53 = vadd.f32 %v3043_v28, %v334_v31 }
 0x122   :  { %v3046_v30 = vsel %vm369_vm6, 1.0, %v3657_v4 }
 0x123   :  { %v249_v36 = vadd.f32 %v3028_v58, %v235_v35  ;;  %v3045_v58 = vsel %vm356_vm7, 1.0, %v3657_v4 }
 0x124   :  { %v3987_v39 = vpop.permute.xlu1 %367 }
 0x125   :  { %v263_v42 = vadd.f32 %v3030_v37, %v249_v36  ;;  %vm370_vm9 = vcmp.eq.s32.totalorder %v3987_v39, %v3955_v24  ;;  %v362_v39 = vadd.f32 %v3045_v58, %v348_v53 }
 0x126   :  { %v3047_v36 = vsel %vm370_vm9, 1.0, %v3657_v4  ;;  %vm482_vm9 = vcmp.eq.s32.totalorder %v3943_v17, %v3955_v24 }
 0x127   :  { %v277_v41 = vadd.f32 %v3032_v62, %v263_v42  ;;  %v3063_v59 = vsel %vm482_vm9, 1.0, %v3657_v4  ;;  %vm870_vm9 = vcmask 400768  }
 0x129   :  { %v4002_v43 = vpop.permute.xlu1 %381  ;;  %v291_v1 = vadd.f32 %v3034_v10, %v277_v41 }
 0x12a   :  { %vm384_vm10 = vcmp.eq.s32.totalorder %v4002_v43, %v3955_v24 }
 0x12b   :  { %v305_v8 = vadd.f32 %v3036_v54, %v291_v1  ;;  %v3049_v37 = vsel %vm384_vm10, 1.0, %v3657_v4  ;;  %vm509_vm10 = vcmp.eq.s32.totalorder %v3949_v20, %v3955_v24 }
 0x12c   :  { %v3066_v19 = vsel %vm509_vm10, 1.0, %v3657_v4 }
 0x12d   :  { %v319_v47 = vadd.f32 %v3038_v7, %v305_v8 }
 0x12e   :  { %v4014_v27 = vpop.permute.xlu1 %392 }
 0x12f   :  { %v333_v25 = vadd.f32 %v3040_v16, %v319_v47  ;;  %vm397_vm11 = vcmp.eq.s32.totalorder %v4014_v27, %v3955_v24  ;;  %v376_v27 = vadd.f32 %v3047_v36, %v362_v39 }
 0x130   :  { %v3050_v43 = vsel %vm397_vm11, 1.0, %v3657_v4 }
 0x131   :  { %v347_v48 = vadd.f32 %v3042_v61, %v333_v25  ;;  %v390_v62 = vadd.f32 %v3049_v37, %v376_v27 }
 0x133   :  { %v4028_v56 = vpop.permute.xlu1 %406  ;;  %v361_v32 = vadd.f32 %v3044_v45, %v347_v48 }
 0x134   :  { %vm411_vm12 = vcmp.eq.s32.totalorder %v4028_v56, %v3955_v24  ;;  %v3051_v56 = vsel %vm398_vm13, 1.0, %v3657_v4 }
 0x135   :  { %v375_v35 = vadd.f32 %v3046_v30, %v361_v32  ;;  %v3052_v40 = vsel %vm411_vm12, 1.0, %v3657_v4  ;;  %v404_v55 = vadd.f32 %v3051_v56, %v390_v62  ;;  %v3069_v32 = vsel %vm524_vm14, 1.0, %v3657_v4 }
 0x137   :  { %v4040_v50 = vpop.permute.xlu1 %409  ;;  %v389_v38 = vadd.f32 %v3048_v60, %v375_v35 }
 0x138   :  { %vm412_vm15 = vcmp.eq.s32.totalorder %v4040_v50, %v3955_v24 }
 0x139   :  { %v403_v0 = vadd.f32 %v3050_v43, %v389_v38  ;;  %v3053_v10 = vsel %vm412_vm15, 1.0, %v3657_v4 }
 0x13b   :  { %v417_v42 = vadd.f32 %v3052_v40, %v403_v0 }
 0x13c   :  { %v4051_v46 = vpop.permute.xlu1 %423 }
 0x13d   :  { %vm426_vm0 = vcmp.eq.s32.totalorder %v4051_v46, %v3955_v24  ;;  %v418_v46 = vadd.f32 %v3053_v10, %v404_v55  ;;  %v431_v2 = vadd.f32 %v3054_v11, %v417_v42 }
 0x13e   :  { %v3055_v50 = vsel %vm426_vm0, 1.0, %v3657_v4  ;;  %vm547_vm0 = vcmask 113664  }
 0x13f   :  { %v432_v54 = vadd.f32 %v3055_v50, %v418_v46  ;;  %v873_v46 = vld [vmem:[%s5170_s4 + $0x1] sm:$0x1] }
 0x141   :  { %v4066_v57 = vpop.permute.xlu1 %434 }
 0x142   :  { %vm439_vm1 = vcmp.eq.s32.totalorder %v4066_v57, %v3955_v24  ;;  %v3057_v57 = vsel %vm440_vm3, 1.0, %v3657_v4 }
 0x143   :  { %v3056_v41 = vsel %vm439_vm1, 1.0, %v3657_v4  ;;  %v446_v15 = vadd.f32 %v3057_v57, %v432_v54 }
 0x144   :  { %v445_v6 = vadd.f32 %v3056_v41, %v431_v2 }
 0x146   :  { %v4078_v49 = vpop.permute.xlu1 %448 }
 0x147   :  { %vm453_vm2 = vcmp.eq.s32.totalorder %v4078_v49, %v3955_v24 }
 0x148   :  { %v3058_v1 = vsel %vm453_vm2, 1.0, %v3657_v4  ;;  %vm723_vm2 = vcmask 130048  }
 0x149   :  { %v459_v13 = vadd.f32 %v3058_v1, %v445_v6 }
 0x14a   :  { %v4093_v22 = vpop.permute.xlu1 %451 }
 0x14b   :  { %vm454_vm5 = vcmp.eq.s32.totalorder %v4093_v22, %v3955_v24  ;;  %v473_v47 = vadd.f32 %v3060_v14, %v459_v13 }
 0x14c   :  { %s3216_s1 = spop %3215  ;;  %v3059_v7 = vsel %vm454_vm5, 1.0, %v3657_v4  ;;  %vm748_vm5 = vcmask 392448  }
 0x14d   :  { %v765_v33 = vstv %s3216_s1  ;;  %v460_v21 = vadd.f32 %v3059_v7, %v446_v15 }
 0x14e   :  { %v766_v34 = vmul.f32 %v4095_v29, %v765_v33  ;;  %v767_v63 = vmul.f32 %v4097_v26, %v765_v33 }
 0x14f   :  { %v466_v9 = vpop.permute.xlu1 %465 }
 0x150   :  { %772 = vrot.lane.b32.xlu0 %v767_v63, %s3683_s0  ;;  %770 = vrot.lane.b32.xlu1 %v766_v34, %s3683_s0  ;;  %vm468_vm6 = vcmp.eq.s32.totalorder %v466_v9, %v3955_v24 }
 0x151   :  { %v3061_v5 = vsel %vm468_vm6, 1.0, %v3657_v4 }
 0x152   :  { %v474_v49 = vadd.f32 %v3061_v5, %v460_v21 }
 0x154   :  { %v477_v52 = vpop.permute.xlu1 %476  ;;  %v488_v28 = vadd.f32 %v3063_v59, %v474_v49 }
 0x155   :  { %vm481_vm7 = vcmp.eq.s32.totalorder %v477_v52, %v3955_v24 }
 0x156   :  { %v3062_v8 = vsel %vm481_vm7, 1.0, %v3657_v4  ;;  %vm853_vm7 = vcmask 138368  }
 0x157   :  { %v487_v25 = vadd.f32 %v3062_v8, %v473_v47 }
 0x159   :  { %v491_v12 = vpop.permute.xlu1 %490 }
 0x15a   :  { %vm495_vm8 = vcmp.eq.s32.totalorder %v491_v12, %v3955_v24 }
 0x15b   :  { %v3064_v18 = vsel %vm495_vm8, 1.0, %v3657_v4 }
 0x15c   :  { %v501_v61 = vadd.f32 %v3064_v18, %v487_v25 }
 0x15d   :  { %v494_v44 = vpop.permute.xlu1 %493 }
 0x15e   :  { %vm496_vm11 = vcmp.eq.s32.totalorder %v494_v44, %v3955_v24  ;;  %v515_v31 = vadd.f32 %v3066_v19, %v501_v61 }
 0x15f   :  { %v3065_v17 = vsel %vm496_vm11, 1.0, %v3657_v4  ;;  %vm971_vm11 = vcmask 146568  }
 0x160   :  { %v502_v22 = vadd.f32 %v3065_v17, %v488_v28 }
 0x162   :  { %v508_v16 = vpop.permute.xlu1 %507 }
 0x163   :  { %vm510_vm12 = vcmp.eq.s32.totalorder %v508_v16, %v3955_v24 }
 0x164   :  { %v3067_v45 = vsel %vm510_vm12, 1.0, %v3657_v4  ;;  %vm988_vm12 = vcmask 408968  }
 0x165   :  { %v516_v30 = vadd.f32 %v3067_v45, %v502_v22  ;;  %v4239_v22 = vld [vmem:[%s5170_s4 + $0x2] sm:$0x1] }
 0x167   :  { %v519_v51 = vpop.permute.xlu1 %518  ;;  %v530_v63 = vadd.f32 %v3069_v32, %v516_v30 }
 0x168   :  { %vm523_vm13 = vcmp.eq.s32.totalorder %v519_v51, %v3955_v24 }
 0x169   :  { %v3068_v20 = vsel %vm523_vm13, 1.0, %v3657_v4 }
 0x16a   :  { %v529_v53 = vadd.f32 %v3068_v20, %v515_v31  ;;  %v757_v31 = vstv %s4099_s22 }
 0x16b   :  { %v759_v32 = vmul.f32 %v4097_v26, %v757_v31 }
 0x16c   :  { %v533_v48 = vpop.permute.xlu1 %532 }
 0x16d   :  { %vm537_vm15 = vcmp.eq.s32.totalorder %v533_v48, %v3955_v24  ;;  %v758_v48 = vmul.f32 %v4095_v29, %v757_v31 }
 0x16e   :  { %v3070_v33 = vsel %vm537_vm15, 1.0, %v3657_v4  ;;  %vm1089_vm15 = vcmask 154768  }
 0x16f   :  { %v543_v58 = vadd.f32 %v3070_v33, %v529_v53 }
 0x170   :  { %v536_v34 = vpop.permute.xlu1 %535 }
 0x171   :  { %vm538_vm1 = vcmp.eq.s32.totalorder %v536_v34, %v3955_v24  ;;  %3133 = vmatprep.mubr.msk.f32.mxu0 %vm547_vm0, %v543_v58  ;;  %3140 = vmatprep.mubr.msk.f32.mxu1 %vm547_vm0, %v543_v58 }
 0x172   :  { %v3071_v23 = vsel %vm538_vm1, 1.0, %v3657_v4 }
 0x173   :  { %v544_v35 = vadd.f32 %v3071_v23, %v530_v63 }
 0x174   :  { %v779_v9 = vpop.permute.xlu1 %778 }
 0x175   :  { %3134 = vmatmul.mubr.msk.f32.vlgmr.msra.gmra.mxu0 %vm547_vm0, %v544_v35  ;;  %3141 = vmatmul.mubr.msk.f32.vlgmr.msra.gmra.mxu1 %vm547_vm0, %v544_v35  ;;  %3217 = vpush %v779_v9  ;;  %vm1106_vm0 = vcmask 417168  }
 0x1a6   :  { %s3218_s23 = spop %3217 }
 0x1a7   :  { %v782_v60 = vstv %s3218_s23 }
 0x1a8   :  { %v783_v36 = vmul.f32 %v4095_v29, %v782_v60  ;;  %v784_v39 = vmul.f32 %v4097_v26, %v782_v60 }
 0x1aa   :  { %787 = vrot.lane.b32.xlu0 %v783_v36, %s3689_s17  ;;  %789 = vrot.lane.b32.xlu1 %v784_v39, %s3689_s17 }
 0x1ae   :  { %795 = vrot.lane.b32.xlu0 %v3783_v3, %s3690_s24 }
 0x1c2   :  { %v4182_v4 = vpop.permute.xlu0 %772  ;;  %v771_v55 = vpop.permute.xlu1 %770 }
 0x1c3   :  { %v776_v30 = vadd.f32 %v771_v55, %v758_v48  ;;  %v777_v58 = vadd.f32 %v4182_v4, %v759_v32 }
 0x21c   :  { %v4184_v24 = vpop.permute.xlu0 %787  ;;  %v4203_v12 = vpop.permute.xlu1 %789 }
 0x21d   :  { %v793_v53 = vadd.f32 %v4184_v24, %v776_v30  ;;  %v794_v63 = vadd.f32 %v4203_v12, %v777_v58 }
 0x220   :  { %v796_v37 = vpop.permute.xlu0 %795 }
 0x221   :  { %3219 = vpush %v796_v37 }
 0x235   :  { %v3135_v43 = vpop.f32.mrf.mxu0  ;;  %v3142_v27 = vpop.f32.mrf.mxu1 }
 0x236   :  { %v714_v38 = vmul.f32 0.0625, %v3135_v43  ;;  %v4188_v62 = vmul.f32 0.0625, %v3142_v27 }
 0x237   :  { %v624_v40 = vpop.f32.mrf.mxu0 }
 0x238   :  { %v4186_v52 = vmul.f32 %v714_v38, %v714_v38  ;;  %v4190_v0 = vmul.f32 0.0625, %v624_v40  ;;  %725 = vst.msk [vmem:[#allocation2 + $0x8] sm:$0xff] %vm723_vm2, %v714_v38 }
 0x23a   :  { %v720_v56 = vsub.f32 %v4188_v62, %v4186_v52  ;;  %724 = vst.msk [vmem:[#allocation2] sm:$0xff] %vm723_vm2, %v4190_v0 }
 0x252   :  { %s3220_s25 = spop %3219 }
 0x253   :  { %v799_v42 = vstv %s3220_s25 }
 0x254   :  { %v800_v11 = vmul.f32 %v4095_v29, %v799_v42  ;;  %v801_v10 = vmul.f32 %v4097_v26, %v799_v42 }
 0x256   :  { %806 = vrot.lane.b32.xlu0 %v801_v10, %s3690_s24  ;;  %804 = vrot.lane.b32.xlu1 %v800_v11, %s3690_s24 }
 0x25a   :  { %812 = vrot.lane.b32.xlu1 %v3783_v3, %s3691_s26 }
 0x2c8   :  { %v4205_v50 = vpop.permute.xlu1 %804  ;;  %v807_v16 = vpop.permute.xlu0 %806 }
 0x2c9   :  { %v810_v33 = vadd.f32 %v4205_v50, %v793_v53  ;;  %v811_v23 = vadd.f32 %v807_v16, %v794_v63 }
 0x2cc   :  { %v813_v41 = vpop.permute.xlu1 %812 }
 0x2cd   :  { %3221 = vpush %v813_v41 }
 0x2ce   :  { %3223 = vpush %v873_v46 }
 0x2fe   :  { %s3222_s3 = spop %3221 }
 0x2ff   :  { %v816_v2 = vstv %s3222_s3  ;;  %s4215_s29 = spop %3223 }
 0x300   :  { %v817_v1 = vmul.f32 %v4095_v29, %v816_v2  ;;  %v818_v54 = vmul.f32 %v4097_v26, %v816_v2  ;;  %v875_v36 = vstv %s4215_s29 }
 0x301   :  { %v876_v39 = vmul.f32 %v4095_v29, %v875_v36  ;;  %v877_v24 = vmul.f32 %v4097_v26, %v875_v36 }
 0x302   :  { %823 = vrot.lane.b32.xlu1 %v818_v54, %s3691_s26  ;;  %821 = vrot.lane.b32.xlu0 %v817_v1, %s3691_s26 }
 0x306   :  { %879 = vrot.lane.b32.xlu1 %v873_v46, %s3683_s0 }
 0x374   :  { %v824_v3 = vpop.permute.xlu1 %823  ;;  %v822_v21 = vpop.permute.xlu0 %821 }
 0x375   :  { %v827_v34 = vadd.f32 %v822_v21, %v810_v33  ;;  %v828_v9 = vadd.f32 %v824_v3, %v811_v23  ;;  %v4303_v23 = vld [vmem:[%s5170_s4 + $0x3] sm:$0x1] }
 0x377   :  { %v829_v35 = vsel %vm723_vm2, %v827_v34, 0.0  ;;  %v832_v60 = vsel %vm723_vm2, %v828_v9, 0.0  ;;  %v838_v1 = vmul.f32 %v828_v9, %v828_v9 }
 0x378   :  { %v880_v6 = vpop.permute.xlu1 %879 }
 0x379   :  { %3225 = vpush %v880_v6  ;;  %v842_v54 = vsel %vm723_vm2, %v838_v1, 0.0 }
 0x3aa   :  { %s3226_s30 = spop %3225 }
 0x3ab   :  { %v883_v44 = vstv %s3226_s30 }
 0x3ac   :  { %v884_v57 = vmul.f32 %v4095_v29, %v883_v44  ;;  %v885_v13 = vmul.f32 %v4097_v26, %v883_v44 }
 0x3ae   :  { %890 = vrot.lane.b32.xlu1 %v885_v13, %s3683_s0  ;;  %888 = vrot.lane.b32.xlu0 %v884_v57, %s3683_s0 }
 0x3b2   :  { %896 = vrot.lane.b32.xlu1 %v873_v46, %s3689_s17 }
 0x420   :  { %v891_v14 = vpop.permute.xlu1 %890  ;;  %v889_v47 = vpop.permute.xlu0 %888 }
 0x421   :  { %v895_v37 = vadd.f32 %v891_v14, %v877_v24  ;;  %v894_v43 = vadd.f32 %v889_v47, %v876_v39 }
 0x424   :  { %v897_v7 = vpop.permute.xlu1 %896 }
 0x425   :  { %3227 = vpush %v897_v7 }
 0x456   :  { %s3228_s2 = spop %3227 }
 0x457   :  { %v900_v15 = vstv %s3228_s2 }
 0x458   :  { %v901_v5 = vmul.f32 %v4095_v29, %v900_v15  ;;  %v902_v8 = vmul.f32 %v4097_v26, %v900_v15 }
 0x45a   :  { %907 = vrot.lane.b32.xlu1 %v902_v8, %s3689_s17  ;;  %905 = vrot.lane.b32.xlu0 %v901_v5, %s3689_s17 }
 0x45e   :  { %913 = vrot.lane.b32.xlu0 %v873_v46, %s3690_s24 }
 0x4cc   :  { %v906_v18 = vpop.permute.xlu0 %905  ;;  %v908_v51 = vpop.permute.xlu1 %907 }
 0x4cd   :  { %v912_v4 = vadd.f32 %v908_v51, %v895_v37  ;;  %v911_v38 = vadd.f32 %v906_v18, %v894_v43 }
 0x4d0   :  { %v914_v49 = vpop.permute.xlu0 %913 }
 0x4d1   :  { %3229 = vpush %v914_v49 }
 0x502   :  { %s3230_s11 = spop %3229 }
 0x503   :  { %v917_v25 = vstv %s3230_s11 }
 0x504   :  { %v918_v59 = vmul.f32 %v4095_v29, %v917_v25  ;;  %v919_v61 = vmul.f32 %v4097_v26, %v917_v25 }
 0x506   :  { %924 = vrot.lane.b32.xlu0 %v919_v61, %s3690_s24  ;;  %922 = vrot.lane.b32.xlu1 %v918_v59, %s3690_s24 }
 0x50a   :  { %930 = vrot.lane.b32.xlu1 %v873_v46, %s3691_s26  ;;  %v837_v46 = vmul.f32 %v827_v34, %v827_v34 }
 0x50c   :  { %v839_v2 = vsel %vm723_vm2, %v837_v46, 0.0 }
 0x578   :  { %v923_v19 = vpop.permute.xlu1 %922  ;;  %v925_v27 = vpop.permute.xlu0 %924 }
 0x579   :  { %v929_v40 = vadd.f32 %v925_v27, %v912_v4  ;;  %v928_v42 = vadd.f32 %v923_v19, %v911_v38 }
 0x57c   :  { %v931_v17 = vpop.permute.xlu1 %930 }
 0x57d   :  { %3231 = vpush %v931_v17 }
 0x57e   :  { %3233 = vpush %v4239_v22 }
 0x5ae   :  { %s3232_s12 = spop %3231 }
 0x5af   :  { %v934_v28 = vstv %s3232_s12  ;;  %s4266_s14 = spop %3233 }
 0x5b0   :  { %v935_v45 = vmul.f32 %v4095_v29, %v934_v28  ;;  %v936_v20 = vmul.f32 %v4097_v26, %v934_v28 }
 0x5b2   :  { %941 = vrot.lane.b32.xlu1 %v936_v20, %s3691_s26  ;;  %939 = vrot.lane.b32.xlu0 %v935_v45, %s3691_s26 }
 0x5d1   :  { %830 = vadd.xlane.f32.xlu0 %v829_v35 }
 0x5d6   :  { %833 = vadd.xlane.f32.xlu1 %v832_v60 }
 0x624   :  { %v942_v11 = vpop.permute.xlu1 %941  ;;  %v940_v10 = vpop.permute.xlu0 %939 }
 0x625   :  { %v946_v55 = vadd.f32 %v942_v11, %v929_v40  ;;  %v945_v12 = vadd.f32 %v940_v10, %v928_v42 }
 0x627   :  { %v950_v50 = vsel %vm723_vm2, %v946_v55, 0.0  ;;  %v947_v41 = vsel %vm723_vm2, %v945_v12, 0.0  ;;  %v955_v3 = vmul.f32 %v945_v12, %v945_v12  ;;  %v956_v44 = vmul.f32 %v946_v55, %v946_v55 }
 0x628   :  { %951 = vadd.xlane.f32.xlu1 %v950_v50  ;;  %948 = vadd.xlane.f32.xlu0 %v947_v41 }
 0x629   :  { %v957_v6 = vsel %vm723_vm2, %v955_v3, 0.0  ;;  %v960_v57 = vsel %vm723_vm2, %v956_v44, 0.0 }
 0x62c   :  { %840 = vadd.xlane.f32.xlu0 %v839_v2 }
 0x630   :  { %843 = vadd.xlane.f32.xlu0 %v842_v54 }
 0x634   :  { %958 = vadd.xlane.f32.xlu0 %v957_v6 }
 0x638   :  { %961 = vadd.xlane.f32.xlu0 %v960_v57  ;;  %v704_v57 = vpop.f32.mrf.mxu1 }
 0x639   :  { %997 = vrot.lane.b32.xlu1 %v4239_v22, %s3683_s0 }
 0x65a   :  { %v4280_v25 = vpop.xlane.xlu0 %830 }
 0x65f   :  { %v4262_v13 = vpop.xlane.xlu1 %833 }
 0x660   :  { %v836_v52 = vmul.f32 0.0625, %v4262_v13 }
 0x6b1   :  { %v4264_v14 = vpop.xlane.xlu1 %951  ;;  %v4282_v59 = vpop.xlane.xlu0 %948 }
 0x6b2   :  { %v954_v62 = vmul.f32 0.0625, %v4264_v14 }
 0x6b5   :  { %v998_v7 = vpop.permute.xlu1 %997  ;;  %v4284_v61 = vpop.xlane.xlu0 %840 }
 0x6b6   :  { %3235 = vpush %v998_v7  ;;  %v717_v7 = vmul.f32 %v4190_v0, %v4190_v0 }
 0x6b9   :  { %v4286_v51 = vpop.xlane.xlu0 %843 }
 0x6bd   :  { %v4288_v19 = vpop.xlane.xlu0 %958 }
 0x6c1   :  { %v4290_v17 = vpop.xlane.xlu0 %961 }
 0x6e7   :  { %s3236_s15 = spop %3235 }
 0x6e8   :  { %v1001_v15 = vstv %s3236_s15 }
 0x6e9   :  { %v1002_v5 = vmul.f32 %v4095_v29, %v1001_v15  ;;  %v1003_v8 = vmul.f32 %v4097_v26, %v1001_v15  ;;  %v715_v15 = vmul.f32 0.0625, %v704_v57 }
 0x6eb   :  { %1008 = vrot.lane.b32.xlu1 %v1003_v8, %s3683_s0  ;;  %1006 = vrot.lane.b32.xlu0 %v1002_v5, %s3683_s0  ;;  %v719_v5 = vsub.f32 %v715_v15, %v717_v7 }
 0x6ed   :  { %v721_v8 = vmax.f32 %v719_v5, 0.0 }
 0x6ef   :  { %1014 = vrot.lane.b32.xlu1 %v4239_v22, %s3689_s17  ;;  %3473 = vrsqrt.f32 %v721_v8  ;;  %vm728_vm3 = vcmp.eq.f32.partialorder %v721_v8, inf  ;;  %vm730_vm4 = vcmp.eq.f32.partialorder %v721_v8, 0.0 }
 0x75d   :  { %v1009_v16 = vpop.permute.xlu1 %1008  ;;  %v1007_v28 = vpop.permute.xlu0 %1006 }
 0x761   :  { %v1015_v21 = vpop.permute.xlu1 %1014 }
 0x762   :  { %3237 = vpush %v1015_v21 }
 0x793   :  { %s3238_s8 = spop %3237 }
 0x794   :  { %v1018_v47 = vstv %s3238_s8 }
 0x795   :  { %v1019_v18 = vmul.f32 %v4095_v29, %v1018_v47  ;;  %v1020_v49 = vmul.f32 %v4097_v26, %v1018_v47 }
 0x797   :  { %1025 = vrot.lane.b32.xlu1 %v1020_v49, %s3689_s17  ;;  %1023 = vrot.lane.b32.xlu0 %v1019_v18, %s3689_s17 }
 0x79b   :  { %1031 = vrot.lane.b32.xlu0 %v4239_v22, %s3690_s24 }
 0x809   :  { %v1024_v45 = vpop.permute.xlu0 %1023  ;;  %v1026_v53 = vpop.permute.xlu1 %1025 }
 0x80d   :  { %v1032_v20 = vpop.permute.xlu0 %1031 }
 0x80e   :  { %3239 = vpush %v1032_v20 }
 0x83f   :  { %s3240_s16 = spop %3239 }
 0x840   :  { %v1035_v31 = vstv %s3240_s16 }
 0x841   :  { %v1036_v48 = vmul.f32 %v4095_v29, %v1035_v31  ;;  %v1037_v30 = vmul.f32 %v4097_v26, %v1035_v31  ;;  %v835_v31 = vmul.f32 0.0625, %v4280_v25 }
 0x843   :  { %1042 = vrot.lane.b32.xlu0 %v1037_v30, %s3690_s24  ;;  %1040 = vrot.lane.b32.xlu1 %v1036_v48, %s3690_s24  ;;  %v953_v48 = vmul.f32 0.0625, %v4282_v59  ;;  %v845_v30 = vmul.f32 0.0625, %v4284_v61 }
 0x847   :  { %1048 = vrot.lane.b32.xlu1 %v4239_v22, %s3691_s26  ;;  %v993_v22 = vstv %s4266_s14 }
 0x848   :  { %v994_v35 = vmul.f32 %v4095_v29, %v993_v22  ;;  %v995_v9 = vmul.f32 %v4097_v26, %v993_v22 }
 0x84a   :  { %v1013_v60 = vadd.f32 %v1009_v16, %v995_v9  ;;  %v1012_v36 = vadd.f32 %v1007_v28, %v994_v35  ;;  %v3474_v16 = vpop.eup %3473  ;;  %v731_v28 = vand.u32 2147483648, %v721_v8 }
 0x84b   :  { %v727_v49 = vmul.f32 %v3474_v16, %v721_v8 }
 0x84c   :  { %v1030_v24 = vadd.f32 %v1026_v53, %v1013_v60  ;;  %v1029_v37 = vadd.f32 %v1024_v45, %v1012_v36 }
 0x84d   :  { %v729_v0 = vsel %vm728_vm3, %v721_v8, %v727_v49 }
 0x84e   :  { %v732_v45 = vsel %vm730_vm4, %v731_v28, %v729_v0  ;;  %v966_v0 = vmul.f32 %v954_v62, %v954_v62 }
 0x8b5   :  { %v1041_v32 = vpop.permute.xlu1 %1040  ;;  %v1043_v39 = vpop.permute.xlu0 %1042 }
 0x8b6   :  { %v1047_v43 = vadd.f32 %v1043_v39, %v1030_v24  ;;  %v1046_v27 = vadd.f32 %v1041_v32, %v1029_v37  ;;  %v847_v32 = vmul.f32 %v835_v31, %v835_v31 }
 0x8b9   :  { %v1049_v33 = vpop.permute.xlu1 %1048 }
 0x8ba   :  { %3241 = vpush %v1049_v33  ;;  %v963_v33 = vmul.f32 0.0625, %v4288_v19 }
 0x8bb   :  { %3243 = vpush %v4303_v23 }
 0x8eb   :  { %s3242_s20 = spop %3241 }
 0x8ec   :  { %v1052_v58 = vstv %s3242_s20  ;;  %s4319_s1 = spop %3243 }
 0x8ed   :  { %v1053_v34 = vmul.f32 %v4095_v29, %v1052_v58  ;;  %v1054_v63 = vmul.f32 %v4097_v26, %v1052_v58 }
 0x8ef   :  { %1059 = vrot.lane.b32.xlu1 %v1054_v63, %s3691_s26  ;;  %1057 = vrot.lane.b32.xlu0 %v1053_v34, %s3691_s26  ;;  %v965_v34 = vmul.f32 %v953_v48, %v953_v48  ;;  %v849_v63 = vsub.f32 %v845_v30, %v847_v32 }
 0x8f1   :  { %v967_v35 = vsub.f32 %v963_v33, %v965_v34  ;;  %v851_v60 = vmax.f32 %v849_v63, 0.0 }
 0x8f3   :  { %v969_v39 = vmax.f32 %v967_v35, 0.0  ;;  %3475 = vrsqrt.f32 %v851_v60  ;;  %vm858_vm6 = vcmp.eq.f32.partialorder %v851_v60, inf  ;;  %vm860_vm10 = vcmp.eq.f32.partialorder %v851_v60, 0.0 }
 0x8f5   :  { %3477 = vrsqrt.f32 %v969_v39  ;;  %vm976_vm8 = vcmp.eq.f32.partialorder %v969_v39, inf  ;;  %vm978_vm14 = vcmp.eq.f32.partialorder %v969_v39, 0.0 }
 0x900   :  { %v3476_v61 = vpop.eup %3475 }
 0x902   :  { %v3478_v19 = vpop.eup %3477 }
 0x961   :  { %v1060_v4 = vpop.permute.xlu1 %1059  ;;  %v1058_v38 = vpop.permute.xlu0 %1057 }
 0x962   :  { %v1064_v40 = vadd.f32 %v1060_v4, %v1047_v43  ;;  %v1063_v42 = vadd.f32 %v1058_v38, %v1046_v27  ;;  %v857_v43 = vmul.f32 %v3476_v61, %v851_v60  ;;  %v975_v38 = vmul.f32 %v3478_v19, %v969_v39 }
 0x964   :  { %v1068_v11 = vsel %vm723_vm2, %v1064_v40, 0.0  ;;  %v1065_v10 = vsel %vm723_vm2, %v1063_v42, 0.0  ;;  %v1073_v55 = vmul.f32 %v1063_v42, %v1063_v42  ;;  %v1074_v50 = vmul.f32 %v1064_v40, %v1064_v40 }
 0x965   :  { %1069 = vadd.xlane.f32.xlu1 %v1068_v11  ;;  %1066 = vadd.xlane.f32.xlu0 %v1065_v10  ;;  %v859_v42 = vsel %vm858_vm6, %v851_v60, %v857_v43  ;;  %v861_v11 = vand.u32 2147483648, %v851_v60 }
 0x966   :  { %v1075_v12 = vsel %vm723_vm2, %v1073_v55, 0.0  ;;  %v1078_v41 = vsel %vm723_vm2, %v1074_v50, 0.0  ;;  %v977_v55 = vsel %vm976_vm8, %v969_v39, %v975_v38  ;;  %v1111_v38 = vstv %s4319_s1 }
 0x967   :  { %v862_v50 = vsel %vm860_vm10, %v861_v11, %v859_v42  ;;  %v1113_v42 = vmul.f32 %v4097_v26, %v1111_v38 }
 0x969   :  { %1076 = vadd.xlane.f32.xlu0 %v1075_v12  ;;  %v979_v12 = vand.u32 2147483648, %v969_v39 }
 0x96d   :  { %1079 = vadd.xlane.f32.xlu0 %v1078_v41 }
 0x976   :  { %1115 = vrot.lane.b32.xlu1 %v4303_v23, %s3683_s0 }
 0x9ee   :  { %v4317_v46 = vpop.xlane.xlu1 %1069  ;;  %v1067_v20 = vpop.xlane.xlu0 %1066 }
 0x9ef   :  { %v1071_v58 = vmul.f32 0.0625, %v1067_v20  ;;  %v1072_v49 = vmul.f32 0.0625, %v4317_v46 }
 0x9f1   :  { %v1083_v9 = vmul.f32 %v1071_v58, %v1071_v58 }
 0x9f2   :  { %v1116_v2 = vpop.permute.xlu1 %1115  ;;  %v1077_v53 = vpop.xlane.xlu0 %1076 }
 0x9f3   :  { %3245 = vpush %v1116_v2  ;;  %v1081_v22 = vmul.f32 0.0625, %v1077_v53  ;;  %v980_v2 = vsel %vm978_vm14, %v979_v12, %v977_v55 }
 0x9f5   :  { %v1085_v36 = vsub.f32 %v1081_v22, %v1083_v9 }
 0x9f6   :  { %v4342_v25 = vpop.xlane.xlu0 %1079 }
 0x9f7   :  { %v1087_v24 = vmax.f32 %v1085_v36, 0.0 }
 0x9f9   :  { %3479 = vrsqrt.f32 %v1087_v24  ;;  %vm1094_vm13 = vcmp.eq.f32.partialorder %v1087_v24, inf  ;;  %vm1096_vm1 = vcmp.eq.f32.partialorder %v1087_v24, 0.0 }
 0xa06   :  { %v3480_v27 = vpop.eup %3479 }
 0xa07   :  { %v1093_v40 = vmul.f32 %v3480_v27, %v1087_v24 }
 0xa09   :  { %v1095_v41 = vsel %vm1094_vm13, %v1087_v24, %v1093_v40  ;;  %v1112_v40 = vmul.f32 %v4095_v29, %v1111_v38 }
 0xa24   :  { %s3246_s23 = spop %3245 }
 0xa25   :  { %v1119_v1 = vstv %s3246_s23 }
 0xa26   :  { %v1120_v54 = vmul.f32 %v4095_v29, %v1119_v1  ;;  %v1121_v3 = vmul.f32 %v4097_v26, %v1119_v1  ;;  %v1097_v1 = vand.u32 2147483648, %v1087_v24 }
 0xa28   :  { %1126 = vrot.lane.b32.xlu1 %v1121_v3, %s3683_s0  ;;  %1124 = vrot.lane.b32.xlu0 %v1120_v54, %s3683_s0  ;;  %v1098_v54 = vsel %vm1096_vm1, %v1097_v1, %v1095_v41  ;;  %v722_v3 = vmax.f32 %v720_v56, 0.0  ;;  %v846_v56 = vmul.f32 0.0625, %v4286_v51 }
 0xa2a   :  { %3481 = vrsqrt.f32 %v722_v3  ;;  %vm735_vm3 = vcmp.eq.f32.partialorder %v722_v3, inf  ;;  %v738_v16 = vand.u32 2147483648, %v722_v3  ;;  %vm737_vm4 = vcmp.eq.f32.partialorder %v722_v3, 0.0 }
 0xa2c   :  { %1132 = vrot.lane.b32.xlu1 %v4303_v23, %s3689_s17 }
 0xa9a   :  { %v4327_v6 = vpop.permute.xlu1 %1126  ;;  %v4344_v59 = vpop.permute.xlu0 %1124 }
 0xa9b   :  { %v1131_v11 = vadd.f32 %v4327_v6, %v1113_v42 }
 0xa9e   :  { %v1133_v44 = vpop.permute.xlu1 %1132 }
 0xa9f   :  { %3247 = vpush %v1133_v44  ;;  %v3482_v44 = vpop.eup %3481 }
 0xaa0   :  { %v734_v57 = vmul.f32 %v3482_v44, %v722_v3 }
 0xaa2   :  { %v736_v8 = vsel %vm735_vm3, %v722_v3, %v734_v57  ;;  %vm1342_vm3 = vcmask 433568  }
 0xad0   :  { %s3248_s25 = spop %3247 }
 0xad1   :  { %v1136_v21 = vstv %s3248_s25 }
 0xad2   :  { %v1137_v47 = vmul.f32 %v4095_v29, %v1136_v21  ;;  %v1138_v18 = vmul.f32 %v4097_v26, %v1136_v21  ;;  %v739_v21 = vsel %vm737_vm4, %v738_v16, %v736_v8 }
 0xad4   :  { %1143 = vrot.lane.b32.xlu1 %v1138_v18, %s3689_s17  ;;  %1141 = vrot.lane.b32.xlu0 %v1137_v47, %s3689_s17  ;;  %v848_v47 = vmul.f32 %v836_v52, %v836_v52  ;;  %v964_v18 = vmul.f32 0.0625, %v4290_v17 }
 0xad6   :  { %v850_v28 = vsub.f32 %v846_v56, %v848_v47  ;;  %v968_v20 = vsub.f32 %v964_v18, %v966_v0 }
 0xad8   :  { %1149 = vrot.lane.b32.xlu0 %v4303_v23, %s3690_s24 }
 0xadc   :  { %742 = vrot.lane.b32.xlu0 %v732_v45, %s3692_s27  ;;  %v1082_v45 = vmul.f32 0.0625, %v4342_v25 }
 0xb46   :  { %v4346_v37 = vpop.permute.xlu0 %1141  ;;  %v1144_v51 = vpop.permute.xlu1 %1143 }
 0xb47   :  { %v1148_v12 = vadd.f32 %v1144_v51, %v1131_v11 }
 0xb4a   :  { %v1150_v4 = vpop.permute.xlu0 %1149 }
 0xb4b   :  { %3249 = vpush %v1150_v4  ;;  %v4383_v4 = vld [vmem:[%s5170_s4 + $0x4] sm:$0x1] }
 0xb4e   :  { %v743_v10 = vpop.permute.xlu0 %742 }
 0xb4f   :  { %749 = vst.msk [vmem:[#allocation2] sm:$0xff] %vm748_vm5, %v743_v10  ;;  %v1130_v10 = vadd.f32 %v4344_v59, %v1112_v40 }
 0xb50   :  { %854 = vst.msk [vmem:[#allocation2] sm:$0xff] %vm853_vm7, %v835_v31  ;;  %v1084_v31 = vmul.f32 %v1072_v49, %v1072_v49 }
 0xb51   :  { %871 = vst.msk [vmem:[#allocation2] sm:$0xff] %vm870_vm9, %v862_v50  ;;  %v1147_v50 = vadd.f32 %v4346_v37, %v1130_v10  ;;  %v4425_v10 = vld [vmem:[%s5170_s4 + $0x5] sm:$0x1] }
 0xb52   :  { %972 = vst.msk [vmem:[#allocation2] sm:$0xff] %vm971_vm11, %v953_v48  ;;  %v852_v48 = vmax.f32 %v850_v28, 0.0  ;;  %v1086_v30 = vsub.f32 %v1082_v45, %v1084_v31 }
 0xb53   :  { %989 = vst.msk [vmem:[#allocation2] sm:$0xff] %vm988_vm12, %v980_v2 }
 0xb54   :  { %1090 = vst.msk [vmem:[#allocation2] sm:$0xff] %vm1089_vm15, %v1071_v58  ;;  %3483 = vrsqrt.f32 %v852_v48  ;;  %v1088_v13 = vmax.f32 %v1086_v30, 0.0  ;;  %vm865_vm6 = vcmp.eq.f32.partialorder %v852_v48, inf  ;;  %v868_v63 = vand.u32 2147483648, %v852_v48 }
 0xb55   :  { %1107 = vst.msk [vmem:[#allocation2] sm:$0xff] %vm1106_vm0, %v1098_v54  ;;  %vm867_vm10 = vcmp.eq.f32.partialorder %v852_v48, 0.0 }
 0xb56   :  { %vm1101_vm13 = vcmp.eq.f32.partialorder %v1088_v13, inf  ;;  %v1104_v25 = vand.u32 2147483648, %v1088_v13  ;;  %vm1103_vm1 = vcmp.eq.f32.partialorder %v1088_v13, 0.0 }
 0xb61   :  { %v3484_v14 = vpop.eup %3483 }
 0xb62   :  { %v864_v32 = vmul.f32 %v3484_v14, %v852_v48 }
 0xb64   :  { %v866_v34 = vsel %vm865_vm6, %v852_v48, %v864_v32 }
 0xb65   :  { %v869_v60 = vsel %vm867_vm10, %v868_v63, %v866_v34 }
 0xb7c   :  { %s3250_s28 = spop %3249 }
 0xb7d   :  { %v1153_v7 = vstv %s3250_s28 }
 0xb7e   :  { %v1154_v15 = vmul.f32 %v4095_v29, %v1153_v7  ;;  %v1155_v5 = vmul.f32 %v4097_v26, %v1153_v7 }
 0xb80   :  { %1160 = vrot.lane.b32.xlu0 %v1155_v5, %s3690_s24  ;;  %1158 = vrot.lane.b32.xlu1 %v1154_v15, %s3690_s24 }
 0xb84   :  { %744 = vrot.lane.b32.xlu1 %v739_v21, %s3692_s27 }
 0xb88   :  { %1166 = vrot.lane.b32.xlu1 %v4303_v23, %s3691_s26  ;;  %v970_v23 = vmax.f32 %v968_v20, 0.0 }
 0xb8a   :  { %3485 = vrsqrt.f32 %v970_v23  ;;  %vm983_vm8 = vcmp.eq.f32.partialorder %v970_v23, inf  ;;  %v986_v9 = vand.u32 2147483648, %v970_v23  ;;  %vm985_vm14 = vcmp.eq.f32.partialorder %v970_v23, 0.0 }
 0xb8b   :  { %3487 = vrsqrt.f32 %v1088_v13 }
 0xb97   :  { %v3486_v53 = vpop.eup %3485 }
 0xb98   :  { %v3488_v17 = vpop.eup %3487  ;;  %v982_v46 = vmul.f32 %v3486_v53, %v970_v23 }
 0xb99   :  { %v1100_v58 = vmul.f32 %v3488_v17, %v1088_v13 }
 0xb9a   :  { %v984_v35 = vsel %vm983_vm8, %v970_v23, %v982_v46 }
 0xb9b   :  { %v1102_v36 = vsel %vm1101_vm13, %v1088_v13, %v1100_v58  ;;  %v987_v39 = vsel %vm985_vm14, %v986_v9, %v984_v35  ;;  %vm1443_vm13 = vcmask 179368  }
 0xb9c   :  { %v1105_v61 = vsel %vm1103_vm1, %v1104_v25, %v1102_v36  ;;  %vm1460_vm1 = vcmask 441768  }
 0xbf2   :  { %v1159_v33 = vpop.permute.xlu1 %1158  ;;  %v1161_v55 = vpop.permute.xlu0 %1160 }
 0xbf3   :  { %v1164_v41 = vadd.f32 %v1159_v33, %v1147_v50  ;;  %v1165_v2 = vadd.f32 %v1161_v55, %v1148_v12 }
 0xbf6   :  { %v745_v22 = vpop.permute.xlu1 %744 }
 0xbf7   :  { %750 = vst.msk [vmem:[#allocation2 + $0x8] sm:$0xff] %vm748_vm5, %v745_v22  ;;  %vm1207_vm5 = vcmask 162968  }
 0xbf8   :  { %855 = vst.msk [vmem:[#allocation2 + $0x8] sm:$0xff] %vm853_vm7, %v836_v52  ;;  %vm1224_vm7 = vcmask 425368  }
 0xbf9   :  { %872 = vst.msk [vmem:[#allocation2 + $0x8] sm:$0xff] %vm870_vm9, %v869_v60 }
 0xbfa   :  { %973 = vst.msk [vmem:[#allocation2 + $0x8] sm:$0xff] %vm971_vm11, %v954_v62  ;;  %v1167_v24 = vpop.permute.xlu1 %1166 }
 0xbfb   :  { %990 = vst.msk [vmem:[#allocation2 + $0x8] sm:$0xff] %vm988_vm12, %v987_v39 }
 0xbfc   :  { %3251 = vpush %v1167_v24 }
 0xbfd   :  { %1091 = vst.msk [vmem:[#allocation2 + $0x8] sm:$0xff] %vm1089_vm15, %v1072_v49 }
 0xbfe   :  { %1108 = vst.msk [vmem:[#allocation2 + $0x8] sm:$0xff] %vm1106_vm0, %v1105_v61  ;;  %vm1325_vm0 = vcmask 171168  }
 0xbff   :  { %3253 = vpush %v4383_v4 }
 0xc2d   :  { %s3252_s3 = spop %3251 }
 0xc2e   :  { %v1170_v19 = vstv %s3252_s3 }
 0xc2f   :  { %v1171_v43 = vmul.f32 %v4095_v29, %v1170_v19  ;;  %v1172_v27 = vmul.f32 %v4097_v26, %v1170_v19 }
 0xc30   :  { %s4400_s2 = spop %3253 }
 0xc31   :  { %1177 = vrot.lane.b32.xlu1 %v1172_v27, %s3691_s26  ;;  %1175 = vrot.lane.b32.xlu0 %v1171_v43, %s3691_s26 }
 0xca3   :  { %v1178_v1 = vpop.permute.xlu1 %1177  ;;  %v1176_v54 = vpop.permute.xlu0 %1175 }
 0xca4   :  { %v1182_v3 = vadd.f32 %v1178_v1, %v1165_v2  ;;  %v1181_v44 = vadd.f32 %v1176_v54, %v1164_v41 }
 0xca6   :  { %v1186_v57 = vsel %vm723_vm2, %v1182_v3, 0.0  ;;  %v1183_v7 = vsel %vm723_vm2, %v1181_v44, 0.0  ;;  %v1191_v15 = vmul.f32 %v1181_v44, %v1181_v44  ;;  %v1192_v59 = vmul.f32 %v1182_v3, %v1182_v3 }
 0xca7   :  { %1187 = vadd.xlane.f32.xlu1 %v1186_v57  ;;  %1184 = vadd.xlane.f32.xlu0 %v1183_v7 }
 0xca8   :  { %v1193_v6 = vsel %vm723_vm2, %v1191_v15, 0.0  ;;  %v1196_v5 = vsel %vm723_vm2, %v1192_v59, 0.0 }
 0xcab   :  { %1194 = vadd.xlane.f32.xlu0 %v1193_v6 }
 0xcaf   :  { %1197 = vadd.xlane.f32.xlu0 %v1196_v5 }
 0xcb8   :  { %1233 = vrot.lane.b32.xlu1 %v4383_v4, %s3683_s0 }
 0xd30   :  { %v1188_v37 = vpop.xlane.xlu1 %1187  ;;  %v1185_v8 = vpop.xlane.xlu0 %1184 }
 0xd31   :  { %v1190_v16 = vmul.f32 0.0625, %v1188_v37  ;;  %v1189_v21 = vmul.f32 0.0625, %v1185_v8 }
 0xd33   :  { %1209 = vst.msk [vmem:[#allocation2 + $0x8] sm:$0xff] %vm1207_vm5, %v1190_v16  ;;  %1208 = vst.msk [vmem:[#allocation2] sm:$0xff] %vm1207_vm5, %v1189_v21  ;;  %v1201_v56 = vmul.f32 %v1189_v21, %v1189_v21  ;;  %v1202_v0 = vmul.f32 %v1190_v16, %v1190_v16 }
 0xd34   :  { %v1234_v52 = vpop.permute.xlu1 %1233  ;;  %v1195_v62 = vpop.xlane.xlu0 %1194 }
 0xd35   :  { %v1199_v47 = vmul.f32 0.0625, %v1195_v62  ;;  %3255 = vpush %v1234_v52 }
 0xd37   :  { %v1203_v18 = vsub.f32 %v1199_v47, %v1201_v56 }
 0xd38   :  { %v1198_v49 = vpop.xlane.xlu0 %1197 }
 0xd39   :  { %v1205_v28 = vmax.f32 %v1203_v18, 0.0  ;;  %v1200_v45 = vmul.f32 0.0625, %v1198_v49 }
 0xd3b   :  { %3489 = vrsqrt.f32 %v1205_v28  ;;  %v1204_v20 = vsub.f32 %v1200_v45, %v1202_v0  ;;  %vm1212_vm9 = vcmp.eq.f32.partialorder %v1205_v28, inf  ;;  %v1215_v23 = vand.u32 2147483648, %v1205_v28 }
 0xd3c   :  { %vm1214_vm11 = vcmp.eq.f32.partialorder %v1205_v28, 0.0 }
 0xd3d   :  { %v1206_v31 = vmax.f32 %v1204_v20, 0.0 }
 0xd3f   :  { %3491 = vrsqrt.f32 %v1206_v31  ;;  %vm1219_vm12 = vcmp.eq.f32.partialorder %v1206_v31, inf  ;;  %v1222_v32 = vand.u32 2147483648, %v1206_v31  ;;  %vm1221_vm15 = vcmp.eq.f32.partialorder %v1206_v31, 0.0 }
 0xd48   :  { %v3490_v48 = vpop.eup %3489 }
 0xd49   :  { %v1211_v30 = vmul.f32 %v3490_v48, %v1205_v28 }
 0xd4b   :  { %v1213_v13 = vsel %vm1212_vm9, %v1205_v28, %v1211_v30 }
 0xd4c   :  { %v3492_v14 = vpop.eup %3491  ;;  %v1216_v51 = vsel %vm1214_vm11, %v1215_v23, %v1213_v13  ;;  %vm1561_vm11 = vcmask 187568  }
 0xd4d   :  { %v1218_v53 = vmul.f32 %v3492_v14, %v1206_v31  ;;  %1225 = vst.msk [vmem:[#allocation2] sm:$0xff] %vm1224_vm7, %v1216_v51 }
 0xd4f   :  { %v1220_v17 = vsel %vm1219_vm12, %v1206_v31, %v1218_v53 }
 0xd50   :  { %v1223_v33 = vsel %vm1221_vm15, %v1222_v32, %v1220_v17  ;;  %vm1578_vm15 = vcmask 449968  }
 0xd51   :  { %1226 = vst.msk [vmem:[#allocation2 + $0x8] sm:$0xff] %vm1224_vm7, %v1223_v33 }
 0xd66   :  { %s3256_s11 = spop %3255 }
 0xd67   :  { %v1237_v46 = vstv %s3256_s11 }
 0xd68   :  { %v1238_v58 = vmul.f32 %v4095_v29, %v1237_v46  ;;  %v1239_v34 = vmul.f32 %v4097_v26, %v1237_v46 }
 0xd6a   :  { %1244 = vrot.lane.b32.xlu1 %v1239_v34, %s3683_s0  ;;  %1242 = vrot.lane.b32.xlu0 %v1238_v58, %s3683_s0 }
 0xd6e   :  { %1250 = vrot.lane.b32.xlu1 %v4383_v4, %s3689_s17 }
 0xddc   :  { %v1245_v63 = vpop.permute.xlu1 %1244  ;;  %v1243_v36 = vpop.permute.xlu0 %1242 }
 0xde0   :  { %v1251_v22 = vpop.permute.xlu1 %1250 }
 0xde1   :  { %3257 = vpush %v1251_v22 }
 0xe12   :  { %s3258_s12 = spop %3257 }
 0xe13   :  { %v1254_v35 = vstv %s3258_s12 }
 0xe14   :  { %v1255_v9 = vmul.f32 %v4095_v29, %v1254_v35  ;;  %v1256_v60 = vmul.f32 %v4097_v26, %v1254_v35 }
 0xe16   :  { %1261 = vrot.lane.b32.xlu1 %v1256_v60, %s3689_s17  ;;  %1259 = vrot.lane.b32.xlu0 %v1255_v9, %s3689_s17 }
 0xe1a   :  { %1267 = vrot.lane.b32.xlu0 %v4383_v4, %s3690_s24 }
 0xe88   :  { %v1260_v39 = vpop.permute.xlu0 %1259  ;;  %v1262_v43 = vpop.permute.xlu1 %1261 }
 0xe8c   :  { %v1268_v24 = vpop.permute.xlu0 %1267 }
 0xe8d   :  { %3259 = vpush %v1268_v24 }
 0xebe   :  { %s3260_s6 = spop %3259 }
 0xebf   :  { %v1271_v25 = vstv %s3260_s6 }
 0xec0   :  { %v1272_v61 = vmul.f32 %v4095_v29, %v1271_v25  ;;  %v1273_v19 = vmul.f32 %v4097_v26, %v1271_v25 }
 0xec2   :  { %1278 = vrot.lane.b32.xlu0 %v1273_v19, %s3690_s24  ;;  %1276 = vrot.lane.b32.xlu1 %v1272_v61, %s3690_s24 }
 0xec6   :  { %1284 = vrot.lane.b32.xlu1 %v4383_v4, %s3691_s26  ;;  %v1229_v4 = vstv %s4400_s2 }
 0xec7   :  { %v1230_v55 = vmul.f32 %v4095_v29, %v1229_v4  ;;  %v1231_v12 = vmul.f32 %v4097_v26, %v1229_v4 }
 0xec9   :  { %v1249_v50 = vadd.f32 %v1245_v63, %v1231_v12  ;;  %v1248_v41 = vadd.f32 %v1243_v36, %v1230_v55 }
 0xecb   :  { %v1266_v1 = vadd.f32 %v1262_v43, %v1249_v50  ;;  %v1265_v54 = vadd.f32 %v1260_v39, %v1248_v41  ;;  %v4464_v41 = vld [vmem:[%s5170_s4 + $0x6] sm:$0x1] }
 0xf34   :  { %v1277_v27 = vpop.permute.xlu1 %1276  ;;  %v1279_v2 = vpop.permute.xlu0 %1278 }
 0xf35   :  { %v1283_v3 = vadd.f32 %v1279_v2, %v1266_v1  ;;  %v1282_v44 = vadd.f32 %v1277_v27, %v1265_v54 }
 0xf38   :  { %v1285_v38 = vpop.permute.xlu1 %1284 }
 0xf39   :  { %3261 = vpush %v1285_v38 }
 0xf3a   :  { %3263 = vpush %v4425_v10 }
 0xf6a   :  { %s3262_s13 = spop %3261 }
 0xf6b   :  { %v1288_v40 = vstv %s3262_s13  ;;  %s4439_s8 = spop %3263 }
 0xf6c   :  { %v1289_v42 = vmul.f32 %v4095_v29, %v1288_v40  ;;  %v1290_v11 = vmul.f32 %v4097_v26, %v1288_v40 }
 0xf6e   :  { %1295 = vrot.lane.b32.xlu1 %v1290_v11, %s3691_s26  ;;  %1293 = vrot.lane.b32.xlu0 %v1289_v42, %s3691_s26 }
 0xfe0   :  { %v1296_v57 = vpop.permute.xlu1 %1295  ;;  %v1294_v7 = vpop.permute.xlu0 %1293 }
 0xfe1   :  { %v1300_v15 = vadd.f32 %v1296_v57, %v1283_v3  ;;  %v1299_v6 = vadd.f32 %v1294_v7, %v1282_v44 }
 0xfe3   :  { %v1304_v59 = vsel %vm723_vm2, %v1300_v15, 0.0  ;;  %v1301_v5 = vsel %vm723_vm2, %v1299_v6, 0.0  ;;  %v1309_v37 = vmul.f32 %v1299_v6, %v1299_v6  ;;  %v1310_v16 = vmul.f32 %v1300_v15, %v1300_v15 }
 0xfe4   :  { %1305 = vadd.xlane.f32.xlu1 %v1304_v59  ;;  %1302 = vadd.xlane.f32.xlu0 %v1301_v5 }
 0xfe5   :  { %v1311_v8 = vsel %vm723_vm2, %v1309_v37, 0.0  ;;  %v1314_v21 = vsel %vm723_vm2, %v1310_v16, 0.0 }
 0xfe8   :  { %1312 = vadd.xlane.f32.xlu0 %v1311_v8 }
 0xfec   :  { %1315 = vadd.xlane.f32.xlu0 %v1314_v21 }
 0xff5   :  { %1351 = vrot.lane.b32.xlu1 %v4425_v10, %s3683_s0 }
0x106d   :  { %v1306_v52 = vpop.xlane.xlu1 %1305  ;;  %v1303_v62 = vpop.xlane.xlu0 %1302 }
0x106e   :  { %v1308_v56 = vmul.f32 0.0625, %v1306_v52  ;;  %v1307_v47 = vmul.f32 0.0625, %v1303_v62 }
0x1070   :  { %1327 = vst.msk [vmem:[#allocation2 + $0x8] sm:$0xff] %vm1325_vm0, %v1308_v56  ;;  %1326 = vst.msk [vmem:[#allocation2] sm:$0xff] %vm1325_vm0, %v1307_v47  ;;  %v1319_v0 = vmul.f32 %v1307_v47, %v1307_v47  ;;  %v1320_v31 = vmul.f32 %v1308_v56, %v1308_v56 }
0x1071   :  { %v1352_v18 = vpop.permute.xlu1 %1351  ;;  %v1313_v49 = vpop.xlane.xlu0 %1312 }
0x1072   :  { %v1317_v28 = vmul.f32 0.0625, %v1313_v49  ;;  %3265 = vpush %v1352_v18 }
0x1074   :  { %v1321_v45 = vsub.f32 %v1317_v28, %v1319_v0 }
0x1075   :  { %v1316_v20 = vpop.xlane.xlu0 %1315 }
0x1076   :  { %v1323_v48 = vmax.f32 %v1321_v45, 0.0  ;;  %v1318_v30 = vmul.f32 0.0625, %v1316_v20 }
0x1078   :  { %3493 = vrsqrt.f32 %v1323_v48  ;;  %v1322_v23 = vsub.f32 %v1318_v30, %v1320_v31  ;;  %vm1330_vm4 = vcmp.eq.f32.partialorder %v1323_v48, inf  ;;  %v1333_v53 = vand.u32 2147483648, %v1323_v48 }
0x1079   :  { %vm1332_vm6 = vcmp.eq.f32.partialorder %v1323_v48, 0.0 }
0x107a   :  { %v1324_v13 = vmax.f32 %v1322_v23, 0.0 }
0x107c   :  { %3495 = vrsqrt.f32 %v1324_v13  ;;  %vm1337_vm8 = vcmp.eq.f32.partialorder %v1324_v13, inf  ;;  %v1340_v58 = vand.u32 2147483648, %v1324_v13  ;;  %vm1339_vm10 = vcmp.eq.f32.partialorder %v1324_v13, 0.0 }
0x1085   :  { %v3494_v14 = vpop.eup %3493 }
0x1086   :  { %v1329_v51 = vmul.f32 %v3494_v14, %v1323_v48 }
0x1088   :  { %v1331_v32 = vsel %vm1330_vm4, %v1323_v48, %v1329_v51 }
0x1089   :  { %v3496_v17 = vpop.eup %3495  ;;  %v1334_v33 = vsel %vm1332_vm6, %v1333_v53, %v1331_v32  ;;  %vm1696_vm6 = vcmask 458168  }
0x108a   :  { %v1336_v46 = vmul.f32 %v3496_v17, %v1324_v13  ;;  %1343 = vst.msk [vmem:[#allocation2] sm:$0xff] %vm1342_vm3, %v1334_v33 }
0x108c   :  { %v1338_v34 = vsel %vm1337_vm8, %v1324_v13, %v1336_v46 }
0x108d   :  { %v1341_v63 = vsel %vm1339_vm10, %v1340_v58, %v1338_v34 }
0x108e   :  { %1344 = vst.msk [vmem:[#allocation2 + $0x8] sm:$0xff] %vm1342_vm3, %v1341_v63 }
0x10a3   :  { %s3266_s16 = spop %3265 }
0x10a4   :  { %v1355_v22 = vstv %s3266_s16 }
0x10a5   :  { %v1356_v35 = vmul.f32 %v4095_v29, %v1355_v22  ;;  %v1357_v9 = vmul.f32 %v4097_v26, %v1355_v22 }
0x10a7   :  { %1362 = vrot.lane.b32.xlu1 %v1357_v9, %s3683_s0  ;;  %1360 = vrot.lane.b32.xlu0 %v1356_v35, %s3683_s0 }
0x10ab   :  { %1368 = vrot.lane.b32.xlu1 %v4425_v10, %s3689_s17 }
0x1119   :  { %v1363_v60 = vpop.permute.xlu1 %1362  ;;  %v1361_v61 = vpop.permute.xlu0 %1360 }
0x111d   :  { %v1369_v36 = vpop.permute.xlu1 %1368 }
0x111e   :  { %3267 = vpush %v1369_v36 }
0x114f   :  { %s3268_s20 = spop %3267 }
0x1150   :  { %v1372_v39 = vstv %s3268_s20 }
0x1151   :  { %v1373_v24 = vmul.f32 %v4095_v29, %v1372_v39  ;;  %v1374_v25 = vmul.f32 %v4097_v26, %v1372_v39 }
0x1153   :  { %1379 = vrot.lane.b32.xlu1 %v1374_v25, %s3689_s17  ;;  %1377 = vrot.lane.b32.xlu0 %v1373_v24, %s3689_s17 }
0x1157   :  { %1385 = vrot.lane.b32.xlu0 %v4425_v10, %s3690_s24 }
0x11c5   :  { %v1378_v19 = vpop.permute.xlu0 %1377  ;;  %v1380_v42 = vpop.permute.xlu1 %1379 }
0x11c9   :  { %v1386_v43 = vpop.permute.xlu0 %1385 }
0x11ca   :  { %3269 = vpush %v1386_v43 }
0x11fb   :  { %s3270_s21 = spop %3269 }
0x11fc   :  { %v1389_v27 = vstv %s3270_s21 }
0x11fd   :  { %v1390_v38 = vmul.f32 %v4095_v29, %v1389_v27  ;;  %v1391_v40 = vmul.f32 %v4097_v26, %v1389_v27 }
0x11ff   :  { %1396 = vrot.lane.b32.xlu0 %v1391_v40, %s3690_s24  ;;  %1394 = vrot.lane.b32.xlu1 %v1390_v38, %s3690_s24 }
0x1203   :  { %1402 = vrot.lane.b32.xlu1 %v4425_v10, %s3691_s26  ;;  %v1347_v10 = vstv %s4439_s8 }
0x1204   :  { %v1348_v2 = vmul.f32 %v4095_v29, %v1347_v10  ;;  %v1349_v1 = vmul.f32 %v4097_v26, %v1347_v10 }
0x1206   :  { %v1367_v54 = vadd.f32 %v1363_v60, %v1349_v1  ;;  %v1366_v3 = vadd.f32 %v1361_v61, %v1348_v2  ;;  %v1581_v2 = vld [vmem:[%s5170_s4 + $0x7] sm:$0x1] }
0x1208   :  { %v1384_v57 = vadd.f32 %v1380_v42, %v1367_v54  ;;  %v1383_v7 = vadd.f32 %v1378_v19, %v1366_v3 }
0x1271   :  { %v1395_v11 = vpop.permute.xlu1 %1394  ;;  %v1397_v44 = vpop.permute.xlu0 %1396 }
0x1272   :  { %v1401_v15 = vadd.f32 %v1397_v44, %v1384_v57  ;;  %v1400_v6 = vadd.f32 %v1395_v11, %v1383_v7  ;;  %v1833_v44 = vld [vmem:[%s5170_s4 + $0x9] sm:$0x1]  ;;  %v4527_v57 = vld [vmem:[%s5170_s4 + $0xa] sm:$0x1]  ;;  %v4538_v7 = vld [vmem:[%s5170_s4 + $0xb] sm:$0x1] }
0x1275   :  { %v1403_v4 = vpop.permute.xlu1 %1402 }
0x1276   :  { %3271 = vpush %v1403_v4 }
0x1277   :  { %3273 = vpush %v4464_v41 }
0x12a7   :  { %s3272_s22 = spop %3271 }
0x12a8   :  { %v1406_v55 = vstv %s3272_s22  ;;  %s4478_s25 = spop %3273 }
0x12a9   :  { %v1407_v12 = vmul.f32 %v4095_v29, %v1406_v55  ;;  %v1408_v50 = vmul.f32 %v4097_v26, %v1406_v55 }
0x12ab   :  { %1413 = vrot.lane.b32.xlu1 %v1408_v50, %s3691_s26  ;;  %1411 = vrot.lane.b32.xlu0 %v1407_v12, %s3691_s26 }
0x131d   :  { %v1414_v59 = vpop.permute.xlu1 %1413  ;;  %v1412_v5 = vpop.permute.xlu0 %1411 }
0x131e   :  { %v1418_v37 = vadd.f32 %v1414_v59, %v1401_v15  ;;  %v1417_v8 = vadd.f32 %v1412_v5, %v1400_v6  ;;  %v4547_v15 = vld [vmem:[%s5170_s4 + $0xc] sm:$0x1]  ;;  %v4556_v6 = vld [vmem:[%s5170_s4 + $0xd] sm:$0x1]  ;;  %v4565_v59 = vld [vmem:[%s5170_s4 + $0xe] sm:$0x1] }
0x131f   :  { %v4574_v5 = vld [vmem:[%s5170_s4 + $0xf] sm:$0x1] }
0x1320   :  { %v1422_v16 = vsel %vm723_vm2, %v1418_v37, 0.0  ;;  %v1419_v21 = vsel %vm723_vm2, %v1417_v8, 0.0  ;;  %v1427_v52 = vmul.f32 %v1417_v8, %v1417_v8  ;;  %v1428_v56 = vmul.f32 %v1418_v37, %v1418_v37 }
0x1321   :  { %1423 = vadd.xlane.f32.xlu1 %v1422_v16  ;;  %1420 = vadd.xlane.f32.xlu0 %v1419_v21  ;;  %v1465_v37 = vstv %s4478_s25 }
0x1322   :  { %v1429_v62 = vsel %vm723_vm2, %v1427_v52, 0.0  ;;  %v1432_v47 = vsel %vm723_vm2, %v1428_v56, 0.0  ;;  %v1466_v8 = vmul.f32 %v4095_v29, %v1465_v37 }
0x1325   :  { %1430 = vadd.xlane.f32.xlu0 %v1429_v62 }
0x1329   :  { %1433 = vadd.xlane.f32.xlu0 %v1432_v47 }
0x1332   :  { %1469 = vrot.lane.b32.xlu1 %v4464_v41, %s3683_s0 }
0x13aa   :  { %v1424_v18 = vpop.xlane.xlu1 %1423  ;;  %v1421_v49 = vpop.xlane.xlu0 %1420 }
0x13ab   :  { %v1426_v0 = vmul.f32 0.0625, %v1424_v18  ;;  %v1425_v28 = vmul.f32 0.0625, %v1421_v49 }
0x13ad   :  { %1445 = vst.msk [vmem:[#allocation2 + $0x8] sm:$0xff] %vm1443_vm13, %v1426_v0  ;;  %1444 = vst.msk [vmem:[#allocation2] sm:$0xff] %vm1443_vm13, %v1425_v28  ;;  %v1437_v31 = vmul.f32 %v1425_v28, %v1425_v28  ;;  %v1438_v13 = vmul.f32 %v1426_v0, %v1426_v0  ;;  %v1467_v28 = vmul.f32 %v4097_v26, %v1465_v37  ;;  %vm1813_vm13 = vcmask 203968  }
0x13ae   :  { %v1470_v45 = vpop.permute.xlu1 %1469  ;;  %v1431_v20 = vpop.xlane.xlu0 %1430 }
0x13af   :  { %v1435_v48 = vmul.f32 0.0625, %v1431_v20  ;;  %3275 = vpush %v1470_v45 }
0x13b1   :  { %v1439_v30 = vsub.f32 %v1435_v48, %v1437_v31 }
0x13b2   :  { %v1434_v23 = vpop.xlane.xlu0 %1433 }
0x13b3   :  { %v1441_v14 = vmax.f32 %v1439_v30, 0.0  ;;  %v1436_v51 = vmul.f32 0.0625, %v1434_v23 }
0x13b5   :  { %3497 = vrsqrt.f32 %v1441_v14  ;;  %v1440_v53 = vsub.f32 %v1436_v51, %v1438_v13  ;;  %vm1448_vm14 = vcmp.eq.f32.partialorder %v1441_v14, inf  ;;  %v1451_v46 = vand.u32 2147483648, %v1441_v14 }
0x13b6   :  { %vm1450_vm5 = vcmp.eq.f32.partialorder %v1441_v14, 0.0 }
0x13b7   :  { %v1442_v32 = vmax.f32 %v1440_v53, 0.0 }
0x13b9   :  { %3499 = vrsqrt.f32 %v1442_v32  ;;  %vm1455_vm7 = vcmp.eq.f32.partialorder %v1442_v32, inf  ;;  %v1458_v35 = vand.u32 2147483648, %v1442_v32  ;;  %vm1457_vm9 = vcmp.eq.f32.partialorder %v1442_v32, 0.0 }
0x13c2   :  { %v3498_v17 = vpop.eup %3497 }
0x13c3   :  { %v1447_v33 = vmul.f32 %v3498_v17, %v1441_v14 }
0x13c5   :  { %v1449_v58 = vsel %vm1448_vm14, %v1441_v14, %v1447_v33 }
0x13c6   :  { %v3500_v34 = vpop.eup %3499  ;;  %v1452_v63 = vsel %vm1450_vm5, %v1451_v46, %v1449_v58  ;;  %vm1830_vm5 = vcmask 466368  }
0x13c7   :  { %v1454_v22 = vmul.f32 %v3500_v34, %v1442_v32  ;;  %1461 = vst.msk [vmem:[#allocation2] sm:$0xff] %vm1460_vm1, %v1452_v63 }
0x13c9   :  { %v1456_v9 = vsel %vm1455_vm7, %v1442_v32, %v1454_v22 }
0x13ca   :  { %v1459_v60 = vsel %vm1457_vm9, %v1458_v35, %v1456_v9  ;;  %vm1947_vm9 = vcmask 212168  }
0x13cb   :  { %1462 = vst.msk [vmem:[#allocation2 + $0x8] sm:$0xff] %vm1460_vm1, %v1459_v60 }
0x13e0   :  { %s3276_s27 = spop %3275 }
0x13e1   :  { %v1473_v36 = vstv %s3276_s27 }
0x13e2   :  { %v1474_v39 = vmul.f32 %v4095_v29, %v1473_v36  ;;  %v1475_v24 = vmul.f32 %v4097_v26, %v1473_v36 }
0x13e4   :  { %1480 = vrot.lane.b32.xlu1 %v1475_v24, %s3683_s0  ;;  %1478 = vrot.lane.b32.xlu0 %v1474_v39, %s3683_s0 }
0x13e8   :  { %1486 = vrot.lane.b32.xlu1 %v4464_v41, %s3689_s17 }
0x1456   :  { %v4486_v25 = vpop.permute.xlu1 %1480  ;;  %v1479_v38 = vpop.permute.xlu0 %1478 }
0x1457   :  { %v1484_v16 = vadd.f32 %v1479_v38, %v1466_v8  ;;  %v1485_v45 = vadd.f32 %v4486_v25, %v1467_v28 }
0x145a   :  { %v1487_v61 = vpop.permute.xlu1 %1486 }
0x145b   :  { %3277 = vpush %v1487_v61 }
0x148c   :  { %s3278_s28 = spop %3277 }
0x148d   :  { %v1490_v19 = vstv %s3278_s28 }
0x148e   :  { %v1491_v43 = vmul.f32 %v4095_v29, %v1490_v19  ;;  %v1492_v27 = vmul.f32 %v4097_v26, %v1490_v19 }
0x1490   :  { %1497 = vrot.lane.b32.xlu1 %v1492_v27, %s3689_s17  ;;  %1495 = vrot.lane.b32.xlu0 %v1491_v43, %s3689_s17 }
0x1494   :  { %1503 = vrot.lane.b32.xlu0 %v4464_v41, %s3690_s24 }
0x1502   :  { %v1496_v40 = vpop.permute.xlu0 %1495  ;;  %v1498_v12 = vpop.permute.xlu1 %1497 }
0x1503   :  { %v1501_v52 = vadd.f32 %v1496_v40, %v1484_v16  ;;  %v1502_v31 = vadd.f32 %v1498_v12, %v1485_v45 }
0x1506   :  { %v1504_v42 = vpop.permute.xlu0 %1503 }
0x1507   :  { %3279 = vpush %v1504_v42 }
0x1538   :  { %s3280_s3 = spop %3279 }
0x1539   :  { %v1507_v11 = vstv %s3280_s3 }
0x153a   :  { %v1508_v4 = vmul.f32 %v4095_v29, %v1507_v11  ;;  %v1509_v55 = vmul.f32 %v4097_v26, %v1507_v11 }
0x153c   :  { %1514 = vrot.lane.b32.xlu0 %v1509_v55, %s3690_s24  ;;  %1512 = vrot.lane.b32.xlu1 %v1508_v4, %s3690_s24 }
0x1540   :  { %1520 = vrot.lane.b32.xlu1 %v4464_v41, %s3691_s26  ;;  %v1699_v41 = vld [vmem:[%s5170_s4 + $0x8] sm:$0x1] }
0x15ae   :  { %v1513_v50 = vpop.permute.xlu1 %1512  ;;  %v1515_v21 = vpop.permute.xlu0 %1514 }
0x15af   :  { %v1518_v62 = vadd.f32 %v1513_v50, %v1501_v52  ;;  %v1519_v48 = vadd.f32 %v1515_v21, %v1502_v31 }
0x15b2   :  { %v1521_v10 = vpop.permute.xlu1 %1520 }
0x15b3   :  { %3281 = vpush %v1521_v10 }
0x15b4   :  { %3283 = vpush %v1581_v2 }
0x15e4   :  { %s3282_s2 = spop %3281 }
0x15e5   :  { %v1524_v1 = vstv %s3282_s2  ;;  %s4606_s4 = spop %3283 }
0x15e6   :  { %v1525_v54 = vmul.f32 %v4095_v29, %v1524_v1  ;;  %v1526_v3 = vmul.f32 %v4097_v26, %v1524_v1 }
0x15e8   :  { %1531 = vrot.lane.b32.xlu1 %v1526_v3, %s3691_s26  ;;  %1529 = vrot.lane.b32.xlu0 %v1525_v54, %s3691_s26 }
0x15ec   :  { %1587 = vrot.lane.b32.xlu1 %v1581_v2, %s3683_s0 }
0x15f0   :  { %1604 = vrot.lane.b32.xlu1 %v1581_v2, %s3689_s17 }
0x15f4   :  { %1621 = vrot.lane.b32.xlu1 %v1581_v2, %s3690_s24 }
0x15f8   :  { %1638 = vrot.lane.b32.xlu1 %v1581_v2, %s3691_s26 }
0x15fc   :  { %1705 = vrot.lane.b32.xlu1 %v1699_v41, %s3683_s0 }
0x1600   :  { %1722 = vrot.lane.b32.xlu1 %v1699_v41, %s3689_s17 }
0x1604   :  { %1739 = vrot.lane.b32.xlu1 %v1699_v41, %s3690_s24 }
0x1608   :  { %1756 = vrot.lane.b32.xlu1 %v1699_v41, %s3691_s26 }
0x160c   :  { %1856 = vrot.lane.b32.xlu1 %v1833_v44, %s3689_s17 }
0x1610   :  { %1873 = vrot.lane.b32.xlu1 %v1833_v44, %s3690_s24 }
0x1614   :  { %1890 = vrot.lane.b32.xlu1 %v1833_v44, %s3691_s26 }
0x1618   :  { %1973 = vrot.lane.b32.xlu1 %v4527_v57, %s3683_s0 }
0x161c   :  { %1990 = vrot.lane.b32.xlu1 %v4527_v57, %s3689_s17 }
0x1620   :  { %2007 = vrot.lane.b32.xlu1 %v4527_v57, %s3690_s24 }
0x1624   :  { %2107 = vrot.lane.b32.xlu1 %v4538_v7, %s3683_s0 }
0x1628   :  { %2141 = vrot.lane.b32.xlu1 %v4538_v7, %s3690_s24 }
0x162c   :  { %2241 = vrot.lane.b32.xlu1 %v4547_v15, %s3683_s0 }
0x1630   :  { %2275 = vrot.lane.b32.xlu1 %v4547_v15, %s3690_s24 }
0x1634   :  { %2375 = vrot.lane.b32.xlu1 %v4556_v6, %s3683_s0 }
0x1638   :  { %2409 = vrot.lane.b32.xlu1 %v4556_v6, %s3690_s24 }
0x163c   :  { %2509 = vrot.lane.b32.xlu1 %v4565_v59, %s3683_s0 }
0x1640   :  { %2543 = vrot.lane.b32.xlu1 %v4565_v59, %s3690_s24 }
0x1644   :  { %2643 = vrot.lane.b32.xlu1 %v4574_v5, %s3683_s0 }
0x1648   :  { %2677 = vrot.lane.b32.xlu1 %v4574_v5, %s3690_s24 }
0x165a   :  { %v1532_v56 = vpop.permute.xlu1 %1531  ;;  %v1530_v47 = vpop.permute.xlu0 %1529 }
0x165b   :  { %v4582_v18 = vadd.f32 %v1530_v47, %v1518_v62  ;;  %v1536_v23 = vadd.f32 %v1532_v56, %v1519_v48 }
0x165d   :  { %v1537_v49 = vsel %vm723_vm2, %v4582_v18, 0.0  ;;  %v1540_v14 = vsel %vm723_vm2, %v1536_v23, 0.0  ;;  %v1545_v43 = vmul.f32 %v4582_v18, %v4582_v18  ;;  %v1546_v38 = vmul.f32 %v1536_v23, %v1536_v23 }
0x165e   :  { %v1588_v0 = vpop.permute.xlu1 %1587  ;;  %1538 = vadd.xlane.f32.xlu0 %v1537_v49 }
0x165f   :  { %3285 = vpush %v1588_v0  ;;  %v1547_v27 = vsel %vm723_vm2, %v1545_v43, 0.0  ;;  %v1550_v42 = vsel %vm723_vm2, %v1546_v38, 0.0 }
0x1662   :  { %v1605_v20 = vpop.permute.xlu1 %1604 }
0x1663   :  { %3287 = vpush %v1605_v20 }
0x1666   :  { %v1622_v30 = vpop.permute.xlu1 %1621 }
0x1667   :  { %3289 = vpush %v1622_v30 }
0x166a   :  { %v1639_v13 = vpop.permute.xlu1 %1638 }
0x166b   :  { %3291 = vpush %v1639_v13 }
0x166c   :  { %1541 = vadd.xlane.f32.xlu1 %v1540_v14  ;;  %3293 = vpush %v1699_v41 }
0x166e   :  { %v1706_v51 = vpop.permute.xlu1 %1705 }
0x166f   :  { %3295 = vpush %v1706_v51 }
0x1672   :  { %v1723_v53 = vpop.permute.xlu1 %1722 }
0x1673   :  { %3297 = vpush %v1723_v53 }
0x1674   :  { %1839 = vrot.lane.b32.xlu0 %v1833_v44, %s3683_s0 }
0x1676   :  { %v1740_v32 = vpop.permute.xlu1 %1739 }
0x1677   :  { %3299 = vpush %v1740_v32 }
0x1678   :  { %2024 = vrot.lane.b32.xlu0 %v4527_v57, %s3691_s26 }
0x167a   :  { %v1757_v17 = vpop.permute.xlu1 %1756 }
0x167b   :  { %3301 = vpush %v1757_v17 }
0x167c   :  { %2124 = vrot.lane.b32.xlu0 %v4538_v7, %s3689_s17  ;;  %3303 = vpush %v1833_v44 }
0x167e   :  { %v1857_v33 = vpop.permute.xlu1 %1856 }
0x1680   :  { %2158 = vrot.lane.b32.xlu0 %v4538_v7, %s3691_s26 }
0x1682   :  { %v1874_v46 = vpop.permute.xlu1 %1873 }
0x1684   :  { %2258 = vrot.lane.b32.xlu0 %v4547_v15, %s3689_s17 }
0x1686   :  { %v1891_v34 = vpop.permute.xlu1 %1890 }
0x1688   :  { %2292 = vrot.lane.b32.xlu0 %v4547_v15, %s3691_s26 }
0x168a   :  { %v1974_v9 = vpop.permute.xlu1 %1973 }
0x168c   :  { %2392 = vrot.lane.b32.xlu0 %v4556_v6, %s3689_s17 }
0x168e   :  { %v1991_v24 = vpop.permute.xlu1 %1990 }
0x1690   :  { %2426 = vrot.lane.b32.xlu0 %v4556_v6, %s3691_s26  ;;  %s4608_s25 = spop %3285 }
0x1691   :  { %v1591_v12 = vstv %s4608_s25 }
0x1692   :  { %v2008_v61 = vpop.permute.xlu1 %2007  ;;  %v1592_v50 = vmul.f32 %v4095_v29, %v1591_v12 }
0x1694   :  { %2526 = vrot.lane.b32.xlu0 %v4565_v59, %s3689_s17  ;;  %s4612_s29 = spop %3287 }
0x1696   :  { %v2108_v19 = vpop.permute.xlu1 %2107 }
0x1698   :  { %2560 = vrot.lane.b32.xlu0 %v4565_v59, %s3691_s26  ;;  %s4614_s30 = spop %3289 }
0x169a   :  { %v2142_v40 = vpop.permute.xlu1 %2141 }
0x169c   :  { %2660 = vrot.lane.b32.xlu0 %v4574_v5, %s3689_s17  ;;  %s4618_s2 = spop %3291 }
0x169d   :  { %s4620_s11 = spop %3293 }
0x169e   :  { %v2242_v11 = vpop.permute.xlu1 %2241 }
0x16a0   :  { %s3296_s12 = spop %3295  ;;  %2694 = vrot.lane.b32.xlu0 %v4574_v5, %s3691_s26 }
0x16a1   :  { %v1709_v58 = vstv %s3296_s12 }
0x16a2   :  { %v1710_v63 = vmul.f32 %v4095_v29, %v1709_v58  ;;  %v1711_v22 = vmul.f32 %v4097_v26, %v1709_v58  ;;  %v2276_v4 = vpop.permute.xlu1 %2275 }
0x16a4   :  { %1714 = vrot.lane.b32.xlu1 %v1710_v63, %s3683_s0  ;;  %s3298_s6 = spop %3297 }
0x16a5   :  { %v1726_v35 = vstv %s3298_s6 }
0x16a6   :  { %v1727_v60 = vmul.f32 %v4095_v29, %v1726_v35  ;;  %v1728_v36 = vmul.f32 %v4097_v26, %v1726_v35  ;;  %v2376_v55 = vpop.permute.xlu1 %2375 }
0x16a8   :  { %1716 = vrot.lane.b32.xlu1 %v1711_v22, %s3683_s0  ;;  %s4629_s13 = spop %3299 }
0x16a9   :  { %v1743_v39 = vstv %s4629_s13 }
0x16aa   :  { %v1744_v25 = vmul.f32 %v4095_v29, %v1743_v39  ;;  %v2410_v10 = vpop.permute.xlu1 %2409  ;;  %v1745_v23 = vmul.f32 %v4097_v26, %v1743_v39 }
0x16ac   :  { %1731 = vrot.lane.b32.xlu1 %v1727_v60, %s3689_s17  ;;  %s4662_s14 = spop %3301 }
0x16ad   :  { %s4664_s15 = spop %3303  ;;  %v1760_v30 = vstv %s4662_s14 }
0x16ae   :  { %v2510_v2 = vpop.permute.xlu1 %2509  ;;  %v1761_v14 = vmul.f32 %v4095_v29, %v1760_v30 }
0x16b0   :  { %1733 = vrot.lane.b32.xlu1 %v1728_v36, %s3689_s17 }
0x16b2   :  { %v2544_v1 = vpop.permute.xlu1 %2543 }
0x16b4   :  { %1748 = vrot.lane.b32.xlu1 %v1744_v25, %s3690_s24 }
0x16b6   :  { %v2644_v41 = vpop.permute.xlu1 %2643 }
0x16ba   :  { %v2678_v37 = vpop.permute.xlu1 %2677 }
0x16bf   :  { %1548 = vadd.xlane.f32.xlu0 %v1547_v27 }
0x16c3   :  { %1551 = vadd.xlane.f32.xlu0 %v1550_v42 }
0x16d9   :  { %1596 = vrot.lane.b32.xlu0 %v1592_v50, %s3683_s0 }
0x16e7   :  { %v1539_v54 = vpop.xlane.xlu0 %1538 }
0x16e8   :  { %v4648_v3 = vmul.f32 0.0625, %v1539_v54 }
0x16ea   :  { %1562 = vst.msk [vmem:[#allocation2] sm:$0xff] %vm1561_vm11, %v4648_v3  ;;  %v1555_v38 = vmul.f32 %v4648_v3, %v4648_v3 }
0x16eb   :  { %v1840_v44 = vpop.permute.xlu0 %1839 }
0x16ec   :  { %3305 = vpush %v1840_v44 }
0x16ed   :  { %3307 = vpush %v1857_v33 }
0x16ee   :  { %3309 = vpush %v1874_v46  ;;  %v1762_v46 = vmul.f32 %v4097_v26, %v1760_v30 }
0x16ef   :  { %3311 = vpush %v1891_v34  ;;  %v2025_v8 = vpop.permute.xlu0 %2024 }
0x16f0   :  { %3313 = vpush %v4527_v57 }
0x16f1   :  { %3315 = vpush %v1974_v9 }
0x16f2   :  { %3317 = vpush %v1991_v24 }
0x16f3   :  { %3319 = vpush %v2008_v61  ;;  %v2125_v16 = vpop.permute.xlu0 %2124 }
0x16f4   :  { %3321 = vpush %v2025_v8 }
0x16f5   :  { %v1542_v21 = vpop.xlane.xlu1 %1541  ;;  %3323 = vpush %v4538_v7 }
0x16f6   :  { %v4654_v52 = vmul.f32 0.0625, %v1542_v21  ;;  %3325 = vpush %v2108_v19 }
0x16f7   :  { %3327 = vpush %v2125_v16  ;;  %v2159_v62 = vpop.permute.xlu0 %2158 }
0x16f8   :  { %1563 = vst.msk [vmem:[#allocation2 + $0x8] sm:$0xff] %vm1561_vm11, %v4654_v52 }
0x16f9   :  { %3329 = vpush %v2142_v40 }
0x16fa   :  { %3331 = vpush %v2159_v62 }
0x16fb   :  { %3333 = vpush %v4547_v15  ;;  %v2259_v57 = vpop.permute.xlu0 %2258 }
0x16fc   :  { %3335 = vpush %v2242_v11 }
0x16fd   :  { %3337 = vpush %v2259_v57 }
0x16fe   :  { %3339 = vpush %v2276_v4 }
0x16ff   :  { %v2293_v56 = vpop.permute.xlu0 %2292 }
0x1700   :  { %3341 = vpush %v2293_v56 }
0x1701   :  { %3343 = vpush %v4556_v6 }
0x1702   :  { %3345 = vpush %v2376_v55 }
0x1703   :  { %v2393_v7 = vpop.permute.xlu0 %2392 }
0x1704   :  { %3347 = vpush %v2393_v7 }
0x1705   :  { %3349 = vpush %v2410_v10 }
0x1707   :  { %v2427_v47 = vpop.permute.xlu0 %2426 }
0x1708   :  { %3351 = vpush %v2427_v47 }
0x1709   :  { %3353 = vpush %v4565_v59 }
0x170a   :  { %3355 = vpush %v2510_v2  ;;  %v1556_v2 = vmul.f32 %v4654_v52, %v4654_v52 }
0x170b   :  { %v2527_v18 = vpop.permute.xlu0 %2526 }
0x170c   :  { %3357 = vpush %v2527_v18 }
0x170d   :  { %3359 = vpush %v2544_v1 }
0x170f   :  { %v2561_v15 = vpop.permute.xlu0 %2560 }
0x1710   :  { %3361 = vpush %v2561_v15 }
0x1711   :  { %3363 = vpush %v4574_v5 }
0x1712   :  { %3365 = vpush %v2644_v41 }
0x1713   :  { %v2661_v49 = vpop.permute.xlu0 %2660 }
0x1714   :  { %3367 = vpush %v2661_v49 }
0x1715   :  { %3369 = vpush %v2678_v37 }
0x1717   :  { %v2695_v6 = vpop.permute.xlu0 %2694 }
0x1718   :  { %3371 = vpush %v2695_v6 }
0x171d   :  { %s3306_s8 = spop %3305 }
0x171e   :  { %v1843_v59 = vstv %s3306_s8  ;;  %s3308_s16 = spop %3307 }
0x171f   :  { %v1844_v0 = vmul.f32 %v4095_v29, %v1843_v59  ;;  %s4667_s20 = spop %3309  ;;  %v1845_v5 = vmul.f32 %v4097_v26, %v1843_v59  ;;  %v1860_v45 = vstv %s3308_s16 }
0x1720   :  { %s4669_s21 = spop %3311  ;;  %v1861_v31 = vmul.f32 %v4095_v29, %v1860_v45  ;;  %v1862_v48 = vmul.f32 %v4097_v26, %v1860_v45  ;;  %v1877_v32 = vstv %s4667_s20 }
0x1721   :  { %s4671_s22 = spop %3313  ;;  %1848 = vrot.lane.b32.xlu0 %v1844_v0, %s3683_s0  ;;  %v1878_v33 = vmul.f32 %v4095_v29, %v1877_v32  ;;  %v1894_v63 = vstv %s4669_s21  ;;  %v1879_v22 = vmul.f32 %v4097_v26, %v1877_v32 }
0x1722   :  { %s3316_s1 = spop %3315  ;;  %v1895_v9 = vmul.f32 %v4095_v29, %v1894_v63  ;;  %v1896_v61 = vmul.f32 %v4097_v26, %v1894_v63 }
0x1723   :  { %v1977_v28 = vstv %s3316_s1  ;;  %s3318_s23 = spop %3317 }
0x1724   :  { %v1978_v20 = vmul.f32 %v4095_v29, %v1977_v28  ;;  %s4683_s27 = spop %3319  ;;  %v1994_v13 = vstv %s3318_s23  ;;  %v1979_v53 = vmul.f32 %v4097_v26, %v1977_v28 }
0x1725   :  { %1850 = vrot.lane.b32.xlu0 %v1845_v5, %s3683_s0  ;;  %s4688_s28 = spop %3321  ;;  %v1995_v51 = vmul.f32 %v4095_v29, %v1994_v13  ;;  %v1996_v34 = vmul.f32 %v4097_v26, %v1994_v13  ;;  %v2011_v39 = vstv %s4683_s27 }
0x1726   :  { %1982 = vrot.lane.b32.xlu1 %v1978_v20, %s3683_s0  ;;  %s4692_s3 = spop %3323  ;;  %v2012_v25 = vmul.f32 %v4095_v29, %v2011_v39  ;;  %v2028_v40 = vstv %s4688_s28  ;;  %v2013_v11 = vmul.f32 %v4097_v26, %v2011_v39 }
0x1727   :  { %s3326_s12 = spop %3325  ;;  %v2029_v50 = vmul.f32 %v4095_v29, %v2028_v40  ;;  %v2030_v52 = vmul.f32 %v4097_v26, %v2028_v40 }
0x1728   :  { %v2111_v17 = vstv %s3326_s12  ;;  %s3328_s6 = spop %3327 }
0x1729   :  { %1865 = vrot.lane.b32.xlu0 %v1861_v31, %s3689_s17  ;;  %v2112_v58 = vmul.f32 %v4095_v29, %v2111_v17  ;;  %v2128_v35 = vstv %s3328_s6  ;;  %v2113_v36 = vmul.f32 %v4097_v26, %v2111_v17 }
0x172a   :  { %1867 = vrot.lane.b32.xlu1 %v1862_v48, %s3689_s17  ;;  %s4709_s13 = spop %3329  ;;  %v2129_v60 = vmul.f32 %v4095_v29, %v2128_v35  ;;  %v2130_v43 = vmul.f32 %v4097_v26, %v2128_v35 }
0x172b   :  { %s4712_s14 = spop %3331  ;;  %v2145_v37 = vstv %s4709_s13 }
0x172c   :  { %s4716_s8 = spop %3333  ;;  %v2146_v21 = vmul.f32 %v4095_v29, %v2145_v37  ;;  %v2162_v56 = vstv %s4712_s14  ;;  %v2147_v7 = vmul.f32 %v4097_v26, %v2145_v37 }
0x172d   :  { %1750 = vrot.lane.b32.xlu0 %v1745_v23, %s3690_s24  ;;  %s4721_s16 = spop %3335  ;;  %v2163_v15 = vmul.f32 %v4095_v29, %v2162_v56 }
0x172e   :  { %1765 = vrot.lane.b32.xlu1 %v1761_v14, %s3691_s26  ;;  %v2245_v24 = vstv %s4721_s16  ;;  %s4733_s20 = spop %3337  ;;  %v2164_v14 = vmul.f32 %v4097_v26, %v2162_v56  ;;  %v1608_v56 = vstv %s4612_s29 }
0x172f   :  { %v2246_v19 = vmul.f32 %v4095_v29, %v2245_v24  ;;  %s4740_s21 = spop %3339  ;;  %v2262_v55 = vstv %s4733_s20  ;;  %v2247_v41 = vmul.f32 %v4097_v26, %v2245_v24 }
0x1730   :  { %v2263_v3 = vmul.f32 %v4095_v29, %v2262_v55  ;;  %v2264_v57 = vmul.f32 %v4097_v26, %v2262_v55  ;;  %v2279_v45 = vstv %s4740_s21 }
0x1731   :  { %1984 = vrot.lane.b32.xlu0 %v1979_v53, %s3683_s0  ;;  %s4744_s1 = spop %3341  ;;  %v2280_v23 = vmul.f32 %v4095_v29, %v2279_v45 }
0x1732   :  { %1999 = vrot.lane.b32.xlu1 %v1995_v51, %s3689_s17  ;;  %s4750_s23 = spop %3343  ;;  %v2296_v17 = vstv %s4744_s1 }
0x1733   :  { %s4755_s27 = spop %3345 }
0x1734   :  { %v2379_v16 = vstv %s4755_s27 }
0x1735   :  { %1882 = vrot.lane.b32.xlu0 %v1878_v33, %s3690_s24  ;;  %v2380_v62 = vmul.f32 %v4095_v29, %v2379_v16  ;;  %s4767_s28 = spop %3347  ;;  %v2381_v0 = vmul.f32 %v4097_v26, %v2379_v16  ;;  %v2281_v33 = vmul.f32 %v4097_v26, %v2279_v45 }
0x1736   :  { %1767 = vrot.lane.b32.xlu1 %v1762_v46, %s3691_s26  ;;  %s4772_s12 = spop %3349  ;;  %v2396_v47 = vstv %s4767_s28 }
0x1737   :  { %v2397_v6 = vmul.f32 %v4095_v29, %v2396_v47  ;;  %v2398_v32 = vmul.f32 %v4097_v26, %v2396_v47 }
0x1739   :  { %2116 = vrot.lane.b32.xlu0 %v2112_v58, %s3683_s0  ;;  %s4776_s6 = spop %3351  ;;  %v2297_v58 = vmul.f32 %v4095_v29, %v2296_v17 }
0x173a   :  { %2001 = vrot.lane.b32.xlu1 %v1996_v34, %s3689_s17  ;;  %s4780_s13 = spop %3353  ;;  %v2430_v24 = vstv %s4776_s6 }
0x173b   :  { %s4785_s14 = spop %3355 }
0x173c   :  { %v2513_v48 = vstv %s4785_s14 }
0x173d   :  { %1884 = vrot.lane.b32.xlu0 %v1879_v22, %s3690_s24  ;;  %v2514_v53 = vmul.f32 %v4095_v29, %v2513_v48  ;;  %s3358_s16 = spop %3357  ;;  %v2515_v63 = vmul.f32 %v4097_v26, %v2513_v48  ;;  %v2413_v22 = vstv %s4772_s12 }
0x173e   :  { %1899 = vrot.lane.b32.xlu1 %v1895_v9, %s3691_s26  ;;  %s4802_s20 = spop %3359  ;;  %v2530_v46 = vstv %s3358_s16  ;;  %v2414_v9 = vmul.f32 %v4095_v29, %v2413_v22 }
0x173f   :  { %v2531_v34 = vmul.f32 %v4095_v29, %v2530_v46  ;;  %v2532_v39 = vmul.f32 %v4097_v26, %v2530_v46  ;;  %v2547_v40 = vstv %s4802_s20 }
0x1741   :  { %2118 = vrot.lane.b32.xlu0 %v2113_v36, %s3683_s0  ;;  %s4805_s21 = spop %3361 }
0x1742   :  { %2133 = vrot.lane.b32.xlu1 %v2129_v60, %s3689_s17  ;;  %s4809_s27 = spop %3363  ;;  %v2298_v60 = vmul.f32 %v4097_v26, %v2296_v17  ;;  %v2564_v55 = vstv %s4805_s21 }
0x1743   :  { %s3366_s1 = spop %3365 }
0x1744   :  { %v2647_v35 = vstv %s3366_s1 }
0x1745   :  { %2016 = vrot.lane.b32.xlu0 %v2012_v25, %s3690_s24  ;;  %v2648_v36 = vmul.f32 %v4095_v29, %v2647_v35  ;;  %s3368_s28 = spop %3367  ;;  %v2415_v25 = vmul.f32 %v4097_v26, %v2413_v22 }
0x1746   :  { %1901 = vrot.lane.b32.xlu1 %v1896_v61, %s3691_s26  ;;  %v2664_v61 = vstv %s3368_s28  ;;  %s3370_s12 = spop %3369 }
0x1748   :  { %v1549_v27 = vpop.xlane.xlu0 %1548 }
0x1749   :  { %v1553_v42 = vmul.f32 0.0625, %v1549_v27  ;;  %2250 = vrot.lane.b32.xlu0 %v2246_v19, %s3683_s0  ;;  %v1715_v19 = vpop.permute.xlu1 %1714  ;;  %v2665_v27 = vmul.f32 %v4095_v29, %v2664_v61  ;;  %s3372_s6 = spop %3371 }
0x174a   :  { %2135 = vrot.lane.b32.xlu1 %v2130_v43, %s3689_s17  ;;  %v2431_v43 = vmul.f32 %v4095_v29, %v2430_v24 }
0x174b   :  { %v1557_v4 = vsub.f32 %v1553_v42, %v1555_v38  ;;  %v2649_v38 = vmul.f32 %v4097_v26, %v2647_v35 }
0x174c   :  { %v1552_v10 = vpop.xlane.xlu0 %1551 }
0x174d   :  { %v1559_v1 = vmax.f32 %v1557_v4, 0.0  ;;  %v1554_v54 = vmul.f32 0.0625, %v1552_v10  ;;  %2018 = vrot.lane.b32.xlu0 %v2013_v11, %s3690_s24  ;;  %v1717_v42 = vpop.permute.xlu1 %1716  ;;  %v2548_v11 = vmul.f32 %v4095_v29, %v2547_v40  ;;  %v2549_v4 = vmul.f32 %v4097_v26, %v2547_v40 }
0x174e   :  { %2033 = vrot.lane.b32.xlu1 %v2029_v50, %s3691_s26  ;;  %v2432_v50 = vmul.f32 %v4097_v26, %v2430_v24 }
0x174f   :  { %3501 = vrsqrt.f32 %v1559_v1  ;;  %v1558_v44 = vsub.f32 %v1554_v54, %v1556_v2  ;;  %vm1566_vm12 = vcmp.eq.f32.partialorder %v1559_v1, inf  ;;  %v1569_v59 = vand.u32 2147483648, %v1559_v1 }
0x1750   :  { %vm1568_vm0 = vcmp.eq.f32.partialorder %v1559_v1, 0.0  ;;  %v2565_v2 = vmul.f32 %v4095_v29, %v2564_v55  ;;  %v2566_v54 = vmul.f32 %v4097_v26, %v2564_v55  ;;  %v4848_v37 = vpop.permute.xlu0 %1596 }
0x1751   :  { %v1560_v8 = vmax.f32 %v1558_v44, 0.0  ;;  %2252 = vrot.lane.b32.xlu0 %v2247_v41, %s3683_s0  ;;  %v1732_v10 = vpop.permute.xlu1 %1731  ;;  %v2698_v41 = vstv %s3372_s6 }
0x1752   :  { %2267 = vrot.lane.b32.xlu1 %v2263_v3, %s3689_s17  ;;  %v2681_v3 = vstv %s3370_s12  ;;  %v2699_v16 = vmul.f32 %v4095_v29, %v2698_v41 }
0x1753   :  { %3503 = vrsqrt.f32 %v1560_v8  ;;  %vm1573_vm3 = vcmp.eq.f32.partialorder %v1560_v8, inf  ;;  %v1576_v30 = vand.u32 2147483648, %v1560_v8  ;;  %vm1575_vm4 = vcmp.eq.f32.partialorder %v1560_v8, 0.0 }
0x1755   :  { %2150 = vrot.lane.b32.xlu0 %v2146_v21, %s3690_s24  ;;  %v1734_v44 = vpop.permute.xlu1 %1733  ;;  %v2683_v21 = vmul.f32 %v4097_v26, %v2681_v3 }
0x1756   :  { %2035 = vrot.lane.b32.xlu1 %v2030_v52, %s3691_s26 }
0x1759   :  { %2384 = vrot.lane.b32.xlu0 %v2380_v62, %s3683_s0  ;;  %v1593_v62 = vmul.f32 %v4097_v26, %v1591_v12  ;;  %v1609_v12 = vmul.f32 %v4095_v29, %v1608_v56 }
0x175a   :  { %2269 = vrot.lane.b32.xlu1 %v2264_v57, %s3689_s17  ;;  %v1749_v57 = vpop.permute.xlu1 %1748 }
0x175c   :  { %v3502_v18 = vpop.eup %3501 }
0x175d   :  { %v1565_v49 = vmul.f32 %v3502_v18, %v1559_v1  ;;  %2152 = vrot.lane.b32.xlu0 %v2147_v7, %s3690_s24  ;;  %v2700_v7 = vmul.f32 %v4097_v26, %v2698_v41  ;;  %v1610_v18 = vmul.f32 %v4097_v26, %v1608_v56 }
0x175e   :  { %2167 = vrot.lane.b32.xlu1 %v2163_v15, %s3691_s26 }
0x175f   :  { %v1567_v5 = vsel %vm1566_vm12, %v1559_v1, %v1565_v49  ;;  %v2666_v1 = vmul.f32 %v4097_v26, %v2664_v61  ;;  %v1625_v49 = vstv %s4614_s30  ;;  %s3695_s30 = smov [#allocation11]  }
0x1760   :  { %v3504_v28 = vpop.eup %3503  ;;  %v1570_v20 = vsel %vm1568_vm0, %v1569_v59, %v1567_v5  ;;  %v1627_v59 = vmul.f32 %v4097_v26, %v1625_v49  ;;  %v1626_v45 = vmul.f32 %v4095_v29, %v1625_v49  ;;  %vm1964_vm0 = vcmask 474568  }
0x1761   :  { %v1572_v31 = vmul.f32 %v3504_v28, %v1560_v8  ;;  %2386 = vrot.lane.b32.xlu0 %v2381_v0, %s3683_s0  ;;  %1579 = vst.msk [vmem:[#allocation2] sm:$0xff] %vm1578_vm15, %v1570_v20  ;;  %v1701_v0 = vstv %s4620_s11  ;;  %v1642_v28 = vstv %s4618_s2  ;;  %s2994_s2 = sshll.u32 %s3695_s30, 4  ;;  %s2995_s2 = int_to_ptr.vmem [resolvable:$true] %s2994_s2 }
0x1762   :  { %2401 = vrot.lane.b32.xlu1 %v2397_v6, %s3689_s17  ;;  %v1702_v20 = vmul.f32 %v4095_v29, %v1701_v0  ;;  %v1644_v48 = vmul.f32 %v4097_v26, %v1642_v28  ;;  %p3626_p7 = scmp.lt.s32.totalorder %s2995_s2, %s2995_s2 }
0x1763   :  { %v1574_v13 = vsel %vm1573_vm3, %v1560_v8, %v1572_v31  ;;  %v2682_v8 = vmul.f32 %v4095_v29, %v2681_v3 }
0x1764   :  { %v1577_v51 = vsel %vm1575_vm4, %v1576_v30, %v1574_v13  ;;  %v1720_v13 = vadd.f32 %v1715_v19, %v1702_v20  ;;  %vm2081_vm4 = vcmask 220368  }
0x1765   :  { %2284 = vrot.lane.b32.xlu0 %v2280_v23, %s3690_s24  ;;  %1580 = vst.msk [vmem:[#allocation2 + $0x8] sm:$0xff] %vm1578_vm15, %v1577_v51  ;;  %v1703_v23 = vmul.f32 %v4097_v26, %v1701_v0  ;;  %v2103_v0 = vstv %s4692_s3 }
0x1766   :  { %2169 = vrot.lane.b32.xlu1 %v2164_v14, %s3691_s26  ;;  %v1643_v14 = vmul.f32 %v4095_v29, %v1642_v28  ;;  %v2104_v20 = vmul.f32 %v4095_v29, %v2103_v0 }
0x1767   :  { %v1721_v51 = vadd.f32 %v1717_v42, %v1703_v23 }
0x1769   :  { %2518 = vrot.lane.b32.xlu0 %v2514_v53, %s3683_s0  ;;  %v1737_v53 = vadd.f32 %v1732_v10, %v1720_v13 }
0x176a   :  { %2403 = vrot.lane.b32.xlu1 %v2398_v32, %s3689_s17 }
0x176b   :  { %v1754_v46 = vadd.f32 %v1749_v57, %v1737_v53 }
0x176d   :  { %2286 = vrot.lane.b32.xlu0 %v2281_v33, %s3690_s24  ;;  %v1738_v33 = vadd.f32 %v1734_v44, %v1721_v51 }
0x176e   :  { %2301 = vrot.lane.b32.xlu1 %v2297_v58, %s3691_s26  ;;  %v1835_v58 = vstv %s4664_s15 }
0x176f   :  { %v1837_v19 = vmul.f32 %v4097_v26, %v1835_v58 }
0x1771   :  { %2520 = vrot.lane.b32.xlu0 %v2515_v63, %s3683_s0 }
0x1772   :  { %2535 = vrot.lane.b32.xlu1 %v2531_v34, %s3689_s17 }
0x1775   :  { %2418 = vrot.lane.b32.xlu0 %v2414_v9, %s3690_s24  ;;  %v1836_v9 = vmul.f32 %v4095_v29, %v1835_v58 }
0x1776   :  { %2303 = vrot.lane.b32.xlu1 %v2298_v60, %s3691_s26 }
0x1779   :  { %2652 = vrot.lane.b32.xlu0 %v2648_v36, %s3683_s0 }
0x177a   :  { %2537 = vrot.lane.b32.xlu1 %v2532_v39, %s3689_s17 }
0x177d   :  { %2420 = vrot.lane.b32.xlu0 %v2415_v25, %s3690_s24 }
0x177e   :  { %2435 = vrot.lane.b32.xlu1 %v2431_v43, %s3691_s26 }
0x1781   :  { %2654 = vrot.lane.b32.xlu0 %v2649_v38, %s3683_s0 }
0x1782   :  { %2669 = vrot.lane.b32.xlu1 %v2665_v27, %s3689_s17 }
0x1785   :  { %2552 = vrot.lane.b32.xlu0 %v2548_v11, %s3690_s24 }
0x1786   :  { %2554 = vrot.lane.b32.xlu1 %v2549_v4, %s3690_s24 }
0x1789   :  { %2437 = vrot.lane.b32.xlu0 %v2432_v50, %s3691_s26 }
0x178a   :  { %2569 = vrot.lane.b32.xlu1 %v2565_v2, %s3691_s26  ;;  %v1969_v2 = vstv %s4671_s22 }
0x178b   :  { %v1970_v41 = vmul.f32 %v4095_v29, %v1969_v2 }
0x178d   :  { %2671 = vrot.lane.b32.xlu0 %v2666_v1, %s3689_s17 }
0x178e   :  { %2571 = vrot.lane.b32.xlu1 %v2566_v54, %s3691_s26 }
0x1791   :  { %2686 = vrot.lane.b32.xlu0 %v2682_v8, %s3690_s24 }
0x1792   :  { %2703 = vrot.lane.b32.xlu1 %v2699_v16, %s3691_s26 }
0x1793   :  { %v1849_v52 = vpop.permute.xlu0 %1848 }
0x1794   :  { %v1854_v36 = vadd.f32 %v1849_v52, %v1836_v9 }
0x1795   :  { %2688 = vrot.lane.b32.xlu0 %v2683_v21, %s3690_s24 }
0x1796   :  { %1598 = vrot.lane.b32.xlu1 %v1593_v62, %s3683_s0  ;;  %s3693_s0 = smov 108  }
0x1797   :  { %v1851_v47 = vpop.permute.xlu0 %1850 }
0x1798   :  { %v4863_v15 = vpop.permute.xlu1 %1982  ;;  %v1855_v42 = vadd.f32 %v1851_v47, %v1837_v19  ;;  %v1971_v47 = vmul.f32 %v4097_v26, %v1969_v2 }
0x1799   :  { %2705 = vrot.lane.b32.xlu0 %v2700_v7, %s3691_s26  ;;  %v1988_v8 = vadd.f32 %v4863_v15, %v1970_v41 }
0x179a   :  { %1615 = vrot.lane.b32.xlu1 %v1610_v18, %s3689_s17 }
0x179b   :  { %v1866_v6 = vpop.permute.xlu0 %1865 }
0x179c   :  { %v1868_v5 = vpop.permute.xlu1 %1867  ;;  %v1871_v61 = vadd.f32 %v1866_v6, %v1854_v36 }
0x179d   :  { %1613 = vrot.lane.b32.xlu0 %v1609_v12, %s3689_s17  ;;  %v1872_v10 = vadd.f32 %v1868_v5, %v1855_v42 }
0x179e   :  { %1632 = vrot.lane.b32.xlu1 %v1627_v59, %s3690_s24 }
0x179f   :  { %v1751_v31 = vpop.permute.xlu0 %1750 }
0x17a0   :  { %v1766_v30 = vpop.permute.xlu1 %1765  ;;  %v1755_v63 = vadd.f32 %v1751_v31, %v1738_v33 }
0x17a1   :  { %1630 = vrot.lane.b32.xlu0 %v1626_v45, %s3690_s24  ;;  %v1771_v34 = vadd.f32 %v1766_v30, %v1754_v46 }
0x17a2   :  { %1649 = vrot.lane.b32.xlu1 %v1644_v48, %s3691_s26 }
0x17a3   :  { %v1985_v32 = vpop.permute.xlu0 %1984  ;;  %v1789_v39 = vmul.f32 %v1771_v34, %v1771_v34 }
0x17a4   :  { %v2000_v17 = vpop.permute.xlu1 %1999  ;;  %v1989_v49 = vadd.f32 %v1985_v32, %v1971_v47 }
0x17a5   :  { %1647 = vrot.lane.b32.xlu0 %v1643_v14, %s3691_s26  ;;  %v2005_v62 = vadd.f32 %v2000_v17, %v1988_v8  ;;  %v2105_v17 = vmul.f32 %v4097_v26, %v2103_v0  ;;  %s3694_s26 = smov 16  }
0x17a7   :  { %v1883_v22 = vpop.permute.xlu0 %1882 }
0x17a8   :  { %v1768_v35 = vpop.permute.xlu1 %1767  ;;  %v1888_v27 = vadd.f32 %v1883_v22, %v1871_v61 }
0x17a9   :  { %v1772_v60 = vadd.f32 %v1768_v35, %v1755_v63  ;;  %1775 = vrot.lane.b32.xlu0 %v1771_v34, %s3693_s0  ;;  %v2237_v35 = vstv %s4716_s8 }
0x17ab   :  { %1777 = vrot.lane.b32.xlu1 %v1772_v60, %s3693_s0  ;;  %v2117_v24 = vpop.permute.xlu0 %2116  ;;  %v1790_v43 = vmul.f32 %v1772_v60, %v1772_v60 }
0x17ac   :  { %v2002_v25 = vpop.permute.xlu1 %2001  ;;  %v2122_v48 = vadd.f32 %v2117_v24, %v2104_v20 }
0x17ad   :  { %1793 = vrot.lane.b32.xlu0 %v1789_v39, %s3693_s0  ;;  %v2006_v59 = vadd.f32 %v2002_v25, %v1989_v49  ;;  %v2238_v39 = vmul.f32 %v4095_v29, %v2237_v35  ;;  %v2505_v49 = vstv %s4780_s13 }
0x17ae   :  { %v2506_v0 = vmul.f32 %v4095_v29, %v2505_v49 }
0x17af   :  { %v1885_v38 = vpop.permute.xlu0 %1884 }
0x17b0   :  { %v1900_v40 = vpop.permute.xlu1 %1899  ;;  %v1889_v1 = vadd.f32 %v1885_v38, %v1872_v10 }
0x17b1   :  { %v1905_v11 = vadd.f32 %v1900_v40, %v1888_v27  ;;  %1795 = vrot.lane.b32.xlu0 %v1790_v43, %s3693_s0 }
0x17b3   :  { %v1923_v4 = vmul.f32 %v1905_v11, %v1905_v11  ;;  %1909 = vrot.lane.b32.xlu1 %v1905_v11, %s3693_s0  ;;  %v2119_v55 = vpop.permute.xlu0 %2118  ;;  %v2239_v11 = vmul.f32 %v4097_v26, %v2237_v35 }
0x17b4   :  { %v2134_v50 = vpop.permute.xlu1 %2133  ;;  %v2123_v46 = vadd.f32 %v2119_v55, %v2105_v17 }
0x17b5   :  { %1927 = vrot.lane.b32.xlu0 %v1923_v4, %s3693_s0  ;;  %v2139_v14 = vadd.f32 %v2134_v50, %v2122_v48 }
0x17b7   :  { %v2017_v54 = vpop.permute.xlu0 %2016 }
0x17b8   :  { %v1902_v3 = vpop.permute.xlu1 %1901  ;;  %v2022_v57 = vadd.f32 %v2017_v54, %v2005_v62  ;;  %v2371_v54 = vstv %s4750_s23 }
0x17b9   :  { %v1906_v44 = vadd.f32 %v1902_v3, %v1889_v1  ;;  %v2372_v8 = vmul.f32 %v4095_v29, %v2371_v54 }
0x17bb   :  { %v1924_v16 = vmul.f32 %v1906_v44, %v1906_v44  ;;  %1911 = vrot.lane.b32.xlu1 %v1906_v44, %s3693_s0  ;;  %v2251_v21 = vpop.permute.xlu0 %2250 }
0x17bc   :  { %v2136_v52 = vpop.permute.xlu1 %2135  ;;  %v2256_v25 = vadd.f32 %v2251_v21, %v2238_v39 }
0x17bd   :  { %1929 = vrot.lane.b32.xlu0 %v1924_v16, %s3693_s0  ;;  %v2140_v22 = vadd.f32 %v2136_v52, %v2123_v46 }
0x17bf   :  { %v2019_v56 = vpop.permute.xlu0 %2018 }
0x17c0   :  { %v2034_v7 = vpop.permute.xlu1 %2033  ;;  %v2023_v5 = vadd.f32 %v2019_v56, %v2006_v59  ;;  %v2373_v59 = vmul.f32 %v4097_v26, %v2371_v54 }
0x17c1   :  { %v2039_v18 = vadd.f32 %v2034_v7, %v2022_v57 }
0x17c3   :  { %v2057_v12 = vmul.f32 %v2039_v18, %v2039_v18  ;;  %2043 = vrot.lane.b32.xlu1 %v2039_v18, %s3693_s0  ;;  %v2253_v15 = vpop.permute.xlu0 %2252 }
0x17c4   :  { %v2268_v6 = vpop.permute.xlu1 %2267  ;;  %v2257_v55 = vadd.f32 %v2253_v15, %v2239_v11 }
0x17c5   :  { %2061 = vrot.lane.b32.xlu0 %v2057_v12, %s3693_s0  ;;  %v2273_v27 = vadd.f32 %v2268_v6, %v2256_v25 }
0x17c7   :  { %v2151_v28 = vpop.permute.xlu0 %2150 }
0x17c8   :  { %v2036_v45 = vpop.permute.xlu1 %2035  ;;  %v2156_v51 = vadd.f32 %v2151_v28, %v2139_v14 }
0x17c9   :  { %v2040_v31 = vadd.f32 %v2036_v45, %v2023_v5 }
0x17cb   :  { %v2058_v30 = vmul.f32 %v2040_v31, %v2040_v31  ;;  %2045 = vrot.lane.b32.xlu1 %v2040_v31, %s3693_s0  ;;  %v2385_v23 = vpop.permute.xlu0 %2384 }
0x17cc   :  { %v2270_v13 = vpop.permute.xlu1 %2269  ;;  %v2390_v21 = vadd.f32 %v2385_v23, %v2372_v8  ;;  %v2507_v23 = vmul.f32 %v4097_v26, %v2505_v49 }
0x17cd   :  { %2063 = vrot.lane.b32.xlu0 %v2058_v30, %s3693_s0  ;;  %v2274_v1 = vadd.f32 %v2270_v13, %v2257_v55 }
0x17cf   :  { %v2153_v53 = vpop.permute.xlu0 %2152 }
0x17d0   :  { %v2168_v32 = vpop.permute.xlu1 %2167  ;;  %v2157_v9 = vadd.f32 %v2153_v53, %v2140_v22 }
0x17d1   :  { %v2173_v33 = vadd.f32 %v2168_v32, %v2156_v51  ;;  %v2639_v51 = vstv %s4809_s27 }
0x17d2   :  { %v2640_v46 = vmul.f32 %v4095_v29, %v2639_v51 }
0x17d3   :  { %v2191_v58 = vmul.f32 %v2173_v33, %v2173_v33  ;;  %2177 = vrot.lane.b32.xlu1 %v2173_v33, %s3693_s0  ;;  %v2387_v34 = vpop.permute.xlu0 %2386 }
0x17d4   :  { %v2402_v63 = vpop.permute.xlu1 %2401  ;;  %v2391_v28 = vadd.f32 %v2387_v34, %v2373_v59 }
0x17d5   :  { %2195 = vrot.lane.b32.xlu0 %v2191_v58, %s3693_s0  ;;  %v2407_v56 = vadd.f32 %v2402_v63, %v2390_v21 }
0x17d7   :  { %v2285_v60 = vpop.permute.xlu0 %2284 }
0x17d8   :  { %v2170_v36 = vpop.permute.xlu1 %2169  ;;  %v2290_v38 = vadd.f32 %v2285_v60, %v2273_v27 }
0x17d9   :  { %v2174_v24 = vadd.f32 %v2170_v36, %v2157_v9 }
0x17db   :  { %v2192_v61 = vmul.f32 %v2174_v24, %v2174_v24  ;;  %2179 = vrot.lane.b32.xlu1 %v2174_v24, %s3693_s0  ;;  %v2519_v19 = vpop.permute.xlu0 %2518 }
0x17dc   :  { %v2404_v43 = vpop.permute.xlu1 %2403  ;;  %v2524_v45 = vadd.f32 %v2519_v19, %v2506_v0 }
0x17dd   :  { %2197 = vrot.lane.b32.xlu0 %v2192_v61, %s3693_s0  ;;  %v2408_v31 = vadd.f32 %v2404_v43, %v2391_v28  ;;  %v2641_v61 = vmul.f32 %v4097_v26, %v2639_v51 }
0x17df   :  { %v2287_v40 = vpop.permute.xlu0 %2286 }
0x17e0   :  { %v2302_v42 = vpop.permute.xlu1 %2301  ;;  %v2291_v3 = vadd.f32 %v2287_v40, %v2274_v1 }
0x17e1   :  { %v2307_v4 = vadd.f32 %v2302_v42, %v2290_v38 }
0x17e3   :  { %v2325_v50 = vmul.f32 %v2307_v4, %v2307_v4  ;;  %2311 = vrot.lane.b32.xlu1 %v2307_v4, %s3693_s0  ;;  %v2521_v10 = vpop.permute.xlu0 %2520 }
0x17e4   :  { %v2536_v2 = vpop.permute.xlu1 %2535  ;;  %v2525_v32 = vadd.f32 %v2521_v10, %v2507_v23 }
0x17e5   :  { %2329 = vrot.lane.b32.xlu0 %v2325_v50, %s3693_s0  ;;  %v2541_v48 = vadd.f32 %v2536_v2, %v2524_v45 }
0x17e7   :  { %v2419_v41 = vpop.permute.xlu0 %2418 }
0x17e8   :  { %v2304_v44 = vpop.permute.xlu1 %2303  ;;  %v2424_v7 = vadd.f32 %v2419_v41, %v2407_v56 }
0x17e9   :  { %v2308_v16 = vadd.f32 %v2304_v44, %v2291_v3  ;;  %v1583_v3 = vstv %s4606_s4 }
0x17ea   :  { %v1584_v44 = vmul.f32 %v4095_v29, %v1583_v3  ;;  %v1585_v56 = vmul.f32 %v4097_v26, %v1583_v3 }
0x17eb   :  { %v2326_v52 = vmul.f32 %v2308_v16, %v2308_v16  ;;  %2313 = vrot.lane.b32.xlu1 %v2308_v16, %s3693_s0  ;;  %v2653_v62 = vpop.permute.xlu0 %2652 }
0x17ec   :  { %v2538_v57 = vpop.permute.xlu1 %2537  ;;  %v2658_v35 = vadd.f32 %v2653_v62, %v2640_v46  ;;  %v1602_v16 = vadd.f32 %v4848_v37, %v1584_v44 }
0x17ed   :  { %2331 = vrot.lane.b32.xlu0 %v2326_v52, %s3693_s0  ;;  %v2542_v58 = vadd.f32 %v2538_v57, %v2525_v32 }
0x17ef   :  { %v2421_v47 = vpop.permute.xlu0 %2420 }
0x17f0   :  { %v2436_v18 = vpop.permute.xlu1 %2435  ;;  %v2425_v13 = vadd.f32 %v2421_v47, %v2408_v31 }
0x17f1   :  { %v2441_v12 = vadd.f32 %v2436_v18, %v2424_v7 }
0x17f3   :  { %v2459_v15 = vmul.f32 %v2441_v12, %v2441_v12  ;;  %2445 = vrot.lane.b32.xlu1 %v2441_v12, %s3693_s0  ;;  %v2655_v6 = vpop.permute.xlu0 %2654 }
0x17f4   :  { %v2670_v5 = vpop.permute.xlu1 %2669  ;;  %v2659_v27 = vadd.f32 %v2655_v6, %v2641_v61 }
0x17f5   :  { %2463 = vrot.lane.b32.xlu0 %v2459_v15, %s3693_s0  ;;  %v2675_v36 = vadd.f32 %v2670_v5, %v2658_v35 }
0x17f7   :  { %v2553_v20 = vpop.permute.xlu0 %2552 }
0x17f8   :  { %v2555_v30 = vpop.permute.xlu1 %2554  ;;  %v2558_v14 = vadd.f32 %v2553_v20, %v2541_v48 }
0x17f9   :  { %v2559_v9 = vadd.f32 %v2555_v30, %v2542_v58 }
0x17fb   :  { %v2438_v53 = vpop.permute.xlu0 %2437 }
0x17fc   :  { %v2570_v17 = vpop.permute.xlu1 %2569  ;;  %v2442_v33 = vadd.f32 %v2438_v53, %v2425_v13 }
0x17fd   :  { %v2575_v63 = vadd.f32 %v2570_v17, %v2558_v14 }
0x17fe   :  { %v2460_v22 = vmul.f32 %v2442_v33, %v2442_v33  ;;  %2447 = vrot.lane.b32.xlu1 %v2442_v33, %s3693_s0 }
0x17ff   :  { %v2672_v34 = vpop.permute.xlu0 %2671  ;;  %v2593_v39 = vmul.f32 %v2575_v63, %v2575_v63 }
0x1800   :  { %v2572_v60 = vpop.permute.xlu1 %2571  ;;  %2465 = vrot.lane.b32.xlu0 %v2460_v22, %s3693_s0  ;;  %v2676_v11 = vadd.f32 %v2672_v34, %v2659_v27 }
0x1801   :  { %v2576_v24 = vadd.f32 %v2572_v60, %v2559_v9 }
0x1802   :  { %2579 = vrot.lane.b32.xlu1 %v2575_v63, %s3693_s0 }
0x1803   :  { %v2687_v25 = vpop.permute.xlu0 %2686  ;;  %v2594_v38 = vmul.f32 %v2576_v24, %v2576_v24 }
0x1804   :  { %v2692_v19 = vadd.f32 %v2687_v25, %v2675_v36  ;;  %2597 = vrot.lane.b32.xlu0 %v2593_v39, %s3693_s0  ;;  %v2704_v43 = vpop.permute.xlu1 %2703 }
0x1806   :  { %v2709_v40 = vadd.f32 %v2704_v43, %v2692_v19  ;;  %2581 = vrot.lane.b32.xlu1 %v2576_v24, %s3693_s0 }
0x1807   :  { %v2689_v42 = vpop.permute.xlu0 %2688 }
0x1808   :  { %2599 = vrot.lane.b32.xlu0 %v2594_v38, %s3693_s0  ;;  %v2727_v4 = vmul.f32 %v2709_v40, %v2709_v40  ;;  %v2693_v55 = vadd.f32 %v2689_v42, %v2676_v11  ;;  %v1599_v54 = vpop.permute.xlu1 %1598 }
0x1809   :  { %v1603_v47 = vadd.f32 %v1599_v54, %v1585_v56 }
0x180a   :  { %2713 = vrot.lane.b32.xlu1 %v2709_v40, %s3693_s0 }
0x180b   :  { %v2706_v50 = vpop.permute.xlu0 %2705 }
0x180c   :  { %v2710_v10 = vadd.f32 %v2706_v50, %v2693_v55  ;;  %2731 = vrot.lane.b32.xlu0 %v2727_v4, %s3693_s0  ;;  %v1616_v8 = vpop.permute.xlu1 %1615 }
0x180d   :  { %v1620_v18 = vadd.f32 %v1616_v8, %v1603_v47 }
0x180e   :  { %2715 = vrot.lane.b32.xlu1 %v2710_v10, %s3693_s0  ;;  %v2728_v2 = vmul.f32 %v2710_v10, %v2710_v10 }
0x180f   :  { %v1614_v1 = vpop.permute.xlu0 %1613 }
0x1810   :  { %v1619_v21 = vadd.f32 %v1614_v1, %v1602_v16  ;;  %v1633_v57 = vpop.permute.xlu1 %1632 }
0x1811   :  { %v1637_v59 = vadd.f32 %v1633_v57, %v1620_v18 }
0x1812   :  { %2733 = vrot.lane.b32.xlu1 %v2728_v2, %s3693_s0 }
0x1813   :  { %v1631_v41 = vpop.permute.xlu0 %1630 }
0x1814   :  { %v1636_v62 = vadd.f32 %v1631_v41, %v1619_v21  ;;  %v1650_v15 = vpop.permute.xlu1 %1649 }
0x1815   :  { %v1654_v29 = vadd.f32 %v1650_v15, %v1637_v59 }
0x1817   :  { %v1648_v52 = vpop.permute.xlu0 %1647  ;;  %v1664_v5 = vmul.f32 %v1654_v29, %v1654_v29  ;;  %v1658_v26 = vsel %vm723_vm2, %v1654_v29, 0.0 }
0x1818   :  { %v1653_v7 = vadd.f32 %v1648_v52, %v1636_v62 }
0x1819   :  { %v1668_v20 = vsel %vm723_vm2, %v1664_v5, 0.0 }
0x181a   :  { %v1663_v49 = vmul.f32 %v1653_v7, %v1653_v7  ;;  %v1655_v12 = vsel %vm723_vm2, %v1653_v7, 0.0 }
0x181b   :  { %v1776_v6 = vpop.permute.xlu0 %1775 }
0x181c   :  { %v1665_v0 = vsel %vm723_vm2, %v1663_v49, 0.0  ;;  %v1781_v28 = vsel %vm723_vm2, %v1776_v6, 0.0 }
0x181d   :  { %v1778_v45 = vpop.permute.xlu1 %1777 }
0x181e   :  { %v1784_v48 = vsel %vm723_vm2, %v1778_v45, 0.0  ;;  %v2803_v45 = vld [vmem:[#allocation8 + $0x70] sm:$0xff] }
0x181f   :  { %v1794_v37 = vpop.permute.xlu0 %1793 }
0x1820   :  { %v1799_v30 = vsel %vm723_vm2, %v1794_v37, 0.0 }
0x1823   :  { %v1796_v31 = vpop.permute.xlu0 %1795 }
0x1824   :  { %v1802_v51 = vsel %vm723_vm2, %v1796_v31, 0.0  ;;  %v2801_v31 = vld [vmem:[#allocation8 + $0x60] sm:$0xff] }
0x1825   :  { %v1910_v23 = vpop.permute.xlu1 %1909 }
0x1826   :  { %v1915_v13 = vsel %vm723_vm2, %v1910_v23, 0.0  ;;  %v2798_v23 = vld [vmem:[#allocation8 + $0x48] sm:$0xff] }
0x1827   :  { %v1928_v14 = vpop.permute.xlu0 %1927 }
0x1828   :  { %v1933_v17 = vsel %vm723_vm2, %v1928_v14, 0.0  ;;  %v2796_v14 = vld [vmem:[#allocation8 + $0x38] sm:$0xff] }
0x182b   :  { %1656 = vadd.xlane.f32.xlu0 %v1655_v12 }
0x182d   :  { %v1912_v53 = vpop.permute.xlu1 %1911 }
0x182e   :  { %v1918_v32 = vsel %vm723_vm2, %v1912_v53, 0.0  ;;  %v2794_v53 = vld [vmem:[#allocation8 + $0x28] sm:$0xff] }
0x182f   :  { %1666 = vadd.xlane.f32.xlu0 %v1665_v0  ;;  %v1930_v46 = vpop.permute.xlu0 %1929 }
0x1830   :  { %v1936_v63 = vsel %vm723_vm2, %v1930_v46, 0.0  ;;  %v2792_v46 = vld [vmem:[#allocation8 + $0x18] sm:$0xff] }
0x1833   :  { %1782 = vadd.xlane.f32.xlu0 %v1781_v28  ;;  %v3078_v28 = vld [vmem:[%s5171_s5] ss:$0 sm:$0xff] }
0x1835   :  { %v2044_v33 = vpop.permute.xlu1 %2043 }
0x1836   :  { %1659 = vadd.xlane.f32.xlu1 %v1658_v26  ;;  %v2049_v58 = vsel %vm723_vm2, %v2044_v33, 0.0  ;;  %v2804_v26 = vld [vmem:[#allocation8 + $0x78] sm:$0xff] }
0x1837   :  { %1669 = vadd.xlane.f32.xlu0 %v1668_v20  ;;  %v2062_v34 = vpop.permute.xlu0 %2061  ;;  %3143 = vmatprep.subr.mxu0 %v2804_v26  ;;  %v2802_v20 = vld [vmem:[#allocation8 + $0x68] sm:$0xff] }
0x1838   :  { %v2067_v9 = vsel %vm723_vm2, %v2062_v34, 0.0  ;;  %3144 = vmatpush3.msra.mxu0 %v2804_v26 }
0x1839   :  { %3145 = vmatprep.subr.mxu0 %v2803_v45 }
0x183a   :  { %1785 = vadd.xlane.f32.xlu1 %v1784_v48  ;;  %3146 = vmatpush3.msra.mxu0 %v2803_v45  ;;  %v2800_v48 = vld [vmem:[#allocation8 + $0x58] sm:$0xff]  ;;  %v2893_v45 = vld [vmem:[#allocation9 + $0x20] sm:$0xff] }
0x183b   :  { %1800 = vadd.xlane.f32.xlu0 %v1799_v30  ;;  %3147 = vmatprep.subr.mxu0 %v2802_v20  ;;  %v2799_v30 = vld [vmem:[#allocation8 + $0x50] sm:$0xff] }
0x183c   :  { %3148 = vmatpush3.msra.mxu0 %v2802_v20 }
0x183d   :  { %v2046_v22 = vpop.permute.xlu1 %2045  ;;  %3149 = vmatprep.subr.mxu0 %v2801_v31 }
0x183e   :  { %1916 = vadd.xlane.f32.xlu1 %v1915_v13  ;;  %v2052_v35 = vsel %vm723_vm2, %v2046_v22, 0.0  ;;  %3150 = vmatpush3.msra.mxu0 %v2801_v31  ;;  %v2797_v13 = vld [vmem:[#allocation8 + $0x40] sm:$0xff] }
0x183f   :  { %1803 = vadd.xlane.f32.xlu0 %v1802_v51  ;;  %v2064_v36 = vpop.permute.xlu0 %2063  ;;  %3151 = vmatprep.subr.mxu0 %v2800_v48  ;;  %v2795_v51 = vld [vmem:[#allocation8 + $0x30] sm:$0xff] }
0x1840   :  { %v2070_v24 = vsel %vm723_vm2, %v2064_v36, 0.0  ;;  %3152 = vmatpush3.msra.mxu0 %v2800_v48 }
0x1841   :  { %3153 = vmatprep.subr.mxu0 %v2799_v30 }
0x1842   :  { %1919 = vadd.xlane.f32.xlu1 %v1918_v32  ;;  %3154 = vmatpush3.msra.mxu0 %v2799_v30  ;;  %v2793_v32 = vld [vmem:[#allocation8 + $0x20] sm:$0xff] }
0x1843   :  { %1934 = vadd.xlane.f32.xlu0 %v1933_v17  ;;  %3155 = vmatprep.subr.mxu0 %v2798_v23 }
0x1844   :  { %3156 = vmatpush3.msra.mxu0 %v2798_v23 }
0x1845   :  { %v2178_v60 = vpop.permute.xlu1 %2177  ;;  %3157 = vmatprep.subr.mxu0 %v2797_v13 }
0x1846   :  { %2050 = vadd.xlane.f32.xlu1 %v2049_v58  ;;  %v2183_v39 = vsel %vm723_vm2, %v2178_v60, 0.0  ;;  %3158 = vmatpush3.msra.mxu0 %v2797_v13  ;;  %v2791_v58 = vld [vmem:[#allocation8 + $0x10] sm:$0xff] }
0x1847   :  { %1937 = vadd.xlane.f32.xlu0 %v1936_v63  ;;  %v2196_v61 = vpop.permute.xlu0 %2195  ;;  %3159 = vmatprep.subr.mxu0 %v2796_v14  ;;  %v2903_v60 = vld [vmem:[#allocation9 + $0x70] sm:$0xff] }
0x1848   :  { %v2201_v43 = vsel %vm723_vm2, %v2196_v61, 0.0  ;;  %3160 = vmatpush3.msra.mxu0 %v2796_v14 }
0x1849   :  { %3161 = vmatprep.subr.mxu0 %v2795_v51 }
0x184a   :  { %2053 = vadd.xlane.f32.xlu1 %v2052_v35  ;;  %3162 = vmatpush3.msra.mxu0 %v2795_v51  ;;  %v2790_v35 = vld [vmem:[#allocation8 + $0x8] sm:$0xff] }
0x184b   :  { %2068 = vadd.xlane.f32.xlu0 %v2067_v9  ;;  %3163 = vmatprep.subr.mxu0 %v2794_v53  ;;  %v2904_v9 = vld [vmem:[#allocation9 + $0x78] sm:$0xff] }
0x184c   :  { %3164 = vmatpush3.msra.mxu0 %v2794_v53  ;;  %3178 = vmatprep.subr.mxu1 %v2904_v9 }
0x184d   :  { %v2180_v25 = vpop.permute.xlu1 %2179  ;;  %3165 = vmatprep.subr.mxu0 %v2793_v32  ;;  %3179 = vmatpush3.msra.mxu1 %v2904_v9 }
0x184e   :  { %2184 = vadd.xlane.f32.xlu1 %v2183_v39  ;;  %v2186_v19 = vsel %vm723_vm2, %v2180_v25, 0.0  ;;  %3166 = vmatpush3.msra.mxu0 %v2793_v32  ;;  %v2789_v39 = vld [vmem:[#allocation8] sm:$0xff]  ;;  %v2902_v25 = vld [vmem:[#allocation9 + $0x68] sm:$0xff] }
0x184f   :  { %2071 = vadd.xlane.f32.xlu0 %v2070_v24  ;;  %v2198_v27 = vpop.permute.xlu0 %2197  ;;  %3167 = vmatprep.subr.mxu0 %v2792_v46 }
0x1850   :  { %v2204_v40 = vsel %vm723_vm2, %v2198_v27, 0.0  ;;  %3168 = vmatpush3.msra.mxu0 %v2792_v46  ;;  %3180 = vmatprep.subr.mxu1 %v2903_v60 }
0x1851   :  { %3169 = vmatprep.subr.mxu0 %v2791_v58  ;;  %3181 = vmatpush3.msra.mxu1 %v2903_v60 }
0x1852   :  { %2187 = vadd.xlane.f32.xlu1 %v2186_v19  ;;  %3170 = vmatpush3.msra.mxu0 %v2791_v58  ;;  %v2901_v19 = vld [vmem:[#allocation9 + $0x60] sm:$0xff] }
0x1853   :  { %2202 = vadd.xlane.f32.xlu0 %v2201_v43  ;;  %3171 = vmatprep.subr.mxu0 %v2790_v35 }
0x1854   :  { %3172 = vmatpush3.msra.mxu0 %v2790_v35  ;;  %3182 = vmatprep.subr.mxu1 %v2902_v25 }
0x1855   :  { %v2312_v38 = vpop.permute.xlu1 %2311  ;;  %3173 = vmatprep.subr.mxu0 %v2789_v39  ;;  %3183 = vmatpush3.msra.mxu1 %v2902_v25 }
0x1856   :  { %v2317_v42 = vsel %vm723_vm2, %v2312_v38, 0.0  ;;  %3174 = vmatpush3.msra.mxu0 %v2789_v39  ;;  %3184 = vmatprep.subr.mxu1 %v2901_v19 }
0x1857   :  { %v2330_v11 = vpop.permute.xlu0 %2329  ;;  %2318 = vadd.xlane.f32.xlu1 %v2317_v42  ;;  %2205 = vadd.xlane.f32.xlu0 %v2204_v40  ;;  %v2900_v40 = vld [vmem:[#allocation9 + $0x58] sm:$0xff] }
0x1858   :  { %v2335_v4 = vsel %vm723_vm2, %v2330_v11, 0.0  ;;  %3185 = vmatpush3.msra.mxu1 %v2901_v19 }
0x1859   :  { %3186 = vmatprep.subr.mxu1 %v2900_v40 }
0x185a   :  { %3187 = vmatpush3.msra.mxu1 %v2900_v40 }
0x185b   :  { %2336 = vadd.xlane.f32.xlu0 %v2335_v4 }
0x185d   :  { %v2314_v55 = vpop.permute.xlu1 %2313 }
0x185e   :  { %v2320_v50 = vsel %vm723_vm2, %v2314_v55, 0.0  ;;  %v2899_v55 = vld [vmem:[#allocation9 + $0x50] sm:$0xff] }
0x185f   :  { %2321 = vadd.xlane.f32.xlu1 %v2320_v50  ;;  %v2332_v10 = vpop.permute.xlu0 %2331  ;;  %3188 = vmatprep.subr.mxu1 %v2899_v55 }
0x1860   :  { %v2338_v2 = vsel %vm723_vm2, %v2332_v10, 0.0  ;;  %3189 = vmatpush3.msra.mxu1 %v2899_v55 }
0x1861   :  { %2339 = vadd.xlane.f32.xlu0 %v2338_v2 }
0x1865   :  { %v2446_v1 = vpop.permute.xlu1 %2445 }
0x1866   :  { %v2451_v54 = vsel %vm723_vm2, %v2446_v1, 0.0  ;;  %v2898_v1 = vld [vmem:[#allocation9 + $0x48] sm:$0xff] }
0x1867   :  { %2452 = vadd.xlane.f32.xlu1 %v2451_v54  ;;  %v2464_v3 = vpop.permute.xlu0 %2463  ;;  %3190 = vmatprep.subr.mxu1 %v2898_v1 }
0x1868   :  { %v2469_v41 = vsel %vm723_vm2, %v2464_v3, 0.0  ;;  %3191 = vmatpush3.msra.mxu1 %v2898_v1 }
0x1869   :  { %2470 = vadd.xlane.f32.xlu0 %v2469_v41 }
0x1870   :  { %v2448_v44 = vpop.permute.xlu1 %2447 }
0x1871   :  { %v2454_v8 = vsel %vm723_vm2, %v2448_v44, 0.0 }
0x1872   :  { %2455 = vadd.xlane.f32.xlu1 %v2454_v8  ;;  %v2466_v16 = vpop.permute.xlu0 %2465  ;;  %v2897_v8 = vld [vmem:[#allocation9 + $0x40] sm:$0xff] }
0x1873   :  { %v2472_v21 = vsel %vm723_vm2, %v2466_v16, 0.0  ;;  %3192 = vmatprep.subr.mxu1 %v2897_v8 }
0x1874   :  { %v2580_v52 = vpop.permute.xlu1 %2579  ;;  %2473 = vadd.xlane.f32.xlu0 %v2472_v21  ;;  %3193 = vmatpush3.msra.mxu1 %v2897_v8 }
0x1875   :  { %v2585_v62 = vsel %vm723_vm2, %v2580_v52, 0.0 }
0x1876   :  { %2586 = vadd.xlane.f32.xlu1 %v2585_v62  ;;  %v2598_v57 = vpop.permute.xlu0 %2597  ;;  %v2896_v62 = vld [vmem:[#allocation9 + $0x38] sm:$0xff] }
0x1877   :  { %v2603_v56 = vsel %vm723_vm2, %v2598_v57, 0.0  ;;  %3194 = vmatprep.subr.mxu1 %v2896_v62 }
0x1878   :  { %v2582_v7 = vpop.permute.xlu1 %2581  ;;  %2604 = vadd.xlane.f32.xlu0 %v2603_v56  ;;  %3195 = vmatpush3.msra.mxu1 %v2896_v62 }
0x1879   :  { %v2588_v47 = vsel %vm723_vm2, %v2582_v7, 0.0 }
0x187a   :  { %2589 = vadd.xlane.f32.xlu1 %v2588_v47  ;;  %v2600_v18 = vpop.permute.xlu0 %2599 }
0x187b   :  { %v2606_v49 = vsel %vm723_vm2, %v2600_v18, 0.0  ;;  %v2895_v18 = vld [vmem:[#allocation9 + $0x30] sm:$0xff] }
0x187c   :  { %v2714_v12 = vpop.permute.xlu1 %2713  ;;  %2607 = vadd.xlane.f32.xlu0 %v2606_v49  ;;  %3196 = vmatprep.subr.mxu1 %v2895_v18 }
0x187d   :  { %v2719_v15 = vsel %vm723_vm2, %v2714_v12, 0.0  ;;  %3197 = vmatpush3.msra.mxu1 %v2895_v18 }
0x187e   :  { %2720 = vadd.xlane.f32.xlu1 %v2719_v15  ;;  %v2732_v6 = vpop.permute.xlu0 %2731 }
0x187f   :  { %v2737_v59 = vsel %vm723_vm2, %v2732_v6, 0.0 }
0x1880   :  { %v2716_v29 = vpop.permute.xlu1 %2715  ;;  %2738 = vadd.xlane.f32.xlu0 %v2737_v59  ;;  %v2894_v59 = vld [vmem:[#allocation9 + $0x28] sm:$0xff] }
0x1881   :  { %v2722_v0 = vsel %vm723_vm2, %v2716_v29, 0.0  ;;  %3198 = vmatprep.subr.mxu1 %v2894_v59 }
0x1882   :  { %2723 = vadd.xlane.f32.xlu1 %v2722_v0  ;;  %3199 = vmatpush3.msra.mxu1 %v2894_v59 }
0x1883   :  { %3200 = vmatprep.subr.mxu1 %v2893_v45 }
0x1884   :  { %v2734_v37 = vpop.permute.xlu1 %2733  ;;  %3201 = vmatpush3.msra.mxu1 %v2893_v45 }
0x1885   :  { %v2740_v5 = vsel %vm723_vm2, %v2734_v37, 0.0  ;;  %vm1679_vm2 = vcmask 195768  }
0x1886   :  { %2741 = vadd.xlane.f32.xlu1 %v2740_v5 }
0x1896   :  { %2779 = vrot.lane.b32.xlu0 %v3078_v28, %s3694_s26 }
0x18b4   :  { %v1657_v17 = vpop.xlane.xlu0 %1656 }
0x18b5   :  { %v1661_v33 = vmul.f32 0.0625, %v1657_v17 }
0x18b7   :  { %1680 = vst.msk [vmem:[#allocation2] sm:$0xff] %vm1679_vm2, %v1661_v33  ;;  %v1673_v22 = vmul.f32 %v1661_v33, %v1661_v33 }
0x18b8   :  { %v1667_v63 = vpop.xlane.xlu0 %1666 }
0x18b9   :  { %v1671_v34 = vmul.f32 0.0625, %v1667_v63 }
0x18bb   :  { %v1675_v36 = vsub.f32 %v1671_v34, %v1673_v22 }
0x18bc   :  { %v1783_v24 = vpop.xlane.xlu0 %1782 }
0x18bd   :  { %v4980_v61 = vmax.f32 %v1675_v36, 0.0  ;;  %v4983_v42 = vmul.f32 0.0625, %v1783_v24 }
0x18bf   :  { %3505 = vrsqrt.f32 %v4980_v61  ;;  %v1660_v43 = vpop.xlane.xlu1 %1659  ;;  %v1807_v54 = vmul.f32 %v4983_v42, %v4983_v42  ;;  %vm1684_vm8 = vcmp.eq.f32.partialorder %v4980_v61, inf  ;;  %v1687_v5 = vand.u32 2147483648, %v4980_v61 }
0x18c0   :  { %v1662_v27 = vmul.f32 0.0625, %v1660_v43  ;;  %v1670_v38 = vpop.xlane.xlu0 %1669  ;;  %vm1686_vm10 = vcmp.eq.f32.partialorder %v4980_v61, 0.0 }
0x18c1   :  { %v1672_v11 = vmul.f32 0.0625, %v1670_v38 }
0x18c2   :  { %v1674_v4 = vmul.f32 %v1662_v27, %v1662_v27  ;;  %1681 = vst.msk [vmem:[#allocation2 + $0x8] sm:$0xff] %vm1679_vm2, %v1662_v27 }
0x18c3   :  { %v1786_v50 = vpop.xlane.xlu1 %1785 }
0x18c4   :  { %v1676_v10 = vsub.f32 %v1672_v11, %v1674_v4  ;;  %v1801_v2 = vpop.xlane.xlu0 %1800  ;;  %v4990_v44 = vmul.f32 0.0625, %v1786_v50 }
0x18c5   :  { %v1805_v3 = vmul.f32 0.0625, %v1801_v2 }
0x18c6   :  { %v4988_v41 = vmax.f32 %v1676_v10, 0.0  ;;  %v1808_v47 = vmul.f32 %v4990_v44, %v4990_v44 }
0x18c7   :  { %v1809_v16 = vsub.f32 %v1805_v3, %v1807_v54  ;;  %v1917_v21 = vpop.xlane.xlu1 %1916 }
0x18c8   :  { %3507 = vrsqrt.f32 %v4988_v41  ;;  %v1804_v52 = vpop.xlane.xlu0 %1803  ;;  %v4995_v56 = vmul.f32 0.0625, %v1917_v21  ;;  %vm1691_vm14 = vcmp.eq.f32.partialorder %v4988_v41, inf  ;;  %v1694_v9 = vand.u32 2147483648, %v4988_v41 }
0x18c9   :  { %v4993_v57 = vmax.f32 %v1809_v16, 0.0  ;;  %v1806_v7 = vmul.f32 0.0625, %v1804_v52  ;;  %vm1693_vm1 = vcmp.eq.f32.partialorder %v4988_v41, 0.0 }
0x18ca   :  { %v1941_v0 = vmul.f32 %v4995_v56, %v4995_v56 }
0x18cb   :  { %3509 = vrsqrt.f32 %v4993_v57  ;;  %v1920_v49 = vpop.xlane.xlu1 %1919  ;;  %v1810_v15 = vsub.f32 %v1806_v7, %v1808_v47  ;;  %vm1818_vm7 = vcmp.eq.f32.partialorder %v4993_v57, inf  ;;  %v1821_v27 = vand.u32 2147483648, %v4993_v57 }
0x18cc   :  { %v3506_v12 = vpop.eup %3505  ;;  %v1935_v6 = vpop.xlane.xlu0 %1934  ;;  %v5007_v26 = vmul.f32 0.0625, %v1920_v49  ;;  %vm1820_vm11 = vcmp.eq.f32.partialorder %v4993_v57, 0.0 }
0x18cd   :  { %v1683_v29 = vmul.f32 %v3506_v12, %v4980_v61  ;;  %v1939_v37 = vmul.f32 0.0625, %v1935_v6  ;;  %v5005_v28 = vmax.f32 %v1810_v15, 0.0 }
0x18ce   :  { %v1942_v53 = vmul.f32 %v5007_v26, %v5007_v26 }
0x18cf   :  { %v1685_v20 = vsel %vm1684_vm8, %v4980_v61, %v1683_v29  ;;  %v1943_v31 = vsub.f32 %v1939_v37, %v1941_v0  ;;  %v2051_v48 = vpop.xlane.xlu1 %2050  ;;  %3511 = vrsqrt.f32 %v5005_v28  ;;  %vm1825_vm12 = vcmp.eq.f32.partialorder %v5005_v28, inf }
0x18d0   :  { %v1688_v30 = vsel %vm1686_vm10, %v1687_v5, %v1685_v20  ;;  %v1938_v23 = vpop.xlane.xlu0 %1937  ;;  %v5015_v14 = vmul.f32 0.0625, %v2051_v48  ;;  %v1828_v8 = vand.u32 2147483648, %v5005_v28  ;;  %vm1827_vm15 = vcmp.eq.f32.partialorder %v5005_v28, 0.0 }
0x18d1   :  { %1697 = vst.msk [vmem:[#allocation2] sm:$0xff] %vm1696_vm6, %v1688_v30  ;;  %v5013_v13 = vmax.f32 %v1943_v31, 0.0  ;;  %v1940_v51 = vmul.f32 0.0625, %v1938_v23  ;;  %vm2098_vm10 = vcmask 482768  }
0x18d2   :  { %1814 = vst.msk [vmem:[#allocation2] sm:$0xff] %vm1813_vm13, %v4983_v42  ;;  %v2075_v58 = vmul.f32 %v5015_v14, %v5015_v14 }
0x18d3   :  { %3513 = vrsqrt.f32 %v5013_v13  ;;  %v2054_v32 = vpop.xlane.xlu1 %2053  ;;  %v1944_v17 = vsub.f32 %v1940_v51, %v1942_v53  ;;  %vm1952_vm3 = vcmp.eq.f32.partialorder %v5013_v13, inf  ;;  %v1955_v18 = vand.u32 2147483648, %v5013_v13 }
0x18d4   :  { %v2069_v33 = vpop.xlane.xlu0 %2068  ;;  %v5027_v35 = vmul.f32 0.0625, %v2054_v32  ;;  %vm1954_vm2 = vcmp.eq.f32.partialorder %v5013_v13, 0.0 }
0x18d5   :  { %v3508_v46 = vpop.eup %3507  ;;  %v2073_v63 = vmul.f32 0.0625, %v2069_v33  ;;  %v5025_v34 = vmax.f32 %v1944_v17, 0.0 }
0x18d6   :  { %v1690_v22 = vmul.f32 %v3508_v46, %v4988_v41  ;;  %v2076_v38 = vmul.f32 %v5027_v35, %v5027_v35 }
0x18d7   :  { %v2077_v60 = vsub.f32 %v2073_v63, %v2075_v58  ;;  %v2185_v36 = vpop.xlane.xlu1 %2184  ;;  %3515 = vrsqrt.f32 %v5025_v34  ;;  %v1962_v20 = vand.u32 2147483648, %v5025_v34  ;;  %vm1961_vm8 = vcmp.eq.f32.partialorder %v5025_v34, 0.0 }
0x18d8   :  { %v3510_v39 = vpop.eup %3509  ;;  %v1692_v24 = vsel %vm1691_vm14, %v4988_v41, %v1690_v22  ;;  %v2072_v25 = vpop.xlane.xlu0 %2071  ;;  %v5042_v40 = vmul.f32 0.0625, %v2185_v36 }
0x18d9   :  { %v1695_v61 = vsel %vm1693_vm1, %v1694_v9, %v1692_v24  ;;  %v1817_v19 = vmul.f32 %v3510_v39, %v4993_v57  ;;  %v5036_v43 = vmax.f32 %v2077_v60, 0.0  ;;  %v2074_v42 = vmul.f32 0.0625, %v2072_v25 }
0x18da   :  { %1698 = vst.msk [vmem:[#allocation2 + $0x8] sm:$0xff] %vm1696_vm6, %v1695_v61  ;;  %v2209_v1 = vmul.f32 %v5042_v40, %v5042_v40  ;;  %vm1959_vm6 = vcmp.eq.f32.partialorder %v5025_v34, inf }
0x18db   :  { %1815 = vst.msk [vmem:[#allocation2 + $0x8] sm:$0xff] %vm1813_vm13, %v4990_v44  ;;  %v1819_v11 = vsel %vm1818_vm7, %v4993_v57, %v1817_v19  ;;  %3517 = vrsqrt.f32 %v5036_v43  ;;  %v2188_v4 = vpop.xlane.xlu1 %2187  ;;  %v2078_v50 = vsub.f32 %v2074_v42, %v2076_v38  ;;  %vm2215_vm13 = vcmask 228568  }
0x18dc   :  { %v1822_v55 = vsel %vm1820_vm11, %v1821_v27, %v1819_v11  ;;  %v2203_v10 = vpop.xlane.xlu0 %2202  ;;  %v3512_v2 = vpop.eup %3511  ;;  %v5057_v44 = vmul.f32 0.0625, %v2188_v4  ;;  %vm2086_vm14 = vcmp.eq.f32.partialorder %v5036_v43, inf  ;;  %v2089_v53 = vand.u32 2147483648, %v5036_v43 }
0x18dd   :  { %1831 = vst.msk [vmem:[#allocation2] sm:$0xff] %vm1830_vm5, %v1822_v55  ;;  %v2207_v54 = vmul.f32 0.0625, %v2203_v10  ;;  %v1824_v3 = vmul.f32 %v3512_v2, %v5005_v28  ;;  %v5055_v41 = vmax.f32 %v2078_v50, 0.0  ;;  %vm2088_vm1 = vcmp.eq.f32.partialorder %v5036_v43, 0.0 }
0x18de   :  { %1948 = vst.msk [vmem:[#allocation2] sm:$0xff] %vm1947_vm9, %v4995_v56  ;;  %v2210_v49 = vmul.f32 %v5057_v44, %v5057_v44  ;;  %vm2349_vm11 = vcmask 236768  }
0x18df   :  { %v2211_v16 = vsub.f32 %v2207_v54, %v2209_v1  ;;  %v1826_v52 = vsel %vm1825_vm12, %v5005_v28, %v1824_v3  ;;  %3519 = vrsqrt.f32 %v5055_v41  ;;  %vm2095_vm7 = vcmp.eq.f32.partialorder %v5055_v41, 0.0 }
0x18e0   :  { %v3514_v21 = vpop.eup %3513  ;;  %v2319_v62 = vpop.xlane.xlu1 %2318  ;;  %v1829_v56 = vsel %vm1827_vm15, %v1828_v8, %v1826_v52 }
0x18e1   :  { %v2206_v57 = vpop.xlane.xlu0 %2205  ;;  %v1951_v7 = vmul.f32 %v3514_v21, %v5013_v13  ;;  %v5066_v47 = vmax.f32 %v2211_v16, 0.0  ;;  %1832 = vst.msk [vmem:[#allocation2 + $0x8] sm:$0xff] %vm1830_vm5, %v1829_v56  ;;  %v5072_v12 = vmul.f32 0.0625, %v2319_v62  ;;  %vm2093_vm5 = vcmp.eq.f32.partialorder %v5055_v41, inf }
0x18e2   :  { %v2208_v15 = vmul.f32 0.0625, %v2206_v57  ;;  %1949 = vst.msk [vmem:[#allocation2 + $0x8] sm:$0xff] %vm1947_vm9, %v5007_v26  ;;  %vm2232_vm9 = vcmask 490968  }
0x18e3   :  { %v1953_v6 = vsel %vm1952_vm3, %v5013_v13, %v1951_v7  ;;  %3521 = vrsqrt.f32 %v5066_v47  ;;  %v2343_v5 = vmul.f32 %v5072_v12, %v5072_v12  ;;  %vm2220_vm12 = vcmp.eq.f32.partialorder %v5066_v47, inf }
0x18e4   :  { %v1956_v59 = vsel %vm1954_vm2, %v1955_v18, %v1953_v6  ;;  %v2212_v29 = vsub.f32 %v2208_v15, %v2210_v49  ;;  %v3516_v37 = vpop.eup %3515  ;;  %vm2222_vm15 = vcmp.eq.f32.partialorder %v5066_v47, 0.0 }
0x18e5   :  { %v2337_v0 = vpop.xlane.xlu0 %2336  ;;  %1965 = vst.msk [vmem:[#allocation2] sm:$0xff] %vm1964_vm0, %v1956_v59  ;;  %v1958_v26 = vmul.f32 %v3516_v37, %v5025_v34 }
0x18e6   :  { %v2341_v28 = vmul.f32 0.0625, %v2337_v0  ;;  %2082 = vst.msk [vmem:[#allocation2] sm:$0xff] %vm2081_vm4, %v5015_v14  ;;  %v5085_v45 = vmax.f32 %v2212_v29, 0.0 }
0x18e7   :  { %v1960_v30 = vsel %vm1959_vm6, %v5025_v34, %v1958_v26  ;;  %vm2483_vm6 = vcmask 244968  }
0x18e8   :  { %v2345_v31 = vsub.f32 %v2341_v28, %v2343_v5  ;;  %v3518_v48 = vpop.eup %3517  ;;  %3523 = vrsqrt.f32 %v5085_v45  ;;  %v2322_v23 = vpop.xlane.xlu1 %2321  ;;  %v1963_v13 = vsel %vm1961_vm8, %v1962_v20, %v1960_v30  ;;  %v2230_v10 = vand.u32 2147483648, %v5085_v45 }
0x18e9   :  { %v2085_v14 = vmul.f32 %v3518_v48, %v5036_v43  ;;  %v2324_v51 = vmul.f32 0.0625, %v2322_v23  ;;  %1966 = vst.msk [vmem:[#allocation2 + $0x8] sm:$0xff] %vm1964_vm0, %v1963_v13  ;;  %vm2227_vm0 = vcmp.eq.f32.partialorder %v5085_v45, inf  ;;  %vm2229_vm3 = vcmp.eq.f32.partialorder %v5085_v45, 0.0 }
0x18ea   :  { %v5096_v32 = vmax.f32 %v2345_v31, 0.0  ;;  %v2340_v17 = vpop.xlane.xlu0 %2339  ;;  %2083 = vst.msk [vmem:[#allocation2 + $0x8] sm:$0xff] %vm2081_vm4, %v5027_v35  ;;  %v2096_v35 = vand.u32 2147483648, %v5055_v41  ;;  %vm2366_vm4 = vcmask 499168  }
0x18eb   :  { %v2087_v33 = vsel %vm2086_vm14, %v5036_v43, %v2085_v14  ;;  %v2344_v46 = vmul.f32 %v2324_v51, %v2324_v51  ;;  %v2342_v58 = vmul.f32 0.0625, %v2340_v17  ;;  %v2223_v43 = vand.u32 2147483648, %v5066_v47 }
0x18ec   :  { %v2090_v63 = vsel %vm2088_vm1, %v2089_v53, %v2087_v33  ;;  %3525 = vrsqrt.f32 %v5096_v32  ;;  %v3520_v22 = vpop.eup %3519  ;;  %vm2354_vm2 = vcmp.eq.f32.partialorder %v5096_v32, inf  ;;  %vm2356_vm8 = vcmp.eq.f32.partialorder %v5096_v32, 0.0 }
0x18ed   :  { %2099 = vst.msk [vmem:[#allocation2] sm:$0xff] %vm2098_vm10, %v2090_v63  ;;  %v2346_v34 = vsub.f32 %v2342_v58, %v2344_v46  ;;  %v2092_v9 = vmul.f32 %v3520_v22, %v5055_v41  ;;  %vm2500_vm14 = vcmask 507368   ;;  %vm2617_vm1 = vcmask 253168  }
0x18ee   :  { %2216 = vst.msk [vmem:[#allocation2] sm:$0xff] %vm2215_vm13, %v5042_v40 }
0x18ef   :  { %v5109_v60 = vmax.f32 %v2346_v34, 0.0  ;;  %v2094_v39 = vsel %vm2093_vm5, %v5055_v41, %v2092_v9 }
0x18f0   :  { %v3522_v36 = vpop.eup %3521  ;;  %v2453_v24 = vpop.xlane.xlu1 %2452  ;;  %v2097_v25 = vsel %vm2095_vm7, %v2096_v35, %v2094_v39 }
0x18f1   :  { %v2219_v61 = vmul.f32 %v3522_v36, %v5066_v47  ;;  %3527 = vrsqrt.f32 %v5109_v60  ;;  %v2457_v19 = vmul.f32 0.0625, %v2453_v24  ;;  %2100 = vst.msk [vmem:[#allocation2 + $0x8] sm:$0xff] %vm2098_vm10, %v2097_v25  ;;  %vm2361_vm10 = vcmp.eq.f32.partialorder %v5109_v60, inf }
0x18f2   :  { %v2471_v27 = vpop.xlane.xlu0 %2470  ;;  %2217 = vst.msk [vmem:[#allocation2 + $0x8] sm:$0xff] %vm2215_vm13, %v5057_v44  ;;  %v2357_v44 = vand.u32 2147483648, %v5096_v32  ;;  %v2364_v49 = vand.u32 2147483648, %v5109_v60  ;;  %vm2363_vm13 = vcmp.eq.f32.partialorder %v5109_v60, 0.0 }
0x18f3   :  { %v2221_v38 = vsel %vm2220_vm12, %v5066_v47, %v2219_v61  ;;  %v2477_v40 = vmul.f32 %v2457_v19, %v2457_v19  ;;  %v2475_v42 = vmul.f32 0.0625, %v2471_v27  ;;  %vm2634_vm12 = vcmask 515568  }
0x18f4   :  { %v2224_v11 = vsel %vm2222_vm15, %v2223_v43, %v2221_v38 }
0x18f5   :  { %v3524_v4 = vpop.eup %3523  ;;  %2233 = vst.msk [vmem:[#allocation2] sm:$0xff] %vm2232_vm9, %v2224_v11  ;;  %v2479_v55 = vsub.f32 %v2475_v42, %v2477_v40 }
0x18f6   :  { %2350 = vst.msk [vmem:[#allocation2] sm:$0xff] %vm2349_vm11, %v5072_v12  ;;  %v2226_v50 = vmul.f32 %v3524_v4, %v5085_v45 }
0x18f7   :  { %v2481_v2 = vmax.f32 %v2479_v55, 0.0 }
0x18f8   :  { %v2228_v1 = vsel %vm2227_vm0, %v5085_v45, %v2226_v50  ;;  %vm2751_vm0 = vcmask 261368  }
0x18f9   :  { %v3526_v54 = vpop.eup %3525  ;;  %v2231_v3 = vsel %vm2229_vm3, %v2230_v10, %v2228_v1  ;;  %3529 = vrsqrt.f32 %v2481_v2  ;;  %vm2488_vm5 = vcmp.eq.f32.partialorder %v2481_v2, inf  ;;  %vm2490_vm7 = vcmp.eq.f32.partialorder %v2481_v2, 0.0 }
0x18fa   :  { %2234 = vst.msk [vmem:[#allocation2 + $0x8] sm:$0xff] %vm2232_vm9, %v2231_v3  ;;  %v2353_v41 = vmul.f32 %v3526_v54, %v5096_v32 }
0x18fb   :  { %2351 = vst.msk [vmem:[#allocation2 + $0x8] sm:$0xff] %vm2349_vm11, %v2324_v51  ;;  %v2456_v8 = vpop.xlane.xlu1 %2455  ;;  %v2491_v51 = vand.u32 2147483648, %v2481_v2 }
0x18fc   :  { %v2355_v16 = vsel %vm2354_vm2, %v5096_v32, %v2353_v41  ;;  %v2458_v21 = vmul.f32 0.0625, %v2456_v8 }
0x18fd   :  { %v2358_v52 = vsel %vm2356_vm8, %v2357_v44, %v2355_v16  ;;  %v2474_v62 = vpop.xlane.xlu0 %2473  ;;  %vm2768_vm8 = vcmask 523768  }
0x18fe   :  { %v3528_v57 = vpop.eup %3527  ;;  %2367 = vst.msk [vmem:[#allocation2] sm:$0xff] %vm2366_vm4, %v2358_v52  ;;  %v2478_v56 = vmul.f32 %v2458_v21, %v2458_v21  ;;  %v2476_v7 = vmul.f32 0.0625, %v2474_v62 }
0x18ff   :  { %v2360_v47 = vmul.f32 %v3528_v57, %v5109_v60  ;;  %2484 = vst.msk [vmem:[#allocation2] sm:$0xff] %vm2483_vm6, %v2457_v19  ;;  %v2587_v18 = vpop.xlane.xlu1 %2586 }
0x1900   :  { %v2480_v12 = vsub.f32 %v2476_v7, %v2478_v56  ;;  %v2591_v15 = vmul.f32 0.0625, %v2587_v18 }
0x1901   :  { %v2362_v6 = vsel %vm2361_vm10, %v5109_v60, %v2360_v47  ;;  %v2605_v59 = vpop.xlane.xlu0 %2604 }
0x1902   :  { %v2365_v29 = vsel %vm2363_vm13, %v2364_v49, %v2362_v6  ;;  %v2482_v0 = vmax.f32 %v2480_v12, 0.0  ;;  %v2611_v37 = vmul.f32 %v2591_v15, %v2591_v15  ;;  %v2609_v5 = vmul.f32 0.0625, %v2605_v59 }
0x1903   :  { %2368 = vst.msk [vmem:[#allocation2 + $0x8] sm:$0xff] %vm2366_vm4, %v2365_v29  ;;  %v2590_v28 = vpop.xlane.xlu1 %2589  ;;  %v2892_v29 = vld [vmem:[#allocation9 + $0x18] sm:$0xff] }
0x1904   :  { %2485 = vst.msk [vmem:[#allocation2 + $0x8] sm:$0xff] %vm2483_vm6, %v2458_v21  ;;  %3531 = vrsqrt.f32 %v2482_v0  ;;  %v2613_v26 = vsub.f32 %v2609_v5, %v2611_v37  ;;  %v2592_v45 = vmul.f32 0.0625, %v2590_v28  ;;  %vm2495_vm9 = vcmp.eq.f32.partialorder %v2482_v0, inf  ;;  %3202 = vmatprep.subr.mxu1 %v2892_v29  ;;  %v2890_v37 = vld [vmem:[#allocation9 + $0x8] sm:$0xff]  ;;  %v2889_v5 = vld [vmem:[#allocation9] sm:$0xff] }
0x1905   :  { %v2608_v20 = vpop.xlane.xlu0 %2607  ;;  %v2498_v43 = vand.u32 2147483648, %v2482_v0  ;;  %vm2497_vm11 = vcmp.eq.f32.partialorder %v2482_v0, 0.0  ;;  %3203 = vmatpush3.msra.mxu1 %v2892_v29  ;;  %v3079_v28 = vld [vmem:[%s5173_s7] ss:$0 sm:$0xff]  ;;  %s3621_s7 = scalar_lea.vmem %s2995_s2, 256 }
0x1906   :  { %v3530_v31 = vpop.eup %3529  ;;  %v2615_v48 = vmax.f32 %v2613_v26, 0.0  ;;  %v2610_v30 = vmul.f32 0.0625, %v2608_v20  ;;  %v2612_v13 = vmul.f32 %v2592_v45, %v2592_v45  ;;  %p3622_p6 = scmp.ne.s32.totalorder %s2995_s2, %s3621_s7  ;;  %p3627_p8 = scmp.lt.s32.totalorder %s3621_s7, %s3621_s7 }
0x1907   :  { %v2487_v23 = vmul.f32 %v3530_v31, %v2481_v2  ;;  %v2721_v14 = vpop.xlane.xlu1 %2720 }
0x1908   :  { %3533 = vrsqrt.f32 %v2615_v48  ;;  %v2614_v32 = vsub.f32 %v2610_v30, %v2612_v13  ;;  %v2725_v17 = vmul.f32 0.0625, %v2721_v14  ;;  %vm2622_vm15 = vcmp.eq.f32.partialorder %v2615_v48, inf  ;;  %p3628_p9 = por %p3627_p8, %p3626_p7 }
0x1909   :  { %v2489_v53 = vsel %vm2488_vm5, %v2481_v2, %v2487_v23  ;;  %v2739_v33 = vpop.xlane.xlu0 %2738  ;;  %v2625_v4 = vand.u32 2147483648, %v2615_v48  ;;  %vm2624_vm3 = vcmp.eq.f32.partialorder %v2615_v48, 0.0  ;;  %v3080_v23 = vld [vmem:[%s5175_s9] ss:$0 sm:$0xff] }
0x190a   :  { %v2492_v46 = vsel %vm2490_vm7, %v2491_v51, %v2489_v53  ;;  %v2743_v58 = vmul.f32 0.0625, %v2739_v33  ;;  %v2616_v63 = vmax.f32 %v2614_v32, 0.0  ;;  %v2745_v22 = vmul.f32 %v2725_v17, %v2725_v17  ;;  %p3629_p10 = pnand %p3628_p9, %p3622_p6 }
0x190b   :  { %2501 = vst.msk [vmem:[#allocation2] sm:$0xff] %vm2500_vm14, %v2492_v46  ;;  %v2724_v34 = vpop.xlane.xlu1 %2723 }
0x190c   :  { %2618 = vst.msk [vmem:[#allocation2] sm:$0xff] %vm2617_vm1, %v2591_v15  ;;  %v2726_v9 = vmul.f32 0.0625, %v2724_v34  ;;  %3535 = vrsqrt.f32 %v2616_v63  ;;  %v2747_v35 = vsub.f32 %v2743_v58, %v2745_v22  ;;  %vm2629_vm4 = vcmp.eq.f32.partialorder %v2616_v63, inf }
0x190d   :  { %v2632_v1 = vand.u32 2147483648, %v2616_v63  ;;  %vm2631_vm2 = vcmp.eq.f32.partialorder %v2616_v63, 0.0  ;;  %v2780_v47 = vpop.permute.xlu0 %2779 }
0x190e   :  { %v2749_v60 = vmax.f32 %v2747_v35, 0.0  ;;  %v2746_v39 = vmul.f32 %v2726_v9, %v2726_v9 }
0x190f   :  { %v2742_v36 = vpop.xlane.xlu1 %2741 }
0x1910   :  { %v2744_v24 = vmul.f32 0.0625, %v2742_v36  ;;  %3537 = vrsqrt.f32 %v2749_v60  ;;  %vm2756_vm6 = vcmp.eq.f32.partialorder %v2749_v60, inf  ;;  %v2759_v8 = vand.u32 2147483648, %v2749_v60 }
0x1911   :  { %v3532_v25 = vpop.eup %3531  ;;  %vm2758_vm10 = vcmp.eq.f32.partialorder %v2749_v60, 0.0 }
0x1912   :  { %v2494_v61 = vmul.f32 %v3532_v25, %v2482_v0  ;;  %v2748_v19 = vsub.f32 %v2744_v24, %v2746_v39 }
0x1914   :  { %v2496_v27 = vsel %vm2495_vm9, %v2482_v0, %v2494_v61  ;;  %v2750_v38 = vmax.f32 %v2748_v19, 0.0  ;;  %v2891_v0 = vld [vmem:[#allocation9 + $0x10] sm:$0xff] }
0x1915   :  { %v3534_v40 = vpop.eup %3533  ;;  %v2499_v42 = vsel %vm2497_vm11, %v2498_v43, %v2496_v27  ;;  %3204 = vmatprep.subr.mxu1 %v2891_v0 }
0x1916   :  { %v2621_v11 = vmul.f32 %v3534_v40, %v2615_v48  ;;  %2502 = vst.msk [vmem:[#allocation2 + $0x8] sm:$0xff] %vm2500_vm14, %v2499_v42  ;;  %3539 = vrsqrt.f32 %v2750_v38  ;;  %vm2763_vm13 = vcmp.eq.f32.partialorder %v2750_v38, inf  ;;  %v2766_v57 = vand.u32 2147483648, %v2750_v38  ;;  %3205 = vmatpush3.msra.mxu1 %v2891_v0 }
0x1917   :  { %2619 = vst.msk [vmem:[#allocation2 + $0x8] sm:$0xff] %vm2617_vm1, %v2592_v45  ;;  %vm2765_vm14 = vcmp.eq.f32.partialorder %v2750_v38, 0.0  ;;  %vm2784_vm1 = vcmask 261248   ;;  %3206 = vmatprep.subr.mxu1 %v2890_v37 }
0x1918   :  { %v2623_v55 = vsel %vm2622_vm15, %v2615_v48, %v2621_v11  ;;  %3207 = vmatpush3.msra.mxu1 %v2890_v37 }
0x1919   :  { %v2626_v50 = vsel %vm2624_vm3, %v2625_v4, %v2623_v55  ;;  %v3536_v10 = vpop.eup %3535  ;;  %3208 = vmatprep.subr.mxu1 %v2889_v5 }
0x191a   :  { %2635 = vst.msk [vmem:[#allocation2] sm:$0xff] %vm2634_vm12, %v2626_v50  ;;  %v2628_v2 = vmul.f32 %v3536_v10, %v2616_v63  ;;  %3209 = vmatpush3.msra.mxu1 %v2889_v5 }
0x191b   :  { %2752 = vst.msk [vmem:[#allocation2] sm:$0xff] %vm2751_vm0, %v2725_v17 }
0x191c   :  { %v2630_v54 = vsel %vm2629_vm4, %v2616_v63, %v2628_v2 }
0x191d   :  { %v3538_v3 = vpop.eup %3537  ;;  %v2633_v41 = vsel %vm2631_vm2, %v2632_v1, %v2630_v54 }
0x191e   :  { %v2755_v44 = vmul.f32 %v3538_v3, %v2749_v60  ;;  %2636 = vst.msk [vmem:[#allocation2 + $0x8] sm:$0xff] %vm2634_vm12, %v2633_v41 }
0x191f   :  { %2753 = vst.msk [vmem:[#allocation2 + $0x8] sm:$0xff] %vm2751_vm0, %v2726_v9 }
0x1920   :  { %v2757_v16 = vsel %vm2756_vm6, %v2749_v60, %v2755_v44 }
0x1921   :  { %v2760_v21 = vsel %vm2758_vm10, %v2759_v8, %v2757_v16 }
0x1922   :  { %2769 = vst.msk [vmem:[#allocation2] sm:$0xff] %vm2768_vm8, %v2760_v21 }
0x1923   :  { %v3540_v52 = vpop.eup %3539 }
0x1924   :  { %v2762_v62 = vmul.f32 %v3540_v52, %v2750_v38 }
0x1926   :  { %v2764_v56 = vsel %vm2763_vm13, %v2750_v38, %v2762_v62 }
0x1927   :  { %v2767_v7 = vsel %vm2765_vm14, %v2766_v57, %v2764_v56 }
0x1928   :  { %2770 = vst.msk [vmem:[#allocation2 + $0x8] sm:$0xff] %vm2768_vm8, %v2767_v7 }
0x1929   :  { %v2771_v18 = vld [vmem:[#allocation2] sm:$0xff] }
0x192a   :  { %v2782_v49 = vadd.f32 %v2780_v47, %v2771_v18 }
0x192c   :  { %2785 = vst.msk [vmem:[#allocation2] sm:$0xff] %vm2784_vm1, %v2782_v49 }
0x192f   :  { %v2772_v12 = vld [vmem:[#allocation2 + $0x8] sm:$0xff] }
0x1930   :  { %v2783_v15 = vadd.f32 %v2780_v47, %v2772_v12 }
0x1932   :  { %2786 = vst.msk [vmem:[#allocation2 + $0x8] sm:$0xff] %vm2784_vm1, %v2783_v15 }
0x1933   :  { %v2787_v6 = vld [vmem:[#allocation2] sm:$0xff] }
0x1934   :  { %3175 = vmatprep.mubr.f32.mxu0 %v2787_v6 }
0x1939   :  { %v2788_v59 = vld [vmem:[#allocation2 + $0x8] sm:$0xff] }
0x193a   :  { %3176 = vmatmul.mubr.f32.vlgmr.msra.gmra.mxu0 %v2788_v59 }
0x19fa   :  { %v3177_v26 = vpop.f32.mrf.mxu0 }
0x19fb   :  { %v2884_v45 = vadd.f32 %v3177_v26, %v3079_v28 }
0x19fc   :  { %v2878_v20 = vpop.f32.mrf.mxu0 }
0x19fd   :  { %v2879_v31 = vadd.f32 %v3079_v28, %v2878_v20  ;;  %v2888_v30 = vmax.f32 %v2884_v45, 0.0 }
0x19ff   :  { %v2887_v48 = vmax.f32 %v2879_v31, 0.0 }
0x1a01   :  { %3210 = vmatprep.mubr.f32.mxu1 %v2887_v48 }
0x1a02   :  { %3211 = vmatmul.mubr.f32.vlgmr.msra.gmra.mxu1 %v2888_v30 }
0x1ac2   :  { %v3212_v13 = vpop.f32.mrf.mxu1 }
0x1ac3   :  { %v2984_v14 = vadd.f32 %v3212_v13, %v3080_v23 }
0x1ac4   :  { %v2978_v51 = vpop.f32.mrf.mxu1 }
0x1ac5   :  { %2988 = vst [vmem:[#allocation11 + $0x8] sm:$0xff] %v2984_v14  ;;  %v2979_v53 = vadd.f32 %v3080_v23, %v2978_v51 }
0x1ac7   :  { %2987 = vst [vmem:[#allocation11] sm:$0xff] %v2979_v53 }
0x1ac8   :  { %3632 = shalt.err (!%p3629_p10)
}
0x1ac9   :  { %3000 = dma.vmem_to_hbm [thread:$0]  %s2995_s2, 256, %s5176_s10, [#allocation5], %s3651_s18, %s3651_s18, %s3652_s19  }
0x1aca   :  { %3647 = dma.done.wait [#allocation5], 256  }
0x1acb   :  { %3648 = vsyncadd [#allocation5], 4294967040 }
0x1acc   :  { %3004 = vsyncpa [#allocation4], 1 }
0x1acd   :  { %3005 = vsyncpa [#allocation7], 1 }
0x1ace   :  { %3006 = vsyncpa [#allocation10], 1 }
0x1acf   :  { %3007 = vsyncpa [#allocation5], 1 }

</bundles_post_ra>
